<compile_context>
chip_gen: v7x
topology: tpu7x:2x2x1
jax: 0.10.0
libtpu: 0.0.40
codegen_flags: <defaults>
</compile_context>

<pallas_src>
import jax
import jax.numpy as jnp
from jax import lax
from jax.experimental import pallas as pl
from jax.experimental.pallas import tpu as pltpu

# ---------------- configuration (small synthetic moco-v3/mae-style ViT) -------
BATCH = 2
IN_CH = 3
IMG = 16
PATCH = 4
N_PATCH = (IMG // PATCH) ** 2          # 16 patches
TOKENS = N_PATCH + 1                   # +1 cls token -> 17
T_PAD = 24                             # token axis padded to a multiple of 8
BT = BATCH * T_PAD                     # 48 rows for all token-wise matmuls
PATCH_DIM = IN_CH * PATCH * PATCH      # 48
DIM = 32                               # feat_dim
HEADS = 2
HEAD_DIM = DIM // HEADS                # 16
DEPTH = 2
MLP_HIDDEN = 4 * DIM                   # 128
NUM_CLASSES = 10
OUT_PAD = 128                          # lane-dense padded logits width
LN_EPS = 1e-6
SCALE = HEAD_DIM ** -0.5
VEC_LANES = 128

# ---------------- packed small-vector layout (rows of a (24,128) f32 array) ----
R_NORM_W = 0
R_NORM_B = 1
R_HEAD_B1 = 2
R_HEAD_B2 = 3
R_BLOCK0 = 4
# per-block row offsets
R_LN1W, R_LN1B, R_LN2W, R_LN2B = 0, 1, 2, 3
R_BQKV = 4
R_BPROJ = 5
R_B1 = 6
R_B2 = 7
ROWS_PER_BLOCK = 8
VEC_ROWS = R_BLOCK0 + DEPTH * ROWS_PER_BLOCK          # 20
VEC_ROWS_PAD = 24

# ---------------- packed weight-slab layout (slabs of a (9,32,128) bf16 stack) --
S_PATCH = 0        # lanes 0:48  = patch_w.T                      (DIM, PATCH_DIM)
S_HEAD1 = 1        # lanes 0:32  = head_w1                        (DIM, DIM)
S_HEAD2 = 2        # lanes 0:128 = head_w2 zero-padded to 128     (DIM, OUT_PAD)
S_BLK0 = 3         # per layer d: +0 = [wqkv | wproj] (32,96 | 32,32)
                   #              +1 = w1   (DIM, MLP_HIDDEN)
                   #              +2 = w2.T (DIM, MLP_HIDDEN)
SLABS_PER_BLOCK = 3
N_SLABS = S_BLK0 + DEPTH * SLABS_PER_BLOCK            # 9


# ---------------- fused Pallas kernel -------------------------------------------
def fused_vit_kernel(patches_ref, base_ref, wstack_ref, vec_ref, o_ref):
    vp = vec_ref[...]                                    # (VEC_ROWS_PAD, 128) f32

    def vrow(row, width):                                # (1, width) packed vector
        return vp[row:row + 1, :width]

    def layernorm(z, w, b):
        mu = jnp.mean(z, axis=-1, keepdims=True)
        var = jnp.mean(jnp.square(z - mu), axis=-1, keepdims=True)
        return (z - mu) * lax.rsqrt(var + LN_EPS) * w + b

    # ---- patch embed: (48,48)bf16 x (32,48)bf16 contracted on last dims -> (48,32)
    patch_wT = wstack_ref[S_PATCH][:, :PATCH_DIM]
    x = lax.dot_general(patches_ref[...], patch_wT, (((1,), (1,)), ((), ())),
                        preferred_element_type=jnp.float32) + base_ref[...]

    # ---- block-diagonal additive attention mask (built once, no int div/mod) ----
    qi = lax.broadcasted_iota(jnp.int32, (BT, BT), 0)
    kj = lax.broadcasted_iota(jnp.int32, (BT, BT), 1)
    allow = None
    for b in range(BATCH):
        lo = b * T_PAD
        blk = ((qi >= lo) & (qi < lo + T_PAD)
               & (kj >= lo) & (kj < lo + TOKENS))        # same image & real key
        allow = blk if allow is None else (allow | blk)
    attn_mask = jnp.where(allow, 0.0, -1e30)             # (BT, BT) f32

    for d in range(DEPTH):                               # static unroll over layers
        rb = R_BLOCK0 + d * ROWS_PER_BLOCK
        slab_a = wstack_ref[S_BLK0 + d * SLABS_PER_BLOCK]        # [wqkv | wproj]
        slab_w1 = wstack_ref[S_BLK0 + d * SLABS_PER_BLOCK + 1]
        slab_w2t = wstack_ref[S_BLK0 + d * SLABS_PER_BLOCK + 2]

        # ---------------- attention branch ----------------
        xn = layernorm(x, vrow(rb + R_LN1W, DIM), vrow(rb + R_LN1B, DIM))
        xn_b = xn.astype(jnp.bfloat16)
        # single 128-lane-wide push: lanes 0:96 = qkv, lanes 96:128 discarded
        qkvp = jnp.dot(xn_b, slab_a, preferred_element_type=jnp.float32)
        qkv = qkvp[:, :3 * DIM] + vrow(rb + R_BQKV, 3 * DIM)     # (BT, 96) f32

        head_outs = []
        for h in range(HEADS):                           # static unroll over heads
            sl = slice(h * HEAD_DIM, (h + 1) * HEAD_DIM)
            q_b = (qkv[:, sl] * SCALE).astype(jnp.bfloat16)
            k_b = qkv[:, DIM + h * HEAD_DIM: DIM + (h + 1) * HEAD_DIM].astype(jnp.bfloat16)
            v_b = qkv[:, 2 * DIM + h * HEAD_DIM: 2 * DIM + (h + 1) * HEAD_DIM].astype(jnp.bfloat16)
            # one block-diagonal (BT,BT) score matmul, contracting last dims
            s = lax.dot_general(q_b, k_b, (((1,), (1,)), ((), ())),
                                preferred_element_type=jnp.float32)
            s = s + attn_mask
            s = s - jnp.max(s, axis=-1, keepdims=True)
            p = jnp.exp(s)
            p = p * pl.reciprocal(jnp.sum(p, axis=-1, keepdims=True), approx=True)
            head_outs.append(jnp.dot(p.astype(jnp.bfloat16), v_b,
                                     preferred_element_type=jnp.float32))
        head_cat = jnp.concatenate(head_outs, axis=-1)   # (BT, DIM) f32
        attn_out = jnp.dot(head_cat.astype(jnp.bfloat16), slab_a[:, 3 * DIM:],
                           preferred_element_type=jnp.float32)
        x = x + attn_out + vrow(rb + R_BPROJ, DIM)

        # ---------------- MLP branch ----------------
        xn2 = layernorm(x, vrow(rb + R_LN2W, DIM), vrow(rb + R_LN2B, DIM))
        h1 = (jnp.dot(xn2.astype(jnp.bfloat16), slab_w1,
                      preferred_element_type=jnp.float32)
              + vrow(rb + R_B1, MLP_HIDDEN))
        # TODO(synk): PyTorch nn.GELU defaults to exact erf; tanh approximation
        # used since erf lowering is not guaranteed in Mosaic.
        h1 = jax.nn.gelu(h1, approximate=True)
        mlp_out = lax.dot_general(h1.astype(jnp.bfloat16), slab_w2t,
                                  (((1,), (1,)), ((), ())),
                                  preferred_element_type=jnp.float32)
        x = x + mlp_out + vrow(rb + R_B2, DIM)

    # ---------------- final norm on cls tokens + classification head -----------
    cls = jnp.concatenate([x[b * T_PAD:b * T_PAD + 1, :] for b in range(BATCH)],
                          axis=0)                        # (BATCH, DIM)
    cls = layernorm(cls, vrow(R_NORM_W, DIM), vrow(R_NORM_B, DIM))
    hid = (jnp.dot(cls.astype(jnp.bfloat16), wstack_ref[S_HEAD1][:, :DIM],
                   preferred_element_type=jnp.float32)
           + vrow(R_HEAD_B1, DIM))
    hid = jnp.maximum(hid, 0.0)                          # ReLU
    o_ref[...] = (jnp.dot(hid.astype(jnp.bfloat16), wstack_ref[S_HEAD2],
                          preferred_element_type=jnp.float32)
                  + vrow(R_HEAD_B2, OUT_PAD))            # (BATCH, OUT_PAD)


# ---------------- pallas_call wrapper (the whole forward = ONE kernel) ----------
def _full(shape):
    n = len(shape)
    return pl.BlockSpec(shape, lambda i, _n=n: (0,) * _n)


def ssl_vit_forward(x_nchw, prep):
    B = x_nchw.shape[0]
    assert B == BATCH
    # patch extraction glue: NCHW -> (B, N, C*P*P) via reshape/transpose, then a
    # plain pad (1 zero cls row before, T_PAD-1-N zero pad rows after) -- no scatter.
    p = x_nchw.reshape(B, IN_CH, IMG // PATCH, PATCH, IMG // PATCH, PATCH)
    p = p.transpose(0, 2, 4, 1, 3, 5).reshape(B, N_PATCH, PATCH_DIM)
    p = jnp.pad(p.astype(jnp.float32), ((0, 0), (1, T_PAD - 1 - N_PATCH), (0, 0)))
    patches = p.reshape(B * T_PAD, PATCH_DIM).astype(jnp.bfloat16)

    logits_pad = pl.pallas_call(
        fused_vit_kernel,
        out_shape=jax.ShapeDtypeStruct((B, OUT_PAD), jnp.float32),
        grid=(1,),
        in_specs=[_full((BT, PATCH_DIM)),                      # patches (bf16)
                  _full((BT, DIM)),                            # base (cls/pos/bias)
                  _full((N_SLABS, DIM, VEC_LANES)),            # packed weight slabs
                  _full((VEC_ROWS_PAD, VEC_LANES))],           # packed small vecs
        out_specs=_full((B, OUT_PAD)),
        compiler_params=pltpu.CompilerParams(
            dimension_semantics=("arbitrary",)),
    )(patches, prep['base'], prep['wstack'], prep['vec'])

    return logits_pad[:, :NUM_CLASSES]


# ---------------- deterministic parameter init (same semantics as before) -------
def init_params(key):
    keys = jax.random.split(key, 8 + DEPTH)

    def nrm(k, shape, s=0.02):
        return (s * jax.random.normal(k, shape)).astype(jnp.float32)

    params = {
        'patch_w': nrm(keys[0], (PATCH_DIM, DIM)),
        'patch_b': jnp.zeros((1, DIM), jnp.float32),
        'cls_token': nrm(keys[1], (1, 1, DIM)),
        'pos_embed': nrm(keys[2], (1, TOKENS, DIM)),
        'norm_w': jnp.ones((1, DIM), jnp.float32),
        'norm_b': jnp.zeros((1, DIM), jnp.float32),
        'head_w1': nrm(keys[3], (DIM, DIM)),
        'head_b1': jnp.zeros((1, DIM), jnp.float32),
        'head_w2': nrm(keys[4], (DIM, NUM_CLASSES)),
        'head_b2': jnp.full((1, NUM_CLASSES), 0.01, jnp.float32),  # special_bias
        'blocks': [],
    }
    for d in range(DEPTH):
        bk = jax.random.split(keys[8 + d], 4)
        params['blocks'].append({
            'ln1_w': jnp.ones((1, DIM), jnp.float32),
            'ln1_b': jnp.zeros((1, DIM), jnp.float32),
            'wqkv': nrm(bk[0], (DIM, 3 * DIM)),
            'bqkv': jnp.zeros((1, 3 * DIM), jnp.float32),
            'wproj': nrm(bk[1], (DIM, DIM)),
            'bproj': jnp.zeros((1, DIM), jnp.float32),
            'ln2_w': jnp.ones((1, DIM), jnp.float32),
            'ln2_b': jnp.zeros((1, DIM), jnp.float32),
            'w1': nrm(bk[2], (DIM, MLP_HIDDEN)),
            'b1': jnp.zeros((1, MLP_HIDDEN), jnp.float32),
            'w2': nrm(bk[3], (MLP_HIDDEN, DIM)),
            'b2': jnp.zeros((1, DIM), jnp.float32),
        })
    return params


# ---------------- one-time parameter repacking (outside the jitted forward) -----
def prepare_params(params):
    vec = jnp.zeros((VEC_ROWS_PAD, VEC_LANES), jnp.float32)

    def setrow(v, row, arr):
        arr = jnp.asarray(arr, jnp.float32).reshape(-1)
        return v.at[row, :arr.shape[0]].set(arr)

    vec = setrow(vec, R_NORM_W, params['norm_w'])
    vec = setrow(vec, R_NORM_B, params['norm_b'])
    vec = setrow(vec, R_HEAD_B1, params['head_b1'])
    vec = setrow(vec, R_HEAD_B2, params['head_b2'])

    slabs = []
    s = jnp.zeros((DIM, VEC_LANES), jnp.float32)
    slabs.append(s.at[:, :PATCH_DIM].set(params['patch_w'].T))            # S_PATCH
    s = jnp.zeros((DIM, VEC_LANES), jnp.float32)
    slabs.append(s.at[:, :DIM].set(params['head_w1']))                    # S_HEAD1
    s = jnp.zeros((DIM, VEC_LANES), jnp.float32)
    slabs.append(s.at[:, :NUM_CLASSES].set(params['head_w2']))            # S_HEAD2

    for d, blk in enumerate(params['blocks']):
        rb = R_BLOCK0 + d * ROWS_PER_BLOCK
        vec = setrow(vec, rb + R_LN1W, blk['ln1_w'])
        vec = setrow(vec, rb + R_LN1B, blk['ln1_b'])
        vec = setrow(vec, rb + R_LN2W, blk['ln2_w'])
        vec = setrow(vec, rb + R_LN2B, blk['ln2_b'])
        vec = setrow(vec, rb + R_BQKV, blk['bqkv'])
        vec = setrow(vec, rb + R_BPROJ, blk['bproj'])
        vec = setrow(vec, rb + R_B1, blk['b1'])
        vec = setrow(vec, rb + R_B2, blk['b2'])

        s = jnp.zeros((DIM, VEC_LANES), jnp.float32)
        s = s.at[:, :3 * DIM].set(blk['wqkv'])           # lanes 0:96  = wqkv
        s = s.at[:, 3 * DIM:].set(blk['wproj'])          # lanes 96:128 = wproj
        slabs.append(s)
        slabs.append(blk['w1'])                          # (32, 128)
        slabs.append(blk['w2'].T)                        # (32, 128)

    wstack = jnp.stack(slabs).astype(jnp.bfloat16)       # (N_SLABS, 32, 128) bf16

    # "base" = cls_token+pos[0] at token 0, patch_b+pos[1:] at tokens 1..N, 0 at pad
    base_single = jnp.zeros((T_PAD, DIM), jnp.float32)
    base_single = base_single.at[0].set(params['cls_token'].reshape(DIM)
                                        + params['pos_embed'][0, 0])
    base_single = base_single.at[1:1 + N_PATCH].set(params['patch_b'].reshape(1, DIM)
                                                    + params['pos_embed'][0, 1:])
    base = jnp.tile(base_single, (BATCH, 1))             # (BT, DIM) f32

    return {'base': base, 'wstack': wstack, 'vec': vec}


if __name__ == "__main__":
    key = jax.random.PRNGKey(0)
    pkey, xkey = jax.random.split(key)
    params = init_params(pkey)
    prep = prepare_params(params)
    x = jax.random.normal(xkey, (BATCH, IN_CH, IMG, IMG), jnp.float32)

    out = jax.jit(ssl_vit_forward)(x, prep)
    out = jax.block_until_ready(out)
    assert out.shape == (BATCH, NUM_CLASSES), out.shape
    assert bool(jnp.all(jnp.isfinite(out)))
    print("KERNEL_OK")
</pallas_src>

<mosaic_0001>
module attributes {stable_mosaic.version = 11 : i64} {
  func.func @fused_vit_kernel(%arg0: i32, %arg1: memref<48x48xbf16, #tpu.memory_space<vmem>>, %arg2: memref<48x32xf32, #tpu.memory_space<vmem>>, %arg3: memref<9x32x128xbf16, #tpu.memory_space<vmem>>, %arg4: memref<24x128xf32, #tpu.memory_space<vmem>>, %arg5: memref<2x128xf32, #tpu.memory_space<vmem>>) attributes {dimension_semantics = [#tpu.dimension_semantics<arbitrary>], iteration_bounds = array<i64: 1>, scalar_prefetch = 0 : i64, scratch_operands = 0 : i64, tpu.core_type = #tpu.core_type<tc>, window_params = [{pipeline_mode = #tpu.pipeline_mode<synchronous>, transform_indices = @transform_0, window_bounds = array<i64: 48, 48>}, {pipeline_mode = #tpu.pipeline_mode<synchronous>, transform_indices = @transform_1, window_bounds = array<i64: 48, 32>}, {pipeline_mode = #tpu.pipeline_mode<synchronous>, transform_indices = @transform_2, window_bounds = array<i64: 9, 32, 128>}, {pipeline_mode = #tpu.pipeline_mode<synchronous>, transform_indices = @transform_3, window_bounds = array<i64: 24, 128>}, {pipeline_mode = #tpu.pipeline_mode<synchronous>, transform_indices = @transform_4, window_bounds = array<i64: 2, 128>}]} {
    %c0 = arith.constant 0 : index
    %c0_0 = arith.constant 0 : index
    %0 = vector.load %arg4[%c0, %c0_0] : memref<24x128xf32, #tpu.memory_space<vmem>>, vector<24x128xf32>
    %c0_1 = arith.constant 0 : index
    %c0_2 = arith.constant 0 : index
    %c0_3 = arith.constant 0 : index
    %1 = vector.load %arg3[%c0_1, %c0_2, %c0_3] : memref<9x32x128xbf16, #tpu.memory_space<vmem>>, vector<1x32x128xbf16>
    %2 = vector.shape_cast %1 : vector<1x32x128xbf16> to vector<32x128xbf16>
    %3 = vector.extract_strided_slice %2 {offsets = [0, 0], sizes = [32, 48], strides = [1, 1]} : vector<32x128xbf16> to vector<32x48xbf16>
    %c0_4 = arith.constant 0 : index
    %c0_5 = arith.constant 0 : index
    %4 = vector.load %arg1[%c0_4, %c0_5] : memref<48x48xbf16, #tpu.memory_space<vmem>>, vector<48x48xbf16>
    %cst = arith.constant dense<0.000000e+00> : vector<48x32xf32>
    %5 = tpu.matmul %4, %3, %cst {dimension_numbers = #tpu.dot_dimension_numbers<[1], [1], [0], [0], [0, 0, 1, 0], [], []>} : vector<48x48xbf16>, vector<32x48xbf16>, vector<48x32xf32> -> vector<48x32xf32>
    %c0_6 = arith.constant 0 : index
    %c0_7 = arith.constant 0 : index
    %6 = vector.load %arg2[%c0_6, %c0_7] : memref<48x32xf32, #tpu.memory_space<vmem>>, vector<48x32xf32>
    %7 = arith.addf %5, %6 : vector<48x32xf32>
    %8 = tpu.iota {dimensions = array<i32: 0>} : vector<48x48xi32>
    %9 = tpu.iota {dimensions = array<i32: 1>} : vector<48x48xi32>
    %c0_i32 = arith.constant 0 : i32
    %10 = vector.broadcast %c0_i32 : i32 to vector<48x48xi32>
    %11 = arith.cmpi sge, %8, %10 : vector<48x48xi32>
    %c24_i32 = arith.constant 24 : i32
    %12 = vector.broadcast %c24_i32 : i32 to vector<48x48xi32>
    %13 = arith.cmpi slt, %8, %12 : vector<48x48xi32>
    %14 = arith.andi %11, %13 : vector<48x48xi1>
    %c0_i32_8 = arith.constant 0 : i32
    %15 = vector.broadcast %c0_i32_8 : i32 to vector<48x48xi32>
    %16 = arith.cmpi sge, %9, %15 : vector<48x48xi32>
    %17 = arith.andi %14, %16 : vector<48x48xi1>
    %c17_i32 = arith.constant 17 : i32
    %18 = vector.broadcast %c17_i32 : i32 to vector<48x48xi32>
    %19 = arith.cmpi slt, %9, %18 : vector<48x48xi32>
    %20 = arith.andi %17, %19 : vector<48x48xi1>
    %c24_i32_9 = arith.constant 24 : i32
    %21 = vector.broadcast %c24_i32_9 : i32 to vector<48x48xi32>
    %22 = arith.cmpi sge, %8, %21 : vector<48x48xi32>
    %c48_i32 = arith.constant 48 : i32
    %23 = vector.broadcast %c48_i32 : i32 to vector<48x48xi32>
    %24 = arith.cmpi slt, %8, %23 : vector<48x48xi32>
    %25 = arith.andi %22, %24 : vector<48x48xi1>
    %c24_i32_10 = arith.constant 24 : i32
    %26 = vector.broadcast %c24_i32_10 : i32 to vector<48x48xi32>
    %27 = arith.cmpi sge, %9, %26 : vector<48x48xi32>
    %28 = arith.andi %25, %27 : vector<48x48xi1>
    %c41_i32 = arith.constant 41 : i32
    %29 = vector.broadcast %c41_i32 : i32 to vector<48x48xi32>
    %30 = arith.cmpi slt, %9, %29 : vector<48x48xi32>
    %31 = arith.andi %28, %30 : vector<48x48xi1>
    %32 = arith.ori %20, %31 : vector<48x48xi1>
    %cst_11 = arith.constant 0.000000e+00 : f32
    %cst_12 = arith.constant -1.000000e+30 : f32
    %33 = vector.broadcast %cst_11 : f32 to vector<48x48xf32>
    %34 = vector.broadcast %cst_12 : f32 to vector<48x48xf32>
    %35 = arith.select %32, %33, %34 : vector<48x48xi1>, vector<48x48xf32>
    %c3 = arith.constant 3 : index
    %c0_13 = arith.constant 0 : index
    %c0_14 = arith.constant 0 : index
    %36 = vector.load %arg3[%c3, %c0_13, %c0_14] : memref<9x32x128xbf16, #tpu.memory_space<vmem>>, vector<1x32x128xbf16>
    %37 = vector.shape_cast %36 : vector<1x32x128xbf16> to vector<32x128xbf16>
    %c4 = arith.constant 4 : index
    %c0_15 = arith.constant 0 : index
    %c0_16 = arith.constant 0 : index
    %38 = vector.load %arg3[%c4, %c0_15, %c0_16] : memref<9x32x128xbf16, #tpu.memory_space<vmem>>, vector<1x32x128xbf16>
    %39 = vector.shape_cast %38 : vector<1x32x128xbf16> to vector<32x128xbf16>
    %c5 = arith.constant 5 : index
    %c0_17 = arith.constant 0 : index
    %c0_18 = arith.constant 0 : index
    %40 = vector.load %arg3[%c5, %c0_17, %c0_18] : memref<9x32x128xbf16, #tpu.memory_space<vmem>>, vector<1x32x128xbf16>
    %41 = vector.shape_cast %40 : vector<1x32x128xbf16> to vector<32x128xbf16>
    %42 = vector.extract_strided_slice %0 {offsets = [4, 0], sizes = [1, 32], strides = [1, 1]} : vector<24x128xf32> to vector<1x32xf32>
    %43 = vector.extract_strided_slice %0 {offsets = [5, 0], sizes = [1, 32], strides = [1, 1]} : vector<24x128xf32> to vector<1x32xf32>
    %cst_19 = arith.constant dense<0.000000e+00> : vector<48xf32>
    %44 = vector.multi_reduction <add>, %7, %cst_19 [1] : vector<48x32xf32> to vector<48xf32>
    %45 = vector.shape_cast %44 : vector<48xf32> to vector<48x1xf32>
    %cst_20 = arith.constant 3.200000e+01 : f32
    %46 = vector.broadcast %cst_20 : f32 to vector<48x1xf32>
    %47 = arith.divf %45, %46 : vector<48x1xf32>
    %48 = vector.broadcast %47 : vector<48x1xf32> to vector<48x32xf32>
    %49 = arith.subf %7, %48 : vector<48x32xf32>
    %50 = arith.mulf %49, %49 : vector<48x32xf32>
    %cst_21 = arith.constant dense<0.000000e+00> : vector<48xf32>
    %51 = vector.multi_reduction <add>, %50, %cst_21 [1] : vector<48x32xf32> to vector<48xf32>
    %52 = vector.shape_cast %51 : vector<48xf32> to vector<48x1xf32>
    %cst_22 = arith.constant 3.200000e+01 : f32
    %53 = vector.broadcast %cst_22 : f32 to vector<48x1xf32>
    %54 = arith.divf %52, %53 : vector<48x1xf32>
    %55 = vector.broadcast %47 : vector<48x1xf32> to vector<48x32xf32>
    %56 = arith.subf %7, %55 : vector<48x32xf32>
    %cst_23 = arith.constant 9.99999997E-7 : f32
    %57 = vector.broadcast %cst_23 : f32 to vector<48x1xf32>
    %58 = arith.addf %54, %57 : vector<48x1xf32>
    %59 = math.rsqrt %58 : vector<48x1xf32>
    %60 = vector.broadcast %59 : vector<48x1xf32> to vector<48x32xf32>
    %61 = arith.mulf %56, %60 : vector<48x32xf32>
    %62 = vector.broadcast %42 : vector<1x32xf32> to vector<48x32xf32>
    %63 = arith.mulf %61, %62 : vector<48x32xf32>
    %64 = vector.broadcast %43 : vector<1x32xf32> to vector<48x32xf32>
    %65 = arith.addf %63, %64 : vector<48x32xf32>
    %66 = arith.truncf %65 : vector<48x32xf32> to vector<48x32xbf16>
    %cst_24 = arith.constant dense<0.000000e+00> : vector<48x128xf32>
    %67 = tpu.matmul %66, %37, %cst_24 {dimension_numbers = #tpu.dot_dimension_numbers<[1], [0], [0], [1], [0, 0, 1, 1], [], []>} : vector<48x32xbf16>, vector<32x128xbf16>, vector<48x128xf32> -> vector<48x128xf32>
    %68 = vector.extract_strided_slice %67 {offsets = [0, 0], sizes = [48, 96], strides = [1, 1]} : vector<48x128xf32> to vector<48x96xf32>
    %69 = vector.extract_strided_slice %0 {offsets = [8, 0], sizes = [1, 96], strides = [1, 1]} : vector<24x128xf32> to vector<1x96xf32>
    %70 = vector.broadcast %69 : vector<1x96xf32> to vector<48x96xf32>
    %71 = arith.addf %68, %70 : vector<48x96xf32>
    %72 = vector.extract_strided_slice %71 {offsets = [0, 0], sizes = [48, 16], strides = [1, 1]} : vector<48x96xf32> to vector<48x16xf32>
    %cst_25 = arith.constant 2.500000e-01 : f32
    %73 = vector.broadcast %cst_25 : f32 to vector<48x16xf32>
    %74 = arith.mulf %72, %73 : vector<48x16xf32>
    %75 = arith.truncf %74 : vector<48x16xf32> to vector<48x16xbf16>
    %76 = vector.extract_strided_slice %71 {offsets = [0, 32], sizes = [48, 16], strides = [1, 1]} : vector<48x96xf32> to vector<48x16xf32>
    %77 = arith.truncf %76 : vector<48x16xf32> to vector<48x16xbf16>
    %78 = vector.extract_strided_slice %71 {offsets = [0, 64], sizes = [48, 16], strides = [1, 1]} : vector<48x96xf32> to vector<48x16xf32>
    %79 = arith.truncf %78 : vector<48x16xf32> to vector<48x16xbf16>
    %cst_26 = arith.constant dense<0.000000e+00> : vector<48x48xf32>
    %80 = tpu.matmul %75, %77, %cst_26 {dimension_numbers = #tpu.dot_dimension_numbers<[1], [1], [0], [0], [0, 0, 1, 0], [], []>} : vector<48x16xbf16>, vector<48x16xbf16>, vector<48x48xf32> -> vector<48x48xf32>
    %81 = arith.addf %80, %35 : vector<48x48xf32>
    %cst_27 = arith.constant dense<0xFF800000> : vector<48xf32>
    %82 = vector.multi_reduction <maximumf>, %81, %cst_27 [1] : vector<48x48xf32> to vector<48xf32>
    %83 = vector.shape_cast %82 : vector<48xf32> to vector<48x1xf32>
    %84 = vector.broadcast %83 : vector<48x1xf32> to vector<48x48xf32>
    %85 = arith.subf %81, %84 : vector<48x48xf32>
    %86 = math.exp %85 : vector<48x48xf32>
    %cst_28 = arith.constant dense<0.000000e+00> : vector<48xf32>
    %87 = vector.multi_reduction <add>, %86, %cst_28 [1] : vector<48x48xf32> to vector<48xf32>
    %88 = vector.shape_cast %87 : vector<48xf32> to vector<48x1xf32>
    %89 = tpu.reciprocal %88 {approx = true} : vector<48x1xf32> -> vector<48x1xf32>
    %90 = vector.broadcast %89 : vector<48x1xf32> to vector<48x48xf32>
    %91 = arith.mulf %86, %90 : vector<48x48xf32>
    %92 = arith.truncf %91 : vector<48x48xf32> to vector<48x48xbf16>
    %cst_29 = arith.constant dense<0.000000e+00> : vector<48x16xf32>
    %93 = tpu.matmul %92, %79, %cst_29 {dimension_numbers = #tpu.dot_dimension_numbers<[1], [0], [0], [1], [0, 0, 1, 1], [], []>} : vector<48x48xbf16>, vector<48x16xbf16>, vector<48x16xf32> -> vector<48x16xf32>
    %94 = vector.extract_strided_slice %71 {offsets = [0, 16], sizes = [48, 16], strides = [1, 1]} : vector<48x96xf32> to vector<48x16xf32>
    %cst_30 = arith.constant 2.500000e-01 : f32
    %95 = vector.broadcast %cst_30 : f32 to vector<48x16xf32>
    %96 = arith.mulf %94, %95 : vector<48x16xf32>
    %97 = arith.truncf %96 : vector<48x16xf32> to vector<48x16xbf16>
    %98 = vector.extract_strided_slice %71 {offsets = [0, 48], sizes = [48, 16], strides = [1, 1]} : vector<48x96xf32> to vector<48x16xf32>
    %99 = arith.truncf %98 : vector<48x16xf32> to vector<48x16xbf16>
    %100 = vector.extract_strided_slice %71 {offsets = [0, 80], sizes = [48, 16], strides = [1, 1]} : vector<48x96xf32> to vector<48x16xf32>
    %101 = arith.truncf %100 : vector<48x16xf32> to vector<48x16xbf16>
    %cst_31 = arith.constant dense<0.000000e+00> : vector<48x48xf32>
    %102 = tpu.matmul %97, %99, %cst_31 {dimension_numbers = #tpu.dot_dimension_numbers<[1], [1], [0], [0], [0, 0, 1, 0], [], []>} : vector<48x16xbf16>, vector<48x16xbf16>, vector<48x48xf32> -> vector<48x48xf32>
    %103 = arith.addf %102, %35 : vector<48x48xf32>
    %cst_32 = arith.constant dense<0xFF800000> : vector<48xf32>
    %104 = vector.multi_reduction <maximumf>, %103, %cst_32 [1] : vector<48x48xf32> to vector<48xf32>
    %105 = vector.shape_cast %104 : vector<48xf32> to vector<48x1xf32>
    %106 = vector.broadcast %105 : vector<48x1xf32> to vector<48x48xf32>
    %107 = arith.subf %103, %106 : vector<48x48xf32>
    %108 = math.exp %107 : vector<48x48xf32>
    %cst_33 = arith.constant dense<0.000000e+00> : vector<48xf32>
    %109 = vector.multi_reduction <add>, %108, %cst_33 [1] : vector<48x48xf32> to vector<48xf32>
    %110 = vector.shape_cast %109 : vector<48xf32> to vector<48x1xf32>
    %111 = tpu.reciprocal %110 {approx = true} : vector<48x1xf32> -> vector<48x1xf32>
    %112 = vector.broadcast %111 : vector<48x1xf32> to vector<48x48xf32>
    %113 = arith.mulf %108, %112 : vector<48x48xf32>
    %114 = arith.truncf %113 : vector<48x48xf32> to vector<48x48xbf16>
    %cst_34 = arith.constant dense<0.000000e+00> : vector<48x16xf32>
    %115 = tpu.matmul %114, %101, %cst_34 {dimension_numbers = #tpu.dot_dimension_numbers<[1], [0], [0], [1], [0, 0, 1, 1], [], []>} : vector<48x48xbf16>, vector<48x16xbf16>, vector<48x16xf32> -> vector<48x16xf32>
    %116 = tpu.concatenate %93, %115 in 1 : vector<48x16xf32>, vector<48x16xf32> -> vector<48x32xf32>
    %117 = arith.truncf %116 : vector<48x32xf32> to vector<48x32xbf16>
    %118 = vector.extract_strided_slice %37 {offsets = [0, 96], sizes = [32, 32], strides = [1, 1]} : vector<32x128xbf16> to vector<32x32xbf16>
    %cst_35 = arith.constant dense<0.000000e+00> : vector<48x32xf32>
    %119 = tpu.matmul %117, %118, %cst_35 {dimension_numbers = #tpu.dot_dimension_numbers<[1], [0], [0], [1], [0, 0, 1, 1], [], []>} : vector<48x32xbf16>, vector<32x32xbf16>, vector<48x32xf32> -> vector<48x32xf32>
    %120 = arith.addf %7, %119 : vector<48x32xf32>
    %121 = vector.extract_strided_slice %0 {offsets = [9, 0], sizes = [1, 32], strides = [1, 1]} : vector<24x128xf32> to vector<1x32xf32>
    %122 = vector.broadcast %121 : vector<1x32xf32> to vector<48x32xf32>
    %123 = arith.addf %120, %122 : vector<48x32xf32>
    %124 = vector.extract_strided_slice %0 {offsets = [6, 0], sizes = [1, 32], strides = [1, 1]} : vector<24x128xf32> to vector<1x32xf32>
    %125 = vector.extract_strided_slice %0 {offsets = [7, 0], sizes = [1, 32], strides = [1, 1]} : vector<24x128xf32> to vector<1x32xf32>
    %cst_36 = arith.constant dense<0.000000e+00> : vector<48xf32>
    %126 = vector.multi_reduction <add>, %123, %cst_36 [1] : vector<48x32xf32> to vector<48xf32>
    %127 = vector.shape_cast %126 : vector<48xf32> to vector<48x1xf32>
    %cst_37 = arith.constant 3.200000e+01 : f32
    %128 = vector.broadcast %cst_37 : f32 to vector<48x1xf32>
    %129 = arith.divf %127, %128 : vector<48x1xf32>
    %130 = vector.broadcast %129 : vector<48x1xf32> to vector<48x32xf32>
    %131 = arith.subf %123, %130 : vector<48x32xf32>
    %132 = arith.mulf %131, %131 : vector<48x32xf32>
    %cst_38 = arith.constant dense<0.000000e+00> : vector<48xf32>
    %133 = vector.multi_reduction <add>, %132, %cst_38 [1] : vector<48x32xf32> to vector<48xf32>
    %134 = vector.shape_cast %133 : vector<48xf32> to vector<48x1xf32>
    %cst_39 = arith.constant 3.200000e+01 : f32
    %135 = vector.broadcast %cst_39 : f32 to vector<48x1xf32>
    %136 = arith.divf %134, %135 : vector<48x1xf32>
    %137 = vector.broadcast %129 : vector<48x1xf32> to vector<48x32xf32>
    %138 = arith.subf %123, %137 : vector<48x32xf32>
    %cst_40 = arith.constant 9.99999997E-7 : f32
    %139 = vector.broadcast %cst_40 : f32 to vector<48x1xf32>
    %140 = arith.addf %136, %139 : vector<48x1xf32>
    %141 = math.rsqrt %140 : vector<48x1xf32>
    %142 = vector.broadcast %141 : vector<48x1xf32> to vector<48x32xf32>
    %143 = arith.mulf %138, %142 : vector<48x32xf32>
    %144 = vector.broadcast %124 : vector<1x32xf32> to vector<48x32xf32>
    %145 = arith.mulf %143, %144 : vector<48x32xf32>
    %146 = vector.broadcast %125 : vector<1x32xf32> to vector<48x32xf32>
    %147 = arith.addf %145, %146 : vector<48x32xf32>
    %148 = arith.truncf %147 : vector<48x32xf32> to vector<48x32xbf16>
    %cst_41 = arith.constant dense<0.000000e+00> : vector<48x128xf32>
    %149 = tpu.matmul %148, %39, %cst_41 {dimension_numbers = #tpu.dot_dimension_numbers<[1], [0], [0], [1], [0, 0, 1, 1], [], []>} : vector<48x32xbf16>, vector<32x128xbf16>, vector<48x128xf32> -> vector<48x128xf32>
    %150 = vector.extract_strided_slice %0 {offsets = [10, 0], sizes = [1, 128], strides = [1, 1]} : vector<24x128xf32> to vector<1x128xf32>
    %151 = vector.broadcast %150 : vector<1x128xf32> to vector<48x128xf32>
    %152 = arith.addf %149, %151 : vector<48x128xf32>
    %153 = arith.mulf %152, %152 : vector<48x128xf32>
    %154 = arith.mulf %152, %153 : vector<48x128xf32>
    %cst_42 = arith.constant 4.471500e-02 : f32
    %155 = vector.broadcast %cst_42 : f32 to vector<48x128xf32>
    %156 = arith.mulf %155, %154 : vector<48x128xf32>
    %157 = arith.addf %152, %156 : vector<48x128xf32>
    %cst_43 = arith.constant 0.797884583 : f32
    %158 = vector.broadcast %cst_43 : f32 to vector<48x128xf32>
    %159 = arith.mulf %158, %157 : vector<48x128xf32>
    %160 = math.tanh %159 : vector<48x128xf32>
    %cst_44 = arith.constant 1.000000e+00 : f32
    %161 = vector.broadcast %cst_44 : f32 to vector<48x128xf32>
    %162 = arith.addf %161, %160 : vector<48x128xf32>
    %cst_45 = arith.constant 5.000000e-01 : f32
    %163 = vector.broadcast %cst_45 : f32 to vector<48x128xf32>
    %164 = arith.mulf %163, %162 : vector<48x128xf32>
    %165 = arith.mulf %152, %164 : vector<48x128xf32>
    %166 = arith.truncf %165 : vector<48x128xf32> to vector<48x128xbf16>
    %cst_46 = arith.constant dense<0.000000e+00> : vector<48x32xf32>
    %167 = tpu.matmul %166, %41, %cst_46 {dimension_numbers = #tpu.dot_dimension_numbers<[1], [1], [0], [0], [0, 0, 1, 0], [], []>} : vector<48x128xbf16>, vector<32x128xbf16>, vector<48x32xf32> -> vector<48x32xf32>
    %168 = arith.addf %123, %167 : vector<48x32xf32>
    %169 = vector.extract_strided_slice %0 {offsets = [11, 0], sizes = [1, 32], strides = [1, 1]} : vector<24x128xf32> to vector<1x32xf32>
    %170 = vector.broadcast %169 : vector<1x32xf32> to vector<48x32xf32>
    %171 = arith.addf %168, %170 : vector<48x32xf32>
    %c6 = arith.constant 6 : index
    %c0_47 = arith.constant 0 : index
    %c0_48 = arith.constant 0 : index
    %172 = vector.load %arg3[%c6, %c0_47, %c0_48] : memref<9x32x128xbf16, #tpu.memory_space<vmem>>, vector<1x32x128xbf16>
    %173 = vector.shape_cast %172 : vector<1x32x128xbf16> to vector<32x128xbf16>
    %c7 = arith.constant 7 : index
    %c0_49 = arith.constant 0 : index
    %c0_50 = arith.constant 0 : index
    %174 = vector.load %arg3[%c7, %c0_49, %c0_50] : memref<9x32x128xbf16, #tpu.memory_space<vmem>>, vector<1x32x128xbf16>
    %175 = vector.shape_cast %174 : vector<1x32x128xbf16> to vector<32x128xbf16>
    %c8 = arith.constant 8 : index
    %c0_51 = arith.constant 0 : index
    %c0_52 = arith.constant 0 : index
    %176 = vector.load %arg3[%c8, %c0_51, %c0_52] : memref<9x32x128xbf16, #tpu.memory_space<vmem>>, vector<1x32x128xbf16>
    %177 = vector.shape_cast %176 : vector<1x32x128xbf16> to vector<32x128xbf16>
    %178 = vector.extract_strided_slice %0 {offsets = [12, 0], sizes = [1, 32], strides = [1, 1]} : vector<24x128xf32> to vector<1x32xf32>
    %179 = vector.extract_strided_slice %0 {offsets = [13, 0], sizes = [1, 32], strides = [1, 1]} : vector<24x128xf32> to vector<1x32xf32>
    %cst_53 = arith.constant dense<0.000000e+00> : vector<48xf32>
    %180 = vector.multi_reduction <add>, %171, %cst_53 [1] : vector<48x32xf32> to vector<48xf32>
    %181 = vector.shape_cast %180 : vector<48xf32> to vector<48x1xf32>
    %cst_54 = arith.constant 3.200000e+01 : f32
    %182 = vector.broadcast %cst_54 : f32 to vector<48x1xf32>
    %183 = arith.divf %181, %182 : vector<48x1xf32>
    %184 = vector.broadcast %183 : vector<48x1xf32> to vector<48x32xf32>
    %185 = arith.subf %171, %184 : vector<48x32xf32>
    %186 = arith.mulf %185, %185 : vector<48x32xf32>
    %cst_55 = arith.constant dense<0.000000e+00> : vector<48xf32>
    %187 = vector.multi_reduction <add>, %186, %cst_55 [1] : vector<48x32xf32> to vector<48xf32>
    %188 = vector.shape_cast %187 : vector<48xf32> to vector<48x1xf32>
    %cst_56 = arith.constant 3.200000e+01 : f32
    %189 = vector.broadcast %cst_56 : f32 to vector<48x1xf32>
    %190 = arith.divf %188, %189 : vector<48x1xf32>
    %191 = vector.broadcast %183 : vector<48x1xf32> to vector<48x32xf32>
    %192 = arith.subf %171, %191 : vector<48x32xf32>
    %cst_57 = arith.constant 9.99999997E-7 : f32
    %193 = vector.broadcast %cst_57 : f32 to vector<48x1xf32>
    %194 = arith.addf %190, %193 : vector<48x1xf32>
    %195 = math.rsqrt %194 : vector<48x1xf32>
    %196 = vector.broadcast %195 : vector<48x1xf32> to vector<48x32xf32>
    %197 = arith.mulf %192, %196 : vector<48x32xf32>
    %198 = vector.broadcast %178 : vector<1x32xf32> to vector<48x32xf32>
    %199 = arith.mulf %197, %198 : vector<48x32xf32>
    %200 = vector.broadcast %179 : vector<1x32xf32> to vector<48x32xf32>
    %201 = arith.addf %199, %200 : vector<48x32xf32>
    %202 = arith.truncf %201 : vector<48x32xf32> to vector<48x32xbf16>
    %cst_58 = arith.constant dense<0.000000e+00> : vector<48x128xf32>
    %203 = tpu.matmul %202, %173, %cst_58 {dimension_numbers = #tpu.dot_dimension_numbers<[1], [0], [0], [1], [0, 0, 1, 1], [], []>} : vector<48x32xbf16>, vector<32x128xbf16>, vector<48x128xf32> -> vector<48x128xf32>
    %204 = vector.extract_strided_slice %203 {offsets = [0, 0], sizes = [48, 96], strides = [1, 1]} : vector<48x128xf32> to vector<48x96xf32>
    %205 = vector.extract_strided_slice %0 {offsets = [16, 0], sizes = [1, 96], strides = [1, 1]} : vector<24x128xf32> to vector<1x96xf32>
    %206 = vector.broadcast %205 : vector<1x96xf32> to vector<48x96xf32>
    %207 = arith.addf %204, %206 : vector<48x96xf32>
    %208 = vector.extract_strided_slice %207 {offsets = [0, 0], sizes = [48, 16], strides = [1, 1]} : vector<48x96xf32> to vector<48x16xf32>
    %cst_59 = arith.constant 2.500000e-01 : f32
    %209 = vector.broadcast %cst_59 : f32 to vector<48x16xf32>
    %210 = arith.mulf %208, %209 : vector<48x16xf32>
    %211 = arith.truncf %210 : vector<48x16xf32> to vector<48x16xbf16>
    %212 = vector.extract_strided_slice %207 {offsets = [0, 32], sizes = [48, 16], strides = [1, 1]} : vector<48x96xf32> to vector<48x16xf32>
    %213 = arith.truncf %212 : vector<48x16xf32> to vector<48x16xbf16>
    %214 = vector.extract_strided_slice %207 {offsets = [0, 64], sizes = [48, 16], strides = [1, 1]} : vector<48x96xf32> to vector<48x16xf32>
    %215 = arith.truncf %214 : vector<48x16xf32> to vector<48x16xbf16>
    %cst_60 = arith.constant dense<0.000000e+00> : vector<48x48xf32>
    %216 = tpu.matmul %211, %213, %cst_60 {dimension_numbers = #tpu.dot_dimension_numbers<[1], [1], [0], [0], [0, 0, 1, 0], [], []>} : vector<48x16xbf16>, vector<48x16xbf16>, vector<48x48xf32> -> vector<48x48xf32>
    %217 = arith.addf %216, %35 : vector<48x48xf32>
    %cst_61 = arith.constant dense<0xFF800000> : vector<48xf32>
    %218 = vector.multi_reduction <maximumf>, %217, %cst_61 [1] : vector<48x48xf32> to vector<48xf32>
    %219 = vector.shape_cast %218 : vector<48xf32> to vector<48x1xf32>
    %220 = vector.broadcast %219 : vector<48x1xf32> to vector<48x48xf32>
    %221 = arith.subf %217, %220 : vector<48x48xf32>
    %222 = math.exp %221 : vector<48x48xf32>
    %cst_62 = arith.constant dense<0.000000e+00> : vector<48xf32>
    %223 = vector.multi_reduction <add>, %222, %cst_62 [1] : vector<48x48xf32> to vector<48xf32>
    %224 = vector.shape_cast %223 : vector<48xf32> to vector<48x1xf32>
    %225 = tpu.reciprocal %224 {approx = true} : vector<48x1xf32> -> vector<48x1xf32>
    %226 = vector.broadcast %225 : vector<48x1xf32> to vector<48x48xf32>
    %227 = arith.mulf %222, %226 : vector<48x48xf32>
    %228 = arith.truncf %227 : vector<48x48xf32> to vector<48x48xbf16>
    %cst_63 = arith.constant dense<0.000000e+00> : vector<48x16xf32>
    %229 = tpu.matmul %228, %215, %cst_63 {dimension_numbers = #tpu.dot_dimension_numbers<[1], [0], [0], [1], [0, 0, 1, 1], [], []>} : vector<48x48xbf16>, vector<48x16xbf16>, vector<48x16xf32> -> vector<48x16xf32>
    %230 = vector.extract_strided_slice %207 {offsets = [0, 16], sizes = [48, 16], strides = [1, 1]} : vector<48x96xf32> to vector<48x16xf32>
    %cst_64 = arith.constant 2.500000e-01 : f32
    %231 = vector.broadcast %cst_64 : f32 to vector<48x16xf32>
    %232 = arith.mulf %230, %231 : vector<48x16xf32>
    %233 = arith.truncf %232 : vector<48x16xf32> to vector<48x16xbf16>
    %234 = vector.extract_strided_slice %207 {offsets = [0, 48], sizes = [48, 16], strides = [1, 1]} : vector<48x96xf32> to vector<48x16xf32>
    %235 = arith.truncf %234 : vector<48x16xf32> to vector<48x16xbf16>
    %236 = vector.extract_strided_slice %207 {offsets = [0, 80], sizes = [48, 16], strides = [1, 1]} : vector<48x96xf32> to vector<48x16xf32>
    %237 = arith.truncf %236 : vector<48x16xf32> to vector<48x16xbf16>
    %cst_65 = arith.constant dense<0.000000e+00> : vector<48x48xf32>
    %238 = tpu.matmul %233, %235, %cst_65 {dimension_numbers = #tpu.dot_dimension_numbers<[1], [1], [0], [0], [0, 0, 1, 0], [], []>} : vector<48x16xbf16>, vector<48x16xbf16>, vector<48x48xf32> -> vector<48x48xf32>
    %239 = arith.addf %238, %35 : vector<48x48xf32>
    %cst_66 = arith.constant dense<0xFF800000> : vector<48xf32>
    %240 = vector.multi_reduction <maximumf>, %239, %cst_66 [1] : vector<48x48xf32> to vector<48xf32>
    %241 = vector.shape_cast %240 : vector<48xf32> to vector<48x1xf32>
    %242 = vector.broadcast %241 : vector<48x1xf32> to vector<48x48xf32>
    %243 = arith.subf %239, %242 : vector<48x48xf32>
    %244 = math.exp %243 : vector<48x48xf32>
    %cst_67 = arith.constant dense<0.000000e+00> : vector<48xf32>
    %245 = vector.multi_reduction <add>, %244, %cst_67 [1] : vector<48x48xf32> to vector<48xf32>
    %246 = vector.shape_cast %245 : vector<48xf32> to vector<48x1xf32>
    %247 = tpu.reciprocal %246 {approx = true} : vector<48x1xf32> -> vector<48x1xf32>
    %248 = vector.broadcast %247 : vector<48x1xf32> to vector<48x48xf32>
    %249 = arith.mulf %244, %248 : vector<48x48xf32>
    %250 = arith.truncf %249 : vector<48x48xf32> to vector<48x48xbf16>
    %cst_68 = arith.constant dense<0.000000e+00> : vector<48x16xf32>
    %251 = tpu.matmul %250, %237, %cst_68 {dimension_numbers = #tpu.dot_dimension_numbers<[1], [0], [0], [1], [0, 0, 1, 1], [], []>} : vector<48x48xbf16>, vector<48x16xbf16>, vector<48x16xf32> -> vector<48x16xf32>
    %252 = tpu.concatenate %229, %251 in 1 : vector<48x16xf32>, vector<48x16xf32> -> vector<48x32xf32>
    %253 = arith.truncf %252 : vector<48x32xf32> to vector<48x32xbf16>
    %254 = vector.extract_strided_slice %173 {offsets = [0, 96], sizes = [32, 32], strides = [1, 1]} : vector<32x128xbf16> to vector<32x32xbf16>
    %cst_69 = arith.constant dense<0.000000e+00> : vector<48x32xf32>
    %255 = tpu.matmul %253, %254, %cst_69 {dimension_numbers = #tpu.dot_dimension_numbers<[1], [0], [0], [1], [0, 0, 1, 1], [], []>} : vector<48x32xbf16>, vector<32x32xbf16>, vector<48x32xf32> -> vector<48x32xf32>
    %256 = arith.addf %171, %255 : vector<48x32xf32>
    %257 = vector.extract_strided_slice %0 {offsets = [17, 0], sizes = [1, 32], strides = [1, 1]} : vector<24x128xf32> to vector<1x32xf32>
    %258 = vector.broadcast %257 : vector<1x32xf32> to vector<48x32xf32>
    %259 = arith.addf %256, %258 : vector<48x32xf32>
    %260 = vector.extract_strided_slice %0 {offsets = [14, 0], sizes = [1, 32], strides = [1, 1]} : vector<24x128xf32> to vector<1x32xf32>
    %261 = vector.extract_strided_slice %0 {offsets = [15, 0], sizes = [1, 32], strides = [1, 1]} : vector<24x128xf32> to vector<1x32xf32>
    %cst_70 = arith.constant dense<0.000000e+00> : vector<48xf32>
    %262 = vector.multi_reduction <add>, %259, %cst_70 [1] : vector<48x32xf32> to vector<48xf32>
    %263 = vector.shape_cast %262 : vector<48xf32> to vector<48x1xf32>
    %cst_71 = arith.constant 3.200000e+01 : f32
    %264 = vector.broadcast %cst_71 : f32 to vector<48x1xf32>
    %265 = arith.divf %263, %264 : vector<48x1xf32>
    %266 = vector.broadcast %265 : vector<48x1xf32> to vector<48x32xf32>
    %267 = arith.subf %259, %266 : vector<48x32xf32>
    %268 = arith.mulf %267, %267 : vector<48x32xf32>
    %cst_72 = arith.constant dense<0.000000e+00> : vector<48xf32>
    %269 = vector.multi_reduction <add>, %268, %cst_72 [1] : vector<48x32xf32> to vector<48xf32>
    %270 = vector.shape_cast %269 : vector<48xf32> to vector<48x1xf32>
    %cst_73 = arith.constant 3.200000e+01 : f32
    %271 = vector.broadcast %cst_73 : f32 to vector<48x1xf32>
    %272 = arith.divf %270, %271 : vector<48x1xf32>
    %273 = vector.broadcast %265 : vector<48x1xf32> to vector<48x32xf32>
    %274 = arith.subf %259, %273 : vector<48x32xf32>
    %cst_74 = arith.constant 9.99999997E-7 : f32
    %275 = vector.broadcast %cst_74 : f32 to vector<48x1xf32>
    %276 = arith.addf %272, %275 : vector<48x1xf32>
    %277 = math.rsqrt %276 : vector<48x1xf32>
    %278 = vector.broadcast %277 : vector<48x1xf32> to vector<48x32xf32>
    %279 = arith.mulf %274, %278 : vector<48x32xf32>
    %280 = vector.broadcast %260 : vector<1x32xf32> to vector<48x32xf32>
    %281 = arith.mulf %279, %280 : vector<48x32xf32>
    %282 = vector.broadcast %261 : vector<1x32xf32> to vector<48x32xf32>
    %283 = arith.addf %281, %282 : vector<48x32xf32>
    %284 = arith.truncf %283 : vector<48x32xf32> to vector<48x32xbf16>
    %cst_75 = arith.constant dense<0.000000e+00> : vector<48x128xf32>
    %285 = tpu.matmul %284, %175, %cst_75 {dimension_numbers = #tpu.dot_dimension_numbers<[1], [0], [0], [1], [0, 0, 1, 1], [], []>} : vector<48x32xbf16>, vector<32x128xbf16>, vector<48x128xf32> -> vector<48x128xf32>
    %286 = vector.extract_strided_slice %0 {offsets = [18, 0], sizes = [1, 128], strides = [1, 1]} : vector<24x128xf32> to vector<1x128xf32>
    %287 = vector.broadcast %286 : vector<1x128xf32> to vector<48x128xf32>
    %288 = arith.addf %285, %287 : vector<48x128xf32>
    %289 = arith.mulf %288, %288 : vector<48x128xf32>
    %290 = arith.mulf %288, %289 : vector<48x128xf32>
    %cst_76 = arith.constant 4.471500e-02 : f32
    %291 = vector.broadcast %cst_76 : f32 to vector<48x128xf32>
    %292 = arith.mulf %291, %290 : vector<48x128xf32>
    %293 = arith.addf %288, %292 : vector<48x128xf32>
    %cst_77 = arith.constant 0.797884583 : f32
    %294 = vector.broadcast %cst_77 : f32 to vector<48x128xf32>
    %295 = arith.mulf %294, %293 : vector<48x128xf32>
    %296 = math.tanh %295 : vector<48x128xf32>
    %cst_78 = arith.constant 1.000000e+00 : f32
    %297 = vector.broadcast %cst_78 : f32 to vector<48x128xf32>
    %298 = arith.addf %297, %296 : vector<48x128xf32>
    %cst_79 = arith.constant 5.000000e-01 : f32
    %299 = vector.broadcast %cst_79 : f32 to vector<48x128xf32>
    %300 = arith.mulf %299, %298 : vector<48x128xf32>
    %301 = arith.mulf %288, %300 : vector<48x128xf32>
    %302 = arith.truncf %301 : vector<48x128xf32> to vector<48x128xbf16>
    %cst_80 = arith.constant dense<0.000000e+00> : vector<48x32xf32>
    %303 = tpu.matmul %302, %177, %cst_80 {dimension_numbers = #tpu.dot_dimension_numbers<[1], [1], [0], [0], [0, 0, 1, 0], [], []>} : vector<48x128xbf16>, vector<32x128xbf16>, vector<48x32xf32> -> vector<48x32xf32>
    %304 = arith.addf %259, %303 : vector<48x32xf32>
    %305 = vector.extract_strided_slice %0 {offsets = [19, 0], sizes = [1, 32], strides = [1, 1]} : vector<24x128xf32> to vector<1x32xf32>
    %306 = vector.broadcast %305 : vector<1x32xf32> to vector<48x32xf32>
    %307 = arith.addf %304, %306 : vector<48x32xf32>
    %308 = vector.extract_strided_slice %307 {offsets = [0, 0], sizes = [1, 32], strides = [1, 1]} : vector<48x32xf32> to vector<1x32xf32>
    %309 = vector.extract_strided_slice %307 {offsets = [24, 0], sizes = [1, 32], strides = [1, 1]} : vector<48x32xf32> to vector<1x32xf32>
    %310 = tpu.concatenate %308, %309 in 0 : vector<1x32xf32>, vector<1x32xf32> -> vector<2x32xf32>
    %311 = vector.extract_strided_slice %0 {offsets = [0, 0], sizes = [1, 32], strides = [1, 1]} : vector<24x128xf32> to vector<1x32xf32>
    %312 = vector.extract_strided_slice %0 {offsets = [1, 0], sizes = [1, 32], strides = [1, 1]} : vector<24x128xf32> to vector<1x32xf32>
    %cst_81 = arith.constant dense<0.000000e+00> : vector<2xf32>
    %313 = vector.multi_reduction <add>, %310, %cst_81 [1] : vector<2x32xf32> to vector<2xf32>
    %314 = vector.shape_cast %313 : vector<2xf32> to vector<2x1xf32>
    %cst_82 = arith.constant 3.200000e+01 : f32
    %315 = vector.broadcast %cst_82 : f32 to vector<2x1xf32>
    %316 = arith.divf %314, %315 : vector<2x1xf32>
    %317 = vector.broadcast %316 : vector<2x1xf32> to vector<2x32xf32>
    %318 = arith.subf %310, %317 : vector<2x32xf32>
    %319 = arith.mulf %318, %318 : vector<2x32xf32>
    %cst_83 = arith.constant dense<0.000000e+00> : vector<2xf32>
    %320 = vector.multi_reduction <add>, %319, %cst_83 [1] : vector<2x32xf32> to vector<2xf32>
    %321 = vector.shape_cast %320 : vector<2xf32> to vector<2x1xf32>
    %cst_84 = arith.constant 3.200000e+01 : f32
    %322 = vector.broadcast %cst_84 : f32 to vector<2x1xf32>
    %323 = arith.divf %321, %322 : vector<2x1xf32>
    %324 = vector.broadcast %316 : vector<2x1xf32> to vector<2x32xf32>
    %325 = arith.subf %310, %324 : vector<2x32xf32>
    %cst_85 = arith.constant 9.99999997E-7 : f32
    %326 = vector.broadcast %cst_85 : f32 to vector<2x1xf32>
    %327 = arith.addf %323, %326 : vector<2x1xf32>
    %328 = math.rsqrt %327 : vector<2x1xf32>
    %329 = vector.broadcast %328 : vector<2x1xf32> to vector<2x32xf32>
    %330 = arith.mulf %325, %329 : vector<2x32xf32>
    %331 = vector.broadcast %311 : vector<1x32xf32> to vector<2x32xf32>
    %332 = arith.mulf %330, %331 : vector<2x32xf32>
    %333 = vector.broadcast %312 : vector<1x32xf32> to vector<2x32xf32>
    %334 = arith.addf %332, %333 : vector<2x32xf32>
    %335 = arith.truncf %334 : vector<2x32xf32> to vector<2x32xbf16>
    %c1 = arith.constant 1 : index
    %c0_86 = arith.constant 0 : index
    %c0_87 = arith.constant 0 : index
    %336 = vector.load %arg3[%c1, %c0_86, %c0_87] : memref<9x32x128xbf16, #tpu.memory_space<vmem>>, vector<1x32x128xbf16>
    %337 = vector.shape_cast %336 : vector<1x32x128xbf16> to vector<32x128xbf16>
    %338 = vector.extract_strided_slice %337 {offsets = [0, 0], sizes = [32, 32], strides = [1, 1]} : vector<32x128xbf16> to vector<32x32xbf16>
    %cst_88 = arith.constant dense<0.000000e+00> : vector<2x32xf32>
    %339 = tpu.matmul %335, %338, %cst_88 {dimension_numbers = #tpu.dot_dimension_numbers<[1], [0], [0], [1], [0, 0, 1, 1], [], []>} : vector<2x32xbf16>, vector<32x32xbf16>, vector<2x32xf32> -> vector<2x32xf32>
    %340 = vector.extract_strided_slice %0 {offsets = [2, 0], sizes = [1, 32], strides = [1, 1]} : vector<24x128xf32> to vector<1x32xf32>
    %341 = vector.broadcast %340 : vector<1x32xf32> to vector<2x32xf32>
    %342 = arith.addf %339, %341 : vector<2x32xf32>
    %cst_89 = arith.constant 0.000000e+00 : f32
    %343 = vector.broadcast %cst_89 : f32 to vector<2x32xf32>
    %344 = arith.maximumf %342, %343 : vector<2x32xf32>
    %345 = arith.truncf %344 : vector<2x32xf32> to vector<2x32xbf16>
    %c2 = arith.constant 2 : index
    %c0_90 = arith.constant 0 : index
    %c0_91 = arith.constant 0 : index
    %346 = vector.load %arg3[%c2, %c0_90, %c0_91] : memref<9x32x128xbf16, #tpu.memory_space<vmem>>, vector<1x32x128xbf16>
    %347 = vector.shape_cast %346 : vector<1x32x128xbf16> to vector<32x128xbf16>
    %cst_92 = arith.constant dense<0.000000e+00> : vector<2x128xf32>
    %348 = tpu.matmul %345, %347, %cst_92 {dimension_numbers = #tpu.dot_dimension_numbers<[1], [0], [0], [1], [0, 0, 1, 1], [], []>} : vector<2x32xbf16>, vector<32x128xbf16>, vector<2x128xf32> -> vector<2x128xf32>
    %349 = vector.extract_strided_slice %0 {offsets = [3, 0], sizes = [1, 128], strides = [1, 1]} : vector<24x128xf32> to vector<1x128xf32>
    %350 = vector.broadcast %349 : vector<1x128xf32> to vector<2x128xf32>
    %351 = arith.addf %348, %350 : vector<2x128xf32>
    %c0_93 = arith.constant 0 : index
    %c0_94 = arith.constant 0 : index
    %352 = vector.load %arg5[%c0_93, %c0_94] : memref<2x128xf32, #tpu.memory_space<vmem>>, vector<2x128xf32>
    tpu.vector_store %arg5[%c0_93, %c0_94], %351 {strides = array<i32>} : memref<2x128xf32, #tpu.memory_space<vmem>>, vector<2x128xf32>,
    return
  }
  func.func @transform_0(%arg0: i32) -> (i32, i32) {
    %c0_i32 = arith.constant 0 : i32
    %c0_i32_0 = arith.constant 0 : i32
    %c0_i32_1 = arith.constant 0 : i32
    return %c0_i32, %c0_i32_0 : i32, i32
  }
  func.func @transform_1(%arg0: i32) -> (i32, i32) {
    %c0_i32 = arith.constant 0 : i32
    %c0_i32_0 = arith.constant 0 : i32
    %c0_i32_1 = arith.constant 0 : i32
    return %c0_i32, %c0_i32_0 : i32, i32
  }
  func.func @transform_2(%arg0: i32) -> (i32, i32, i32) {
    %c0_i32 = arith.constant 0 : i32
    %c0_i32_0 = arith.constant 0 : i32
    %c0_i32_1 = arith.constant 0 : i32
    %c0_i32_2 = arith.constant 0 : i32
    return %c0_i32, %c0_i32_0, %c0_i32_1 : i32, i32, i32
  }
  func.func @transform_3(%arg0: i32) -> (i32, i32) {
    %c0_i32 = arith.constant 0 : i32
    %c0_i32_0 = arith.constant 0 : i32
    %c0_i32_1 = arith.constant 0 : i32
    return %c0_i32, %c0_i32_0 : i32, i32
  }
  func.func @transform_4(%arg0: i32) -> (i32, i32) {
    %c0_i32 = arith.constant 0 : i32
    %c0_i32_0 = arith.constant 0 : i32
    %c0_i32_1 = arith.constant 0 : i32
    return %c0_i32, %c0_i32_0 : i32, i32
  }
}

</mosaic_0001>

<bundles_post_ra>
// kernel: ssl_vit_forward.1
= control target key start
LH: loop header
LB: loop body
LE: loop exit
PB: predicated region body
PF: predicated region fallthrough
CT: control target
= control target key end

     0   :  { %v3399_v1 = vmov 0.0   ;;  %vm63_vm0 = vcmask 392192   ;;  %vm3400_vm1 = vmmov 0   ;;  %s4364_s0 = inlined_call_operand.vmem [shape: bf16[48,48], index: 0, kind: input, shape index: {}]   ;;  %s4365_s1 = inlined_call_operand.vmem [shape: f32[48,32], index: 1, kind: input, shape index: {}]   ;;  %s4366_s2 = inlined_call_operand.vmem [shape: bf16[9,32,128], index: 2, kind: input, shape index: {}]   ;;  %s4367_s3 = inlined_call_operand.vmem [shape: f32[24,128], index: 3, kind: input, shape index: {}]   ;;  %s4368_s4 = inlined_call_operand.hbm [shape: f32[2,128], index: 4, kind: output, shape index: {}]  }
   0x1   :  { %v3179_v0 = vld [vmem:[%s4366_s2] sm:$0xff]   ;;  %2834 = vmatprep.subr.bf16.mxu0 %v3399_v1  ;;  %v3180_v2 = vld [vmem:[%s4366_s2 + $0x8] sm:$0xff]   ;;  %2850 = vmatprep.subr.bf16.mxu1 %v3399_v1 }
   0x2   :  { %v74_v3 = vsel %vm63_vm0, %v3179_v0, 0  ;;  %2838 = vmatprep.mubr.msk.bf16.mxu0 %vm3400_vm1, %v3399_v1  ;;  %2854 = vmatprep.mubr.msk.bf16.mxu1 %vm3400_vm1, %v3399_v1  ;;  %v77_v4 = vsel %vm63_vm0, %v3180_v2, 0  ;;  %v3181_v5 = vld [vmem:[%s4364_s0] sm:$0xff]  }
   0x3   :  { %2835 = vmatpush3.bf16.xpose.msra.mxu0 %v74_v3 }
   0x4   :  { %2836 = vmatprep.subr.bf16.mxu0 %v3399_v1 }
   0xb   :  { %2837 = vmatpush3.bf16.xpose.msra.mxu0 %v77_v4 }
   0xc   :  { %2884 = vmatprep.subr.bf16.mxu0 %v3399_v1 }
   0xd   :  { %9 = vsyncpa [#allocation3], 0  ;;  %v3182_v6 = vld [vmem:[%s4364_s0 + $0x8] sm:$0xff]   ;;  %v3183_v7 = vld [vmem:[%s4364_s0 + $0x10] sm:$0xff]   ;;  %vm236_vm2 = vcmask 261120   ;;  %s3401_s17 = smov 96  }
   0xe   :  { %v32_v8 = vld [vmem:[%s4365_s1] sm:$0xff]  ;;  %v33_v10 = vld [vmem:[%s4365_s1 + $0x8] sm:$0xff]  ;;  %v34_v17 = vld [vmem:[%s4365_s1 + $0x10] sm:$0xff]  ;;  %s3402_s18 = smov 80   ;;  %s3403_s19 = smov 112   ;;  %vm448_vm3 = vcmask 130048  }
   0xf   :  { %v35_v20 = vld [vmem:[%s4365_s1 + $0x18] sm:$0xff]  ;;  %v36_v27 = vld [vmem:[%s4365_s1 + $0x20] sm:$0xff]  ;;  %v37_v30 = vld [vmem:[%s4365_s1 + $0x28] sm:$0xff]  ;;  %s3404_s20 = smov 64   ;;  %s3406_s21 = smov 48   ;;  %vm2463_vm8 = vcmask 1040384  }
  0x10   :  { %s3407_s22 = smov 32   ;;  %s3408_s23 = smov 16   ;;  %vm2465_vm9 = vcmask 254976  }
  0x12   :  { %2839 = vmatmul.mubr.msk.bf16.vlgmr.msra.gmra.mrb[0].mxu0 %vm63_vm0, %v3181_v5  ;;  %v3546_v5 = vld [vmem:[%s4366_s2 + $0x30] sm:$0xff]  }
  0x13   :  { %2842 = vmatprep.mubr.msk.bf16.mxu0 %vm3400_vm1, %v3399_v1  ;;  %2851 = vmatpush3.bf16.msra.mxu1 %v3546_v5 }
  0x14   :  { %2852 = vmatprep.subr.bf16.mxu1 %v3399_v1 }
  0x1a   :  { %2843 = vmatmul.mubr.msk.bf16.gmra.mrb[4].mxu0 %vm63_vm0, %v3182_v6  ;;  %v3553_v6 = vld [vmem:[%s4366_s2 + $0x38] sm:$0xff]  }
  0x1b   :  { %2846 = vmatprep.mubr.msk.bf16.mxu0 %vm3400_vm1, %v3399_v1  ;;  %2853 = vmatpush3.bf16.msra.mxu1 %v3553_v6 }
  0x1c   :  { %2866 = vmatprep.subr.bf16.mxu1 %v3399_v1 }
  0x22   :  { %2847 = vmatmul.mubr.msk.bf16.gmra.mrb[8].mxu0 %vm63_vm0, %v3183_v7 }
  0x23   :  { %2890 = vmatprep.mubr.msk.bf16.mxu0 %vm3400_vm1, %v3399_v1 }
  0xe5   :  { %v113_v9 = vpop.f32.mrb[0].mxu0 }
  0xe6   :  { %v3475_v11 = vadd.f32 %v113_v9, %v32_v8  ;;  %v2840_v12 = vpop.f32.mrb[1].mxu0 }
  0xe7   :  { %v116_v13 = vpop.f32.mrb[2].mxu0  ;;  %v143_v12 = vlaneseq }
  0xe8   :  { %v3477_v14 = vadd.f32 %v116_v13, %v33_v10  ;;  %v2841_v15 = vpop.f32.mrb[3].mxu0  ;;  %v237_v16 = vsel %vm236_vm2, %v3475_v11, 0.0 }
  0xe9   :  { %238 = vadd.xlane.f32.xlu0 %v237_v16 }
  0xea   :  { %v240_v18 = vsel %vm236_vm2, %v3477_v14, 0.0 }
  0xed   :  { %241 = vadd.xlane.f32.xlu0 %v240_v18  ;;  %v121_v19 = vpop.f32.mrb[4].mxu0 }
  0xee   :  { %v3489_v21 = vadd.f32 %v121_v19, %v34_v17  ;;  %v2844_v22 = vpop.f32.mrb[5].mxu0  ;;  %v3558_v17 = vshrl.u32 %v143_v12, 7 }
  0xef   :  { %v124_v23 = vpop.f32.mrb[6].mxu0 }
  0xf0   :  { %v3491_v24 = vadd.f32 %v124_v23, %v35_v20  ;;  %v2845_v25 = vpop.f32.mrb[7].mxu0  ;;  %v243_v26 = vsel %vm236_vm2, %v3489_v21, 0.0  ;;  %v318_v22 = vsub.s32 4, %v3558_v17 }
  0xf1   :  { %244 = vadd.xlane.f32.xlu1 %v243_v26  ;;  %v19_v25 = vld [vmem:[%s4367_s3] sm:$0xff] }
  0xf2   :  { %v246_v28 = vsel %vm236_vm2, %v3491_v24, 0.0 }
  0xf5   :  { %247 = vadd.xlane.f32.xlu1 %v246_v28  ;;  %v129_v29 = vpop.f32.mrb[8].mxu0 }
  0xf6   :  { %v3503_v31 = vadd.f32 %v129_v29, %v36_v27  ;;  %v2848_v32 = vpop.f32.mrb[9].mxu0 }
  0xf7   :  { %v132_v33 = vpop.f32.mrb[10].mxu0  ;;  %v328_v32 = vsub.s32 5, %v3558_v17 }
  0xf8   :  { %v3505_v34 = vadd.f32 %v132_v33, %v37_v30  ;;  %v2849_v35 = vpop.f32.mrb[11].mxu0  ;;  %v249_v36 = vsel %vm236_vm2, %v3503_v31, 0.0  ;;  %v319_v30 = vrot.slane %v19_v25, %v318_v22 }
  0xf9   :  { %250 = vadd.xlane.f32.xlu0 %v249_v36 }
  0xfa   :  { %v252_v37 = vsel %vm236_vm2, %v3505_v34, 0.0 }
  0xfb   :  { %253 = vadd.xlane.f32.xlu1 %v252_v37 }
 0x176   :  { %v239_v38 = vpop.xlane.xlu0 %238 }
 0x177   :  { %v256_v39 = vmul.f32 0.03125, %v239_v38 }
 0x179   :  { %v262_v40 = vsub.f32 %v3475_v11, %v256_v39 }
 0x17a   :  { %v242_v41 = vpop.xlane.xlu0 %241 }
 0x17b   :  { %v257_v42 = vmul.f32 0.03125, %v242_v41  ;;  %v268_v43 = vmul.f32 %v262_v40, %v262_v40 }
 0x17d   :  { %v3513_v44 = vsub.f32 %v3477_v14, %v257_v42  ;;  %v274_v45 = vsel %vm236_vm2, %v268_v43, 0.0  ;;  %v329_v42 = vrot.slane %v19_v25, %v328_v32 }
 0x17e   :  { %v245_v46 = vpop.xlane.xlu1 %244  ;;  %275 = vadd.xlane.f32.xlu0 %v274_v45 }
 0x17f   :  { %v258_v47 = vmul.f32 0.03125, %v245_v46  ;;  %v269_v48 = vmul.f32 %v3513_v44, %v3513_v44 }
 0x181   :  { %v3519_v49 = vsub.f32 %v3489_v21, %v258_v47  ;;  %v277_v50 = vsel %vm236_vm2, %v269_v48, 0.0 }
 0x182   :  { %v248_v51 = vpop.xlane.xlu1 %247  ;;  %278 = vadd.xlane.f32.xlu1 %v277_v50 }
 0x183   :  { %v259_v52 = vmul.f32 0.03125, %v248_v51  ;;  %v270_v53 = vmul.f32 %v3519_v49, %v3519_v49 }
 0x185   :  { %v3525_v54 = vsub.f32 %v3491_v24, %v259_v52  ;;  %v280_v55 = vsel %vm236_vm2, %v270_v53, 0.0 }
 0x186   :  { %281 = vadd.xlane.f32.xlu0 %v280_v55  ;;  %v251_v56 = vpop.xlane.xlu0 %250 }
 0x187   :  { %v260_v57 = vmul.f32 0.03125, %v251_v56  ;;  %v271_v58 = vmul.f32 %v3525_v54, %v3525_v54 }
 0x188   :  { %v254_v59 = vpop.xlane.xlu1 %253 }
 0x189   :  { %v3531_v60 = vsub.f32 %v3503_v31, %v260_v57  ;;  %v261_v61 = vmul.f32 0.03125, %v254_v59  ;;  %v283_v62 = vsel %vm236_vm2, %v271_v58, 0.0 }
 0x18a   :  { %284 = vadd.xlane.f32.xlu1 %v283_v62 }
 0x18b   :  { %v3535_v63 = vsub.f32 %v3505_v34, %v261_v61  ;;  %v272_v0 = vmul.f32 %v3531_v60, %v3531_v60 }
 0x18d   :  { %v286_v2 = vsel %vm236_vm2, %v272_v0, 0.0  ;;  %v273_v3 = vmul.f32 %v3535_v63, %v3535_v63 }
 0x18e   :  { %287 = vadd.xlane.f32.xlu0 %v286_v2 }
 0x18f   :  { %v289_v4 = vsel %vm236_vm2, %v273_v3, 0.0 }
 0x190   :  { %290 = vadd.xlane.f32.xlu1 %v289_v4 }
 0x20b   :  { %v276_v7 = vpop.xlane.xlu0 %275 }
 0x20c   :  { %v292_v8 = vmul.f32 0.03125, %v276_v7 }
 0x20e   :  { %v298_v9 = vadd.f32 1e-06, %v292_v8 }
 0x20f   :  { %v279_v10 = vpop.xlane.xlu1 %278 }
 0x210   :  { %3200 = vrsqrt.f32 %v298_v9  ;;  %v293_v13 = vmul.f32 0.03125, %v279_v10 }
 0x212   :  { %v299_v15 = vadd.f32 1e-06, %v293_v13 }
 0x213   :  { %v282_v16 = vpop.xlane.xlu0 %281 }
 0x214   :  { %3202 = vrsqrt.f32 %v299_v15  ;;  %v294_v18 = vmul.f32 0.03125, %v282_v16 }
 0x216   :  { %v300_v19 = vadd.f32 1e-06, %v294_v18 }
 0x217   :  { %v285_v20 = vpop.xlane.xlu1 %284 }
 0x218   :  { %3204 = vrsqrt.f32 %v300_v19  ;;  %v295_v23 = vmul.f32 0.03125, %v285_v20 }
 0x21a   :  { %v3201_v26 = vpop.eup %3200  ;;  %v301_v27 = vadd.f32 1e-06, %v295_v23 }
 0x21b   :  { %v288_v28 = vpop.xlane.xlu0 %287  ;;  %v310_v29 = vmul.f32 %v3201_v26, %v262_v40 }
 0x21c   :  { %3206 = vrsqrt.f32 %v301_v27  ;;  %v296_v33 = vmul.f32 0.03125, %v288_v28 }
 0x21d   :  { %v291_v35 = vpop.xlane.xlu1 %290  ;;  %v320_v41 = vmul.f32 %v319_v30, %v310_v29 }
 0x21e   :  { %v3203_v36 = vpop.eup %3202  ;;  %v302_v37 = vadd.f32 1e-06, %v296_v33  ;;  %v297_v38 = vmul.f32 0.03125, %v291_v35 }
 0x21f   :  { %v311_v39 = vmul.f32 %v3203_v36, %v3513_v44  ;;  %v330_v46 = vadd.f32 %v329_v42, %v320_v41 }
 0x220   :  { %3208 = vrsqrt.f32 %v302_v37  ;;  %v303_v43 = vadd.f32 1e-06, %v297_v38 }
 0x221   :  { %v321_v40 = vmul.f32 %v319_v30, %v311_v39 }
 0x222   :  { %v3205_v45 = vpop.eup %3204  ;;  %3210 = vrsqrt.f32 %v303_v43 }
 0x223   :  { %v331_v47 = vadd.f32 %v329_v42, %v321_v40  ;;  %v312_v48 = vmul.f32 %v3205_v45, %v3519_v49 }
 0x225   :  { %v336_v50 = vpack.c.bf16 %v331_v47, %v330_v46  ;;  %v322_v44 = vmul.f32 %v319_v30, %v312_v48 }
 0x226   :  { %v3207_v51 = vpop.eup %3206 }
 0x227   :  { %2855 = vmatmul.mubr.msk.bf16.vlgmr.msra.gmra.mrb[0].mxu1 %vm236_vm2, %v336_v50  ;;  %v313_v52 = vmul.f32 %v3207_v51, %v3525_v54  ;;  %v332_v56 = vadd.f32 %v329_v42, %v322_v44 }
 0x228   :  { %2858 = vmatprep.mubr.msk.bf16.mxu1 %vm3400_vm1, %v3399_v1 }
 0x229   :  { %v323_v53 = vmul.f32 %v319_v30, %v313_v52 }
 0x22a   :  { %v3209_v55 = vpop.eup %3208 }
 0x22b   :  { %v333_v57 = vadd.f32 %v329_v42, %v323_v53  ;;  %v314_v58 = vmul.f32 %v3209_v55, %v3531_v60  ;;  %v3584_v60 = vsub.s32 0, %v3558_v17 }
 0x22c   :  { %v3211_v59 = vpop.eup %3210 }
 0x22d   :  { %v337_v61 = vpack.c.bf16 %v333_v57, %v332_v56  ;;  %v315_v49 = vmul.f32 %v3211_v59, %v3535_v63  ;;  %v324_v62 = vmul.f32 %v319_v30, %v314_v58  ;;  %v3589_v63 = vld [vmem:[%s4367_s3 + $0x8] sm:$0xff] }
 0x22e   :  { %v420_v4 = vrot.slane %v3589_v63, %v3584_v60 }
 0x22f   :  { %2859 = vmatmul.mubr.msk.bf16.gmra.mrb[4].mxu1 %vm236_vm2, %v337_v61  ;;  %v325_v0 = vmul.f32 %v319_v30, %v315_v49  ;;  %v334_v2 = vadd.f32 %v329_v42, %v324_v62 }
 0x230   :  { %2862 = vmatprep.mubr.msk.bf16.mxu1 %vm3400_vm1, %v3399_v1 }
 0x231   :  { %v335_v54 = vadd.f32 %v329_v42, %v325_v0 }
 0x233   :  { %v338_v3 = vpack.c.bf16 %v335_v54, %v334_v2  ;;  %v144_v2 = vand.u32 127, %v143_v12 }
 0x235   :  { %vm170_vm4 = vcmp.lt.s32.totalorder %v144_v2, 17  ;;  %vm195_vm5 = vcmp.ge.s32.totalorder %v144_v2, 24  ;;  %vm202_vm6 = vcmp.lt.s32.totalorder %v144_v2, 41 }
 0x236   :  { %vm206_vm7 = vmand %vm195_vm5, %vm202_vm6 }
 0x237   :  { %2863 = vmatmul.mubr.msk.bf16.gmra.mrb[8].mxu1 %vm236_vm2, %v338_v3  ;;  %v3405_v3 = vmov -1e+30  }
 0x238   :  { %2872 = vmatprep.mubr.msk.bf16.mxu1 %vm3400_vm1, %v3399_v1 }
 0x2fa   :  { %v394_v7 = vpop.f32.mrb[0].mxu1 }
 0x2fb   :  { %v421_v8 = vadd.f32 %v420_v4, %v394_v7  ;;  %v2856_v9 = vpop.f32.mrb[1].mxu1 }
 0x2fc   :  { %v397_v10 = vpop.f32.mrb[2].mxu1 }
 0x2fd   :  { %v422_v13 = vadd.f32 %v420_v4, %v397_v10  ;;  %v2857_v15 = vpop.f32.mrb[3].mxu1  ;;  %v427_v16 = vmul.f32 0.25, %v421_v8 }
 0x2ff   :  { %v428_v18 = vmul.f32 0.25, %v422_v13  ;;  %v3593_v19 = vpack.c.bf16 %v422_v13, %v421_v8 }
 0x301   :  { %442 = vrot.lane.b32.xlu0 %v3593_v19, %s3401_s17  ;;  %v433_v20 = vpack.c.bf16 %v428_v18, %v427_v16 }
 0x302   :  { %v402_v23 = vpop.f32.mrb[4].mxu1 }
 0x303   :  { %v423_v25 = vadd.f32 %v420_v4, %v402_v23  ;;  %v2860_v26 = vpop.f32.mrb[5].mxu1 }
 0x304   :  { %v405_v27 = vpop.f32.mrb[6].mxu1 }
 0x305   :  { %v424_v28 = vadd.f32 %v420_v4, %v405_v27  ;;  %v2861_v29 = vpop.f32.mrb[7].mxu1  ;;  %v429_v30 = vmul.f32 0.25, %v423_v25 }
 0x307   :  { %v430_v33 = vmul.f32 0.25, %v424_v28  ;;  %v3597_v35 = vpack.c.bf16 %v424_v28, %v423_v25 }
 0x309   :  { %679 = vrot.lane.b32.xlu0 %v3597_v35, %s3402_s18  ;;  %444 = vrot.lane.b32.xlu1 %v3597_v35, %s3401_s17  ;;  %v434_v36 = vpack.c.bf16 %v430_v33, %v429_v30 }
 0x30a   :  { %v410_v37 = vpop.f32.mrb[8].mxu1 }
 0x30b   :  { %v425_v38 = vadd.f32 %v420_v4, %v410_v37  ;;  %v2864_v39 = vpop.f32.mrb[9].mxu1 }
 0x30c   :  { %v413_v41 = vpop.f32.mrb[10].mxu1 }
 0x30d   :  { %v426_v42 = vadd.f32 %v420_v4, %v413_v41  ;;  %671 = vrot.lane.b32.xlu0 %v433_v20, %s3403_s19  ;;  %v2865_v43 = vpop.f32.mrb[11].mxu1  ;;  %v431_v40 = vmul.f32 0.25, %v425_v38  ;;  %v3648_v4 = vsel %vm170_vm4, 0.0, %v3405_v3 }
 0x30f   :  { %v432_v45 = vmul.f32 0.25, %v426_v42  ;;  %v3604_v46 = vpack.c.bf16 %v426_v42, %v425_v38 }
 0x311   :  { %446 = vrot.lane.b32.xlu1 %v3604_v46, %s3401_s17  ;;  %v435_v47 = vpack.c.bf16 %v432_v45, %v431_v40 }
 0x313   :  { %675 = vrot.lane.b32.xlu0 %v435_v47, %s3403_s19 }
 0x315   :  { %677 = vrot.lane.b32.xlu1 %v3593_v19, %s3402_s18 }
 0x319   :  { %681 = vrot.lane.b32.xlu1 %v3604_v46, %s3402_s18 }
 0x31d   :  { %673 = vrot.lane.b32.xlu1 %v434_v36, %s3403_s19 }
 0x321   :  { %593 = vrot.lane.b32.xlu1 %v3593_v19, %s3404_s20 }
 0x373   :  { %v443_v48 = vpop.permute.xlu0 %442 }
 0x374   :  { %v459_v50 = vsel %vm448_vm3, %v443_v48, 0 }
 0x375   :  { %2867 = vmatpush3.bf16.xpose.msra.mxu1 %v459_v50 }
 0x376   :  { %2868 = vmatprep.subr.bf16.mxu1 %v3399_v1 }
 0x37b   :  { %v445_v51 = vpop.permute.xlu1 %444  ;;  %v680_v59 = vpop.permute.xlu0 %679 }
 0x37c   :  { %v462_v52 = vsel %vm448_vm3, %v445_v51, 0  ;;  %v696_v49 = vsel %vm448_vm3, %v680_v59, 0 }
 0x37d   :  { %2869 = vmatpush3.bf16.xpose.msra.mxu1 %v462_v52 }
 0x37e   :  { %2870 = vmatprep.subr.bf16.mxu1 %v3399_v1 }
 0x37f   :  { %v672_v0 = vpop.permute.xlu0 %671 }
 0x383   :  { %v447_v44 = vpop.permute.xlu1 %446 }
 0x384   :  { %v465_v53 = vsel %vm448_vm3, %v447_v44, 0 }
 0x385   :  { %2871 = vmatpush3.bf16.xpose.msra.mxu1 %v465_v53  ;;  %v676_v54 = vpop.permute.xlu0 %675 }
 0x386   :  { %2902 = vmatprep.subr.bf16.mxu1 %v3399_v1 }
 0x387   :  { %v678_v55 = vpop.permute.xlu1 %677 }
 0x388   :  { %v693_v57 = vsel %vm448_vm3, %v678_v55, 0 }
 0x38b   :  { %v682_v56 = vpop.permute.xlu1 %681 }
 0x38c   :  { %2873 = vmatmul.mubr.msk.bf16.vlgmr.msra.gmra.mrb[12].mxu1 %vm448_vm3, %v433_v20  ;;  %v699_v62 = vsel %vm448_vm3, %v682_v56, 0  ;;  %v3660_v20 = vsel %vm206_vm7, 0.0, %v3405_v3 }
 0x38d   :  { %2903 = vmatpush3.bf16.xpose.msra.mxu1 %v693_v57  ;;  %2876 = vmatprep.mubr.msk.bf16.mxu1 %vm3400_vm1, %v3399_v1 }
 0x38e   :  { %2904 = vmatprep.subr.bf16.mxu1 %v3399_v1 }
 0x38f   :  { %v674_v58 = vpop.permute.xlu1 %673 }
 0x393   :  { %v594_v61 = vpop.permute.xlu1 %593 }
 0x394   :  { %2877 = vmatmul.mubr.msk.bf16.gmra.mrb[16].mxu1 %vm448_vm3, %v434_v36  ;;  %2885 = vmatpush3.bf16.msra.mxu0 %v594_v61 }
 0x395   :  { %2905 = vmatpush3.bf16.xpose.msra.mxu1 %v696_v49  ;;  %2880 = vmatprep.mubr.msk.bf16.mxu1 %vm3400_vm1, %v3399_v1 }
 0x396   :  { %2906 = vmatprep.subr.bf16.mxu1 %v3399_v1  ;;  %2886 = vmatprep.subr.bf16.mxu0 %v3399_v1 }
 0x39c   :  { %2881 = vmatmul.mubr.msk.bf16.gmra.mrb[20].mxu1 %vm448_vm3, %v435_v47 }
 0x39d   :  { %2907 = vmatpush3.bf16.xpose.msra.mxu1 %v699_v62  ;;  %2908 = vmatprep.mubr.msk.bf16.mxu1 %vm3400_vm1, %v3399_v1 }
 0x39e   :  { %2938 = vmatprep.subr.bf16.mxu1 %v3399_v1 }
 0x3a4   :  { %2909 = vmatmul.mubr.msk.bf16.vlgmr.msra.gmra.mrb[24].mxu1 %vm448_vm3, %v672_v0 }
 0x3a5   :  { %2912 = vmatprep.mubr.msk.bf16.mxu1 %vm3400_vm1, %v3399_v1 }
 0x3ac   :  { %2913 = vmatmul.mubr.msk.bf16.gmra.mrb[28].mxu1 %vm448_vm3, %v674_v58 }
 0x3ad   :  { %2916 = vmatprep.mubr.msk.bf16.mxu1 %vm3400_vm1, %v3399_v1 }
 0x3b4   :  { %2917 = vmatmul.mubr.msk.bf16.gmra.mrb[32].mxu1 %vm448_vm3, %v676_v54 }
 0x3b5   :  { %2942 = vmatprep.mubr.msk.bf16.mxu1 %vm3400_vm1, %v3399_v1 }
 0x45f   :  { %v501_v7 = vpop.f32.mrb[12].mxu1 }
 0x460   :  { %v3651_v8 = vadd.f32 %v501_v7, %v3648_v4  ;;  %v2874_v9 = vpop.f32.mrb[13].mxu1 }
 0x461   :  { %v504_v10 = vpop.f32.mrb[14].mxu1 }
 0x462   :  { %v3654_v13 = vadd.f32 %v504_v10, %v3648_v4  ;;  %v2875_v15 = vpop.f32.mrb[15].mxu1  ;;  %v524_v16 = vsel %vm63_vm0, %v3651_v8, -inf }
 0x463   :  { %525 = vmax.xlane.f32.xlu1 %v524_v16 }
 0x464   :  { %v527_v12 = vsel %vm63_vm0, %v3654_v13, -inf }
 0x465   :  { %528 = vmax.xlane.f32.xlu0 %v527_v12 }
 0x467   :  { %v509_v18 = vpop.f32.mrb[16].mxu1 }
 0x468   :  { %v3663_v23 = vadd.f32 %v509_v18, %v3648_v4  ;;  %v2878_v25 = vpop.f32.mrb[17].mxu1 }
 0x469   :  { %v512_v26 = vpop.f32.mrb[18].mxu1 }
 0x46a   :  { %v513_v27 = vadd.f32 %v512_v26, %v3660_v20  ;;  %v2879_v28 = vpop.f32.mrb[19].mxu1  ;;  %v530_v29 = vsel %vm63_vm0, %v3663_v23, -inf }
 0x46b   :  { %531 = vmax.xlane.f32.xlu0 %v530_v29 }
 0x46c   :  { %v533_v30 = vsel %vm63_vm0, %v513_v27, -inf }
 0x46f   :  { %534 = vmax.xlane.f32.xlu0 %v533_v30  ;;  %v517_v33 = vpop.f32.mrb[20].mxu1 }
 0x470   :  { %v3670_v36 = vadd.f32 %v517_v33, %v3660_v20  ;;  %v2882_v37 = vpop.f32.mrb[21].mxu1 }
 0x471   :  { %v520_v38 = vpop.f32.mrb[22].mxu1 }
 0x472   :  { %v521_v39 = vadd.f32 %v520_v38, %v3660_v20  ;;  %v2883_v41 = vpop.f32.mrb[23].mxu1  ;;  %v536_v42 = vsel %vm63_vm0, %v3670_v36, -inf }
 0x473   :  { %537 = vmax.xlane.f32.xlu1 %v536_v42 }
 0x474   :  { %v539_v43 = vsel %vm63_vm0, %v521_v39, -inf }
 0x475   :  { %540 = vmax.xlane.f32.xlu0 %v539_v43 }
 0x477   :  { %v735_v40 = vpop.f32.mrb[24].mxu1 }
 0x478   :  { %v3677_v45 = vadd.f32 %v735_v40, %v3648_v4  ;;  %v2910_v47 = vpop.f32.mrb[25].mxu1 }
 0x479   :  { %v738_v48 = vpop.f32.mrb[26].mxu1 }
 0x47a   :  { %v739_v50 = vadd.f32 %v738_v48, %v3648_v4  ;;  %v2911_v51 = vpop.f32.mrb[27].mxu1  ;;  %v758_v52 = vsel %vm63_vm0, %v3677_v45, -inf }
 0x47b   :  { %759 = vmax.xlane.f32.xlu1 %v758_v52 }
 0x47c   :  { %v761_v44 = vsel %vm63_vm0, %v739_v50, -inf }
 0x47d   :  { %762 = vmax.xlane.f32.xlu0 %v761_v44 }
 0x47f   :  { %v743_v53 = vpop.f32.mrb[28].mxu1 }
 0x480   :  { %v744_v55 = vadd.f32 %v743_v53, %v3648_v4  ;;  %v2914_v56 = vpop.f32.mrb[29].mxu1 }
 0x481   :  { %v746_v57 = vpop.f32.mrb[30].mxu1 }
 0x482   :  { %v747_v58 = vadd.f32 %v746_v57, %v3660_v20  ;;  %v2915_v59 = vpop.f32.mrb[31].mxu1  ;;  %v764_v61 = vsel %vm63_vm0, %v744_v55, -inf }
 0x483   :  { %765 = vmax.xlane.f32.xlu1 %v764_v61 }
 0x484   :  { %v767_v49 = vsel %vm63_vm0, %v747_v58, -inf }
 0x485   :  { %768 = vmax.xlane.f32.xlu0 %v767_v49 }
 0x487   :  { %v751_v62 = vpop.f32.mrb[32].mxu1 }
 0x488   :  { %v752_v0 = vadd.f32 %v751_v62, %v3660_v20  ;;  %v2918_v54 = vpop.f32.mrb[33].mxu1 }
 0x489   :  { %v754_v2 = vpop.f32.mrb[34].mxu1 }
 0x48a   :  { %v755_v3 = vadd.f32 %v754_v2, %v3660_v20  ;;  %v2919_v7 = vpop.f32.mrb[35].mxu1  ;;  %v770_v9 = vsel %vm63_vm0, %v752_v0, -inf }
 0x48b   :  { %771 = vmax.xlane.f32.xlu1 %v770_v9 }
 0x48c   :  { %v773_v10 = vsel %vm63_vm0, %v755_v3, -inf }
 0x48d   :  { %774 = vmax.xlane.f32.xlu0 %v773_v10 }
 0x49c   :  { %597 = vrot.lane.b32.xlu1 %v3604_v46, %s3404_s20 }
 0x4a3   :  { %595 = vrot.lane.b32.xlu0 %v3597_v35, %s3404_s20 }
 0x4f0   :  { %v526_v15 = vpop.xlane.xlu1 %525 }
 0x4f1   :  { %v542_v16 = vsub.f32 %v3651_v8, %v526_v15 }
 0x4f2   :  { %v529_v12 = vpop.xlane.xlu0 %528 }
 0x4f3   :  { %v548_v18 = vmul.f32 1.442695, %v542_v16  ;;  %v543_v25 = vsub.f32 %v3654_v13, %v529_v12 }
 0x4f5   :  { %3212 = vpow2.f32 %v548_v18  ;;  %v550_v26 = vmul.f32 1.442695, %v543_v25 }
 0x4f7   :  { %3214 = vpow2.f32 %v550_v26 }
 0x4f8   :  { %v532_v28 = vpop.xlane.xlu0 %531 }
 0x4fc   :  { %v535_v29 = vpop.xlane.xlu0 %534 }
 0x4fd   :  { %v545_v30 = vsub.f32 %v513_v27, %v535_v29 }
 0x4ff   :  { %v3697_v33 = vpop.eup %3212  ;;  %v554_v37 = vmul.f32 1.442695, %v545_v30 }
 0x500   :  { %v560_v38 = vsel %vm63_vm0, %v3697_v33, 0.0  ;;  %v538_v40 = vpop.xlane.xlu1 %537 }
 0x501   :  { %v3701_v41 = vpop.eup %3214  ;;  %3216 = vpow2.f32 %v554_v37  ;;  %561 = vadd.xlane.f32.xlu1 %v560_v38  ;;  %v546_v25 = vsub.f32 %v3670_v36, %v538_v40 }
 0x502   :  { %v541_v8 = vpop.xlane.xlu0 %540  ;;  %v563_v13 = vsel %vm63_vm0, %v3701_v41, 0.0 }
 0x503   :  { %v547_v42 = vsub.f32 %v521_v39, %v541_v8  ;;  %564 = vadd.xlane.f32.xlu0 %v563_v13 }
 0x505   :  { %v558_v43 = vmul.f32 1.442695, %v547_v42 }
 0x507   :  { %3218 = vpow2.f32 %v558_v43 }
 0x508   :  { %v760_v51 = vpop.xlane.xlu1 %759 }
 0x509   :  { %v776_v29 = vsub.f32 %v3677_v45, %v760_v51 }
 0x50a   :  { %v763_v27 = vpop.xlane.xlu0 %762 }
 0x50b   :  { %v3705_v47 = vpop.eup %3216  ;;  %v777_v48 = vsub.f32 %v739_v50, %v763_v27  ;;  %v782_v36 = vmul.f32 1.442695, %v776_v29 }
 0x50c   :  { %v569_v52 = vsel %vm63_vm0, %v3705_v47, 0.0 }
 0x50d   :  { %v784_v44 = vmul.f32 1.442695, %v777_v48  ;;  %570 = vadd.xlane.f32.xlu0 %v569_v52 }
 0x50f   :  { %3220 = vpow2.f32 %v784_v44 }
 0x510   :  { %v766_v53 = vpop.xlane.xlu1 %765 }
 0x511   :  { %v3709_v56 = vpop.eup %3218  ;;  %v778_v57 = vsub.f32 %v744_v55, %v766_v53 }
 0x512   :  { %v769_v39 = vpop.xlane.xlu0 %768  ;;  %827 = vrot.lane.b32.xlu1 %v3593_v19, %s3406_s21  ;;  %v575_v59 = vsel %vm63_vm0, %v3709_v56, 0.0 }
 0x513   :  { %v786_v50 = vmul.f32 1.442695, %v778_v57  ;;  %v779_v61 = vsub.f32 %v747_v58, %v769_v39  ;;  %576 = vadd.xlane.f32.xlu0 %v575_v59  ;;  %v544_v58 = vsub.f32 %v3663_v23, %v532_v28  ;;  %v556_v28 = vmul.f32 1.442695, %v546_v25 }
 0x515   :  { %3222 = vpow2.f32 %v786_v50  ;;  %v788_v49 = vmul.f32 1.442695, %v779_v61 }
 0x517   :  { %3224 = vpow2.f32 %v788_v49 }
 0x518   :  { %v772_v62 = vpop.xlane.xlu1 %771 }
 0x519   :  { %v3715_v54 = vpop.eup %3220  ;;  %v780_v2 = vsub.f32 %v752_v0, %v772_v62 }
 0x51a   :  { %v775_v7 = vpop.xlane.xlu0 %774  ;;  %v797_v55 = vsel %vm63_vm0, %v3715_v54, 0.0 }
 0x51b   :  { %v790_v9 = vmul.f32 1.442695, %v780_v2  ;;  %v781_v10 = vsub.f32 %v755_v3, %v775_v7  ;;  %798 = vadd.xlane.f32.xlu0 %v797_v55  ;;  %v552_v3 = vmul.f32 1.442695, %v544_v58 }
 0x51c   :  { %v598_v18 = vpop.permute.xlu1 %597 }
 0x51d   :  { %3226 = vpow2.f32 %v790_v9  ;;  %v792_v19 = vmul.f32 1.442695, %v781_v10 }
 0x51e   :  { %v596_v15 = vpop.permute.xlu0 %595 }
 0x51f   :  { %v3719_v16 = vpop.eup %3222  ;;  %3228 = vpow2.f32 %v792_v19  ;;  %2887 = vmatpush3.bf16.msra.mxu0 %v596_v15 }
 0x520   :  { %v800_v12 = vsel %vm63_vm0, %v3719_v16, 0.0  ;;  %2888 = vmatprep.subr.bf16.mxu0 %v3399_v1  ;;  %3230 = vpow2.f32 %v552_v3 }
 0x521   :  { %v3725_v0 = vpop.eup %3224  ;;  %801 = vadd.xlane.f32.xlu0 %v800_v12  ;;  %3232 = vpow2.f32 %v556_v28 }
 0x522   :  { %v803_v26 = vsel %vm63_vm0, %v3725_v0, 0.0  ;;  %3234 = vpow2.f32 %v782_v36 }
 0x523   :  { %2889 = vmatpush3.bf16.msra.mxu0 %v598_v18 }
 0x524   :  { %2920 = vmatprep.subr.bf16.mxu0 %v3399_v1 }
 0x525   :  { %804 = vadd.xlane.f32.xlu0 %v803_v26 }
 0x527   :  { %v3731_v23 = vpop.eup %3226 }
 0x528   :  { %v806_v30 = vsel %vm63_vm0, %v3731_v23, 0.0 }
 0x529   :  { %v3736_v37 = vpop.eup %3228  ;;  %807 = vadd.xlane.f32.xlu0 %v806_v30 }
 0x52a   :  { %v809_v38 = vsel %vm63_vm0, %v3736_v37, 0.0  ;;  %v3231_v8 = vpop.eup %3230 }
 0x52b   :  { %v566_v13 = vsel %vm63_vm0, %v3231_v8, 0.0  ;;  %v3233_v42 = vpop.eup %3232 }
 0x52c   :  { %v572_v45 = vsel %vm63_vm0, %v3233_v42, 0.0  ;;  %v3235_v43 = vpop.eup %3234 }
 0x52d   :  { %810 = vadd.xlane.f32.xlu0 %v809_v38  ;;  %v794_v40 = vsel %vm63_vm0, %v3235_v43, 0.0 }
 0x536   :  { %567 = vadd.xlane.f32.xlu1 %v566_v13 }
 0x53a   :  { %573 = vadd.xlane.f32.xlu1 %v572_v45 }
 0x53e   :  { %795 = vadd.xlane.f32.xlu1 %v794_v40 }
 0x543   :  { %829 = vrot.lane.b32.xlu0 %v3597_v35, %s3406_s21 }
 0x54f   :  { %831 = vrot.lane.b32.xlu1 %v3604_v46, %s3406_s21 }
 0x553   :  { %935 = vrot.lane.b32.xlu1 %v3546_v5, %s3407_s22 }
 0x58e   :  { %v562_v27 = vpop.xlane.xlu1 %561 }
 0x58f   :  { %3236 = vrcp.f32 %v562_v27 }
 0x590   :  { %v565_v48 = vpop.xlane.xlu0 %564 }
 0x591   :  { %3238 = vrcp.f32 %v565_v48 }
 0x592   :  { %v828_v39 = vpop.permute.xlu1 %827 }
 0x599   :  { %v3237_v51 = vpop.eup %3236 }
 0x59a   :  { %v584_v44 = vmul.f32 %v3237_v51, %v3697_v33  ;;  %v571_v35 = vpop.xlane.xlu0 %570 }
 0x59b   :  { %v3239_v52 = vpop.eup %3238  ;;  %3240 = vrcp.f32 %v571_v35 }
 0x59c   :  { %v585_v53 = vmul.f32 %v3239_v52, %v3701_v41 }
 0x59e   :  { %v590_v57 = vpack.c.bf16 %v585_v53, %v584_v44 }
 0x5a0   :  { %2891 = vmatmul.mubr.msk.bf16.vlgmr.msra.gmra.mrb[12].mxu0 %vm63_vm0, %v590_v57  ;;  %v577_v46 = vpop.xlane.xlu0 %576 }
 0x5a1   :  { %2921 = vmatpush3.bf16.msra.mxu0 %v828_v39  ;;  %2894 = vmatprep.mubr.msk.bf16.mxu0 %vm3400_vm1, %v3399_v1 }
 0x5a2   :  { %2922 = vmatprep.subr.bf16.mxu0 %v3399_v1 }
 0x5a5   :  { %v3241_v55 = vpop.eup %3240 }
 0x5a6   :  { %v587_v15 = vmul.f32 %v3241_v55, %v3705_v47 }
 0x5a8   :  { %v799_v59 = vpop.xlane.xlu0 %798 }
 0x5ae   :  { %v802_v50 = vpop.xlane.xlu0 %801 }
 0x5b2   :  { %v805_v61 = vpop.xlane.xlu0 %804 }
 0x5b6   :  { %v808_v49 = vpop.xlane.xlu0 %807 }
 0x5ba   :  { %v811_v62 = vpop.xlane.xlu0 %810 }
 0x5be   :  { %v830_v33 = vpop.permute.xlu0 %829 }
 0x5bf   :  { %2923 = vmatpush3.bf16.msra.mxu0 %v830_v33 }
 0x5c0   :  { %2924 = vmatprep.subr.bf16.mxu0 %v3399_v1 }
 0x5c3   :  { %v568_v41 = vpop.xlane.xlu1 %567 }
 0x5c4   :  { %3242 = vrcp.f32 %v568_v41 }
 0x5c7   :  { %v574_v2 = vpop.xlane.xlu1 %573 }
 0x5c8   :  { %3244 = vrcp.f32 %v574_v2 }
 0x5c9   :  { %3246 = vrcp.f32 %v577_v46 }
 0x5cb   :  { %v796_v7 = vpop.xlane.xlu1 %795 }
 0x5cc   :  { %3248 = vrcp.f32 %v796_v7 }
 0x5cd   :  { %3250 = vrcp.f32 %v799_v59 }
 0x5ce   :  { %v3243_v9 = vpop.eup %3242  ;;  %3252 = vrcp.f32 %v805_v61 }
 0x5cf   :  { %v832_v10 = vpop.permute.xlu1 %831  ;;  %v586_v19 = vmul.f32 %v3243_v9, %v3231_v8  ;;  %3254 = vrcp.f32 %v802_v50 }
 0x5d0   :  { %2925 = vmatpush3.bf16.msra.mxu0 %v832_v10  ;;  %3256 = vrcp.f32 %v811_v62 }
 0x5d1   :  { %v591_v58 = vpack.c.bf16 %v587_v15, %v586_v19  ;;  %2954 = vmatprep.subr.bf16.mxu0 %v3399_v1  ;;  %3258 = vrcp.f32 %v808_v49 }
 0x5d2   :  { %v3245_v12 = vpop.eup %3244 }
 0x5d3   :  { %2895 = vmatmul.mubr.msk.bf16.gmra.mrb[16].mxu0 %vm63_vm0, %v591_v58  ;;  %v3247_v18 = vpop.eup %3246  ;;  %v588_v3 = vmul.f32 %v3245_v12, %v3233_v42  ;;  %v936_v52 = vpop.permute.xlu1 %935 }
 0x5d4   :  { %2898 = vmatprep.mubr.msk.bf16.mxu0 %vm3400_vm1, %v3399_v1  ;;  %v589_v25 = vmul.f32 %v3247_v18, %v3709_v56  ;;  %2939 = vmatpush3.bf16.msra.mxu1 %v936_v52 }
 0x5d5   :  { %2940 = vmatprep.subr.bf16.mxu1 %v3399_v1 }
 0x5d6   :  { %v592_v26 = vpack.c.bf16 %v589_v25, %v588_v3  ;;  %v3249_v28 = vpop.eup %3248 }
 0x5d7   :  { %v3251_v47 = vpop.eup %3250  ;;  %v818_v29 = vmul.f32 %v3249_v28, %v3235_v43 }
 0x5d8   :  { %v819_v30 = vmul.f32 %v3251_v47, %v3715_v54  ;;  %v3253_v38 = vpop.eup %3252 }
 0x5d9   :  { %v3255_v56 = vpop.eup %3254  ;;  %v821_v8 = vmul.f32 %v3253_v38, %v3725_v0 }
 0x5da   :  { %v824_v36 = vpack.c.bf16 %v819_v30, %v818_v29  ;;  %v820_v13 = vmul.f32 %v3255_v56, %v3719_v16  ;;  %v3257_v45 = vpop.eup %3256 }
 0x5db   :  { %2899 = vmatmul.mubr.msk.bf16.gmra.mrb[20].mxu0 %vm63_vm0, %v592_v26  ;;  %v3259_v43 = vpop.eup %3258  ;;  %v823_v54 = vmul.f32 %v3257_v45, %v3736_v37 }
 0x5dc   :  { %2926 = vmatprep.mubr.msk.bf16.mxu0 %vm3400_vm1, %v3399_v1  ;;  %v825_v42 = vpack.c.bf16 %v821_v8, %v820_v13  ;;  %v822_v40 = vmul.f32 %v3259_v43, %v3731_v23 }
 0x5de   :  { %v826_v27 = vpack.c.bf16 %v823_v54, %v822_v40  ;;  %v3802_v54 = vsub.s32 1, %v3558_v17 }
 0x5e0   :  { %v1016_v40 = vrot.slane %v3589_v63, %v3802_v54 }
 0x5e3   :  { %2927 = vmatmul.mubr.msk.bf16.vlgmr.msra.gmra.mrb[24].mxu0 %vm63_vm0, %v824_v36 }
 0x5e4   :  { %2930 = vmatprep.mubr.msk.bf16.mxu0 %vm3400_vm1, %v3399_v1 }
 0x5eb   :  { %2931 = vmatmul.mubr.msk.bf16.gmra.mrb[28].mxu0 %vm63_vm0, %v825_v42 }
 0x5ec   :  { %2934 = vmatprep.mubr.msk.bf16.mxu0 %vm3400_vm1, %v3399_v1 }
 0x5f3   :  { %2935 = vmatmul.mubr.msk.bf16.gmra.mrb[32].mxu0 %vm63_vm0, %v826_v27 }
 0x5f4   :  { %2958 = vmatprep.mubr.msk.bf16.mxu0 %vm3400_vm1, %v3399_v1 }
 0x673   :  { %v645_v16 = vpop.f32.mrb[12].mxu0 }
 0x674   :  { %v2892_v0 = vpop.f32.mrb[13].mxu0 }
 0x675   :  { %v648_v48 = vpop.f32.mrb[14].mxu0 }
 0x676   :  { %v2893_v51 = vpop.f32.mrb[15].mxu0 }
 0x6a6   :  { %v653_v44 = vpop.f32.mrb[16].mxu0 }
 0x6a7   :  { %v2896_v23 = vpop.f32.mrb[17].mxu0 }
 0x6a8   :  { %v656_v37 = vpop.f32.mrb[18].mxu0 }
 0x6a9   :  { %v2897_v53 = vpop.f32.mrb[19].mxu0 }
 0x6ae   :  { %v661_v57 = vpop.f32.mrb[20].mxu0 }
 0x6af   :  { %v2900_v39 = vpop.f32.mrb[21].mxu0 }
 0x6b0   :  { %v664_v35 = vpop.f32.mrb[22].mxu0 }
 0x6b1   :  { %v2901_v46 = vpop.f32.mrb[23].mxu0 }
 0x6b6   :  { %v879_v59 = vpop.f32.mrb[24].mxu0 }
 0x6b7   :  { %v2928_v50 = vpop.f32.mrb[25].mxu0 }
 0x6b8   :  { %v882_v61 = vpop.f32.mrb[26].mxu0 }
 0x6b9   :  { %v3149_v5 = vpack.i.bf16 %v882_v61, %v879_v59  ;;  %v2929_v49 = vpop.f32.mrb[27].mxu0 }
 0x6bb   :  { %3150 = vrot.lane.b32.xlu1 %v3149_v5, %s3408_s23 }
 0x6be   :  { %v887_v62 = vpop.f32.mrb[28].mxu0 }
 0x6bf   :  { %937 = vrot.lane.b32.xlu1 %v3553_v6, %s3407_s22  ;;  %v2932_v33 = vpop.f32.mrb[29].mxu0 }
 0x6c0   :  { %v890_v41 = vpop.f32.mrb[30].mxu0 }
 0x6c1   :  { %v3154_v2 = vpack.i.bf16 %v890_v41, %v887_v62  ;;  %v2933_v7 = vpop.f32.mrb[31].mxu0 }
 0x6c3   :  { %3155 = vrot.lane.b32.xlu1 %v3154_v2, %s3408_s23 }
 0x6c6   :  { %v895_v55 = vpop.f32.mrb[32].mxu0 }
 0x6c7   :  { %v2936_v9 = vpop.f32.mrb[33].mxu0 }
 0x6c8   :  { %v898_v10 = vpop.f32.mrb[34].mxu0 }
 0x6c9   :  { %v3159_v19 = vpack.i.bf16 %v898_v10, %v895_v55  ;;  %v2937_v15 = vpop.f32.mrb[35].mxu0 }
 0x6cb   :  { %3160 = vrot.lane.b32.xlu1 %v3159_v19, %s3408_s23 }
 0x72d   :  { %v3151_v58 = vpop.permute.xlu1 %3150 }
 0x72e   :  { %v3153_v12 = vunpack.i.h.bf16 %v3151_v58  ;;  %v3152_v18 = vunpack.i.l.bf16 %v3151_v58 }
 0x730   :  { %v927_v3 = vsel %vm448_vm3, %v648_v48, %v3153_v12  ;;  %v926_v6 = vsel %vm448_vm3, %v645_v16, %v3152_v18 }
 0x731   :  { %v932_v25 = vpack.c.bf16 %v927_v3, %v926_v6  ;;  %v938_v26 = vpop.permute.xlu1 %937 }
 0x732   :  { %2941 = vmatpush3.bf16.msra.mxu1 %v938_v26 }
 0x733   :  { %2970 = vmatprep.subr.bf16.mxu1 %v3399_v1 }
 0x735   :  { %2943 = vmatmul.mubr.msk.bf16.vlgmr.msra.gmra.mrb[36].mxu1 %vm236_vm2, %v932_v25  ;;  %v3156_v28 = vpop.permute.xlu1 %3155 }
 0x736   :  { %v3158_v47 = vunpack.i.h.bf16 %v3156_v28  ;;  %v3157_v29 = vunpack.i.l.bf16 %v3156_v28  ;;  %2946 = vmatprep.mubr.msk.bf16.mxu1 %vm3400_vm1, %v3399_v1 }
 0x738   :  { %v929_v30 = vsel %vm448_vm3, %v656_v37, %v3158_v47  ;;  %v928_v36 = vsel %vm448_vm3, %v653_v44, %v3157_v29 }
 0x739   :  { %v933_v38 = vpack.c.bf16 %v929_v30, %v928_v36 }
 0x73d   :  { %2947 = vmatmul.mubr.msk.bf16.gmra.mrb[40].mxu1 %vm236_vm2, %v933_v38  ;;  %v3161_v56 = vpop.permute.xlu1 %3160 }
 0x73e   :  { %v3163_v8 = vunpack.i.h.bf16 %v3161_v56  ;;  %v3162_v13 = vunpack.i.l.bf16 %v3161_v56  ;;  %2950 = vmatprep.mubr.msk.bf16.mxu1 %vm3400_vm1, %v3399_v1 }
 0x740   :  { %v931_v42 = vsel %vm448_vm3, %v664_v35, %v3163_v8  ;;  %v930_v45 = vsel %vm448_vm3, %v661_v57, %v3162_v13 }
 0x741   :  { %v934_v43 = vpack.c.bf16 %v931_v42, %v930_v45 }
 0x745   :  { %2951 = vmatmul.mubr.msk.bf16.gmra.mrb[44].mxu1 %vm236_vm2, %v934_v43 }
 0x746   :  { %2974 = vmatprep.mubr.msk.bf16.mxu1 %vm3400_vm1, %v3399_v1 }
 0x808   :  { %v984_v27 = vpop.f32.mrb[36].mxu1 }
 0x809   :  { %v1007_v16 = vadd.f32 %v984_v27, %v3475_v11  ;;  %v2944_v0 = vpop.f32.mrb[37].mxu1 }
 0x80a   :  { %v987_v48 = vpop.f32.mrb[38].mxu1 }
 0x80b   :  { %v3807_v51 = vadd.f32 %v1016_v40, %v1007_v16  ;;  %v1008_v52 = vadd.f32 %v987_v48, %v3477_v14  ;;  %v2945_v44 = vpop.f32.mrb[39].mxu1 }
 0x80c   :  { %v3187_v44 = vld [vmem:[%s4366_s2 + $0x48] sm:$0xff]  }
 0x80d   :  { %v3810_v23 = vadd.f32 %v1016_v40, %v1008_v52  ;;  %v1023_v37 = vsel %vm236_vm2, %v3807_v51, 0.0  ;;  %v3186_v52 = vld [vmem:[%s4366_s2 + $0x40] sm:$0xff]  }
 0x80e   :  { %1024 = vadd.xlane.f32.xlu0 %v1023_v37  ;;  %2955 = vmatpush3.bf16.msra.mxu0 %v3186_v52 }
 0x80f   :  { %v1026_v53 = vsel %vm236_vm2, %v3810_v23, 0.0  ;;  %2956 = vmatprep.subr.bf16.mxu0 %v3399_v1 }
 0x810   :  { %1027 = vadd.xlane.f32.xlu1 %v1026_v53  ;;  %v992_v63 = vpop.f32.mrb[40].mxu1 }
 0x811   :  { %v1009_v11 = vadd.f32 %v992_v63, %v3489_v21  ;;  %v2948_v57 = vpop.f32.mrb[41].mxu1 }
 0x812   :  { %v995_v39 = vpop.f32.mrb[42].mxu1  ;;  %2957 = vmatpush3.bf16.msra.mxu0 %v3187_v44 }
 0x813   :  { %v3817_v35 = vadd.f32 %v1016_v40, %v1009_v11  ;;  %v1010_v14 = vadd.f32 %v995_v39, %v3491_v24  ;;  %v2949_v46 = vpop.f32.mrb[43].mxu1  ;;  %2986 = vmatprep.subr.bf16.mxu0 %v3399_v1 }
 0x815   :  { %v3820_v59 = vadd.f32 %v1016_v40, %v1010_v14  ;;  %v1029_v50 = vsel %vm236_vm2, %v3817_v35, 0.0 }
 0x816   :  { %1030 = vadd.xlane.f32.xlu0 %v1029_v50  ;;  %v1103_v50 = vsub.s32 6, %v3558_v17 }
 0x817   :  { %v1032_v21 = vsel %vm236_vm2, %v3820_v59, 0.0 }
 0x818   :  { %v1000_v61 = vpop.f32.mrb[44].mxu1 }
 0x819   :  { %v1011_v5 = vadd.f32 %v1000_v61, %v3503_v31  ;;  %v2952_v49 = vpop.f32.mrb[45].mxu1 }
 0x81a   :  { %1033 = vadd.xlane.f32.xlu0 %v1032_v21  ;;  %v1003_v62 = vpop.f32.mrb[46].mxu1  ;;  %v3370_v21 = vld [vmem:[%s4367_s3] sm:$0xff] }
 0x81b   :  { %v3827_v33 = vadd.f32 %v1016_v40, %v1011_v5  ;;  %v1012_v24 = vadd.f32 %v1003_v62, %v3505_v34  ;;  %v2953_v41 = vpop.f32.mrb[47].mxu1  ;;  %v1104_v62 = vrot.slane %v3370_v21, %v1103_v50 }
 0x81d   :  { %v3830_v2 = vadd.f32 %v1016_v40, %v1012_v24  ;;  %v1035_v7 = vsel %vm236_vm2, %v3827_v33, 0.0  ;;  %v1113_v24 = vsub.s32 7, %v3558_v17 }
 0x81e   :  { %1036 = vadd.xlane.f32.xlu0 %v1035_v7 }
 0x81f   :  { %v1038_v31 = vsel %vm236_vm2, %v3830_v2, 0.0 }
 0x820   :  { %1039 = vadd.xlane.f32.xlu1 %v1038_v31 }
 0x89b   :  { %v1025_v55 = vpop.xlane.xlu0 %1024 }
 0x89c   :  { %v1041_v9 = vmul.f32 0.03125, %v1025_v55 }
 0x89d   :  { %v1028_v10 = vpop.xlane.xlu1 %1027 }
 0x89e   :  { %v1047_v19 = vsub.f32 %v3807_v51, %v1041_v9  ;;  %v1042_v15 = vmul.f32 0.03125, %v1028_v10 }
 0x8a0   :  { %v3838_v58 = vsub.f32 %v3810_v23, %v1042_v15  ;;  %v1053_v34 = vmul.f32 %v1047_v19, %v1047_v19  ;;  %v1114_v15 = vrot.slane %v3370_v21, %v1113_v24 }
 0x8a2   :  { %v1059_v12 = vsel %vm236_vm2, %v1053_v34, 0.0  ;;  %v1054_v18 = vmul.f32 %v3838_v58, %v3838_v58 }
 0x8a3   :  { %v1031_v3 = vpop.xlane.xlu0 %1030  ;;  %1060 = vadd.xlane.f32.xlu0 %v1059_v12 }
 0x8a4   :  { %v1043_v6 = vmul.f32 0.03125, %v1031_v3  ;;  %v1062_v25 = vsel %vm236_vm2, %v1054_v18, 0.0 }
 0x8a5   :  { %1063 = vadd.xlane.f32.xlu1 %v1062_v25 }
 0x8a6   :  { %v3845_v26 = vsub.f32 %v3817_v35, %v1043_v6 }
 0x8a7   :  { %v1034_v28 = vpop.xlane.xlu0 %1033 }
 0x8a8   :  { %v1044_v47 = vmul.f32 0.03125, %v1034_v28  ;;  %v1055_v29 = vmul.f32 %v3845_v26, %v3845_v26 }
 0x8aa   :  { %v3850_v30 = vsub.f32 %v3820_v59, %v1044_v47  ;;  %v1065_v36 = vsel %vm236_vm2, %v1055_v29, 0.0 }
 0x8ab   :  { %1066 = vadd.xlane.f32.xlu0 %v1065_v36  ;;  %v1037_v38 = vpop.xlane.xlu0 %1036 }
 0x8ac   :  { %v1045_v56 = vmul.f32 0.03125, %v1037_v38  ;;  %v1056_v8 = vmul.f32 %v3850_v30, %v3850_v30 }
 0x8ad   :  { %v1040_v13 = vpop.xlane.xlu1 %1039 }
 0x8ae   :  { %v3856_v42 = vsub.f32 %v3827_v33, %v1045_v56  ;;  %v1046_v45 = vmul.f32 0.03125, %v1040_v13  ;;  %v1068_v43 = vsel %vm236_vm2, %v1056_v8, 0.0 }
 0x8af   :  { %1069 = vadd.xlane.f32.xlu1 %v1068_v43 }
 0x8b0   :  { %v3860_v40 = vsub.f32 %v3830_v2, %v1046_v45  ;;  %v1057_v27 = vmul.f32 %v3856_v42, %v3856_v42 }
 0x8b2   :  { %v1071_v16 = vsel %vm236_vm2, %v1057_v27, 0.0  ;;  %v1058_v0 = vmul.f32 %v3860_v40, %v3860_v40 }
 0x8b3   :  { %1072 = vadd.xlane.f32.xlu0 %v1071_v16 }
 0x8b4   :  { %v1074_v48 = vsel %vm236_vm2, %v1058_v0, 0.0 }
 0x8b5   :  { %1075 = vadd.xlane.f32.xlu1 %v1074_v48 }
 0x930   :  { %v1061_v37 = vpop.xlane.xlu0 %1060 }
 0x931   :  { %v1077_v53 = vmul.f32 0.03125, %v1061_v37 }
 0x932   :  { %v1064_v63 = vpop.xlane.xlu1 %1063 }
 0x933   :  { %v1083_v11 = vadd.f32 1e-06, %v1077_v53  ;;  %v1078_v57 = vmul.f32 0.03125, %v1064_v63  ;;  %v3908_v63 = vsub.s32 2, %v3558_v17 }
 0x935   :  { %3260 = vrsqrt.f32 %v1083_v11  ;;  %v1084_v39 = vadd.f32 1e-06, %v1078_v57  ;;  %v3913_v11 = vld [vmem:[%s4367_s3 + $0x8] sm:$0xff] }
 0x936   :  { %v1127_v57 = vrot.slane %v3913_v11, %v3908_v63 }
 0x937   :  { %3262 = vrsqrt.f32 %v1084_v39 }
 0x938   :  { %v1067_v14 = vpop.xlane.xlu0 %1066 }
 0x939   :  { %v1079_v46 = vmul.f32 0.03125, %v1067_v14 }
 0x93b   :  { %v1085_v61 = vadd.f32 1e-06, %v1079_v46 }
 0x93c   :  { %v1070_v5 = vpop.xlane.xlu1 %1069 }
 0x93d   :  { %3264 = vrsqrt.f32 %v1085_v61  ;;  %v1080_v49 = vmul.f32 0.03125, %v1070_v5 }
 0x93f   :  { %v3261_v41 = vpop.eup %3260  ;;  %v1086_v7 = vadd.f32 1e-06, %v1080_v49 }
 0x940   :  { %v1095_v31 = vmul.f32 %v3261_v41, %v1047_v19  ;;  %v1073_v55 = vpop.xlane.xlu0 %1072 }
 0x941   :  { %v3263_v9 = vpop.eup %3262  ;;  %3266 = vrsqrt.f32 %v1086_v7  ;;  %v1081_v10 = vmul.f32 0.03125, %v1073_v55 }
 0x942   :  { %v1105_v34 = vmul.f32 %v1104_v62, %v1095_v31  ;;  %v1096_v12 = vmul.f32 %v3263_v9, %v3838_v58  ;;  %v1076_v18 = vpop.xlane.xlu1 %1075 }
 0x943   :  { %v1087_v3 = vadd.f32 1e-06, %v1081_v10  ;;  %v1082_v6 = vmul.f32 0.03125, %v1076_v18 }
 0x944   :  { %v1106_v25 = vmul.f32 %v1104_v62, %v1096_v12  ;;  %v1115_v47 = vadd.f32 %v1114_v15, %v1105_v34 }
 0x945   :  { %3268 = vrsqrt.f32 %v1087_v3  ;;  %v1088_v28 = vadd.f32 1e-06, %v1082_v6 }
 0x946   :  { %v1116_v29 = vadd.f32 %v1114_v15, %v1106_v25 }
 0x947   :  { %v3265_v36 = vpop.eup %3264  ;;  %3270 = vrsqrt.f32 %v1088_v28 }
 0x948   :  { %v1097_v19 = vmul.f32 %v3265_v36, %v3845_v26  ;;  %v1121_v38 = vpack.c.bf16 %v1116_v29, %v1115_v47 }
 0x94a   :  { %2959 = vmatmul.mubr.msk.bf16.vlgmr.msra.gmra.mrb[36].mxu0 %vm236_vm2, %v1121_v38  ;;  %v1107_v8 = vmul.f32 %v1104_v62, %v1097_v19 }
 0x94b   :  { %v3267_v56 = vpop.eup %3266  ;;  %2962 = vmatprep.mubr.msk.bf16.mxu0 %vm3400_vm1, %v3399_v1 }
 0x94c   :  { %v1098_v58 = vmul.f32 %v3267_v56, %v3850_v30  ;;  %v1117_v27 = vadd.f32 %v1114_v15, %v1107_v8 }
 0x94e   :  { %v1108_v13 = vmul.f32 %v1104_v62, %v1098_v58 }
 0x94f   :  { %v3269_v45 = vpop.eup %3268 }
 0x950   :  { %v1099_v43 = vmul.f32 %v3269_v45, %v3856_v42  ;;  %v1118_v16 = vadd.f32 %v1114_v15, %v1108_v13  ;;  %v3188_v42 = vld [vmem:[%s4366_s2 + $0x50] sm:$0xff]  }
 0x951   :  { %v3271_v0 = vpop.eup %3270  ;;  %2971 = vmatpush3.bf16.xpose.msra.mxu1 %v3188_v42 }
 0x952   :  { %v1100_v48 = vmul.f32 %v3271_v0, %v3860_v40  ;;  %v1122_v26 = vpack.c.bf16 %v1118_v16, %v1117_v27  ;;  %v1109_v52 = vmul.f32 %v1104_v62, %v1099_v43  ;;  %2972 = vmatprep.subr.bf16.mxu1 %v3399_v1  ;;  %v3189_v40 = vld [vmem:[%s4366_s2 + $0x58] sm:$0xff]  }
 0x954   :  { %2963 = vmatmul.mubr.msk.bf16.gmra.mrb[40].mxu0 %vm236_vm2, %v1122_v26  ;;  %v1110_v44 = vmul.f32 %v1104_v62, %v1100_v48  ;;  %v1119_v30 = vadd.f32 %v1114_v15, %v1109_v52 }
 0x955   :  { %2966 = vmatprep.mubr.msk.bf16.mxu0 %vm3400_vm1, %v3399_v1 }
 0x956   :  { %v1120_v37 = vadd.f32 %v1114_v15, %v1110_v44 }
 0x958   :  { %v1123_v53 = vpack.c.bf16 %v1120_v37, %v1119_v30 }
 0x959   :  { %2973 = vmatpush3.bf16.xpose.msra.mxu1 %v3189_v40 }
 0x95a   :  { %3002 = vmatprep.subr.bf16.mxu1 %v3399_v1 }
 0x95c   :  { %2967 = vmatmul.mubr.msk.bf16.gmra.mrb[44].mxu0 %vm236_vm2, %v1123_v53 }
 0x95d   :  { %2990 = vmatprep.mubr.msk.bf16.mxu0 %vm3400_vm1, %v3399_v1 }
 0xa1d   :  { %v1183_v39 = vpop.f32.mrb[36].mxu0 }
 0xa1e   :  { %v1184_v14 = vadd.f32 %v1183_v39, %v1127_v57  ;;  %v2960_v46 = vpop.f32.mrb[37].mxu0 }
 0xa1f   :  { %v1186_v61 = vpop.f32.mrb[38].mxu0 }
 0xa20   :  { %v1206_v5 = vmul.f32 %v1184_v14, %v1184_v14  ;;  %v1187_v49 = vadd.f32 %v1186_v61, %v1127_v57  ;;  %v2961_v21 = vpop.f32.mrb[39].mxu0 }
 0xa22   :  { %v1212_v62 = vmul.f32 %v1206_v5, %v1184_v14  ;;  %v1207_v41 = vmul.f32 %v1187_v49, %v1187_v49 }
 0xa24   :  { %v1218_v7 = vmul.f32 0.044715, %v1212_v62  ;;  %v1213_v31 = vmul.f32 %v1207_v41, %v1187_v49 }
 0xa26   :  { %v1224_v55 = vadd.f32 %v1218_v7, %v1184_v14  ;;  %v1219_v9 = vmul.f32 0.044715, %v1213_v31 }
 0xa27   :  { %v1191_v10 = vpop.f32.mrb[40].mxu0 }
 0xa28   :  { %v1230_v15 = vmul.f32 0.7978846, %v1224_v55  ;;  %v1225_v34 = vadd.f32 %v1219_v9, %v1187_v49  ;;  %v1192_v12 = vadd.f32 %v1191_v10, %v1127_v57  ;;  %v2964_v18 = vpop.f32.mrb[41].mxu0 }
 0xa29   :  { %v1194_v3 = vpop.f32.mrb[42].mxu0 }
 0xa2a   :  { %3272 = vtanh.f32 %v1230_v15  ;;  %v1231_v6 = vmul.f32 0.7978846, %v1225_v34  ;;  %v1208_v25 = vmul.f32 %v1192_v12, %v1192_v12  ;;  %v1195_v28 = vadd.f32 %v1194_v3, %v1127_v57  ;;  %v2965_v47 = vpop.f32.mrb[43].mxu0 }
 0xa2c   :  { %3274 = vtanh.f32 %v1231_v6  ;;  %v1214_v29 = vmul.f32 %v1208_v25, %v1192_v12  ;;  %v1209_v36 = vmul.f32 %v1195_v28, %v1195_v28 }
 0xa2e   :  { %v1220_v19 = vmul.f32 0.044715, %v1214_v29  ;;  %v1215_v38 = vmul.f32 %v1209_v36, %v1195_v28 }
 0xa2f   :  { %v1199_v56 = vpop.f32.mrb[44].mxu0 }
 0xa30   :  { %v1226_v58 = vadd.f32 %v1220_v19, %v1192_v12  ;;  %v1221_v8 = vmul.f32 0.044715, %v1215_v38  ;;  %v1200_v13 = vadd.f32 %v1199_v56, %v1127_v57  ;;  %v2968_v45 = vpop.f32.mrb[45].mxu0 }
 0xa31   :  { %v1202_v43 = vpop.f32.mrb[46].mxu0 }
 0xa32   :  { %v1232_v27 = vmul.f32 0.7978846, %v1226_v58  ;;  %v1227_v16 = vadd.f32 %v1221_v8, %v1195_v28  ;;  %v1210_v0 = vmul.f32 %v1200_v13, %v1200_v13  ;;  %v1203_v48 = vadd.f32 %v1202_v43, %v1127_v57  ;;  %v2969_v26 = vpop.f32.mrb[47].mxu0 }
 0xa34   :  { %v3273_v52 = vpop.eup %3272  ;;  %3276 = vtanh.f32 %v1232_v27  ;;  %v1233_v44 = vmul.f32 0.7978846, %v1227_v16  ;;  %v1216_v37 = vmul.f32 %v1210_v0, %v1200_v13  ;;  %v1211_v30 = vmul.f32 %v1203_v48, %v1203_v48 }
 0xa35   :  { %v1242_v53 = vadd.f32 1.0, %v3273_v52 }
 0xa36   :  { %v3275_v42 = vpop.eup %3274  ;;  %3278 = vtanh.f32 %v1233_v44  ;;  %v1222_v40 = vmul.f32 0.044715, %v1216_v37  ;;  %v1217_v39 = vmul.f32 %v1211_v30, %v1203_v48 }
 0xa37   :  { %v1248_v46 = vmul.f32 0.5, %v1242_v53  ;;  %v1243_v61 = vadd.f32 1.0, %v3275_v42 }
 0xa38   :  { %v1228_v5 = vadd.f32 %v1222_v40, %v1200_v13  ;;  %v1223_v21 = vmul.f32 0.044715, %v1217_v39 }
 0xa39   :  { %v1249_v62 = vmul.f32 0.5, %v1243_v61  ;;  %v1254_v31 = vmul.f32 %v1248_v46, %v1184_v14 }
 0xa3a   :  { %v1234_v41 = vmul.f32 0.7978846, %v1228_v5  ;;  %v1229_v7 = vadd.f32 %v1223_v21, %v1203_v48 }
 0xa3b   :  { %v1255_v57 = vmul.f32 %v1249_v62, %v1187_v49 }
 0xa3c   :  { %3280 = vtanh.f32 %v1234_v41  ;;  %v1235_v55 = vmul.f32 0.7978846, %v1229_v7 }
 0xa3d   :  { %v1260_v9 = vpack.c.bf16 %v1255_v57, %v1254_v31 }
 0xa3e   :  { %v3277_v10 = vpop.eup %3276  ;;  %3282 = vtanh.f32 %v1235_v55 }
 0xa3f   :  { %2975 = vmatmul.mubr.bf16.vlgmr.msra.gmra.mrb[48].mxu1 %v1260_v9  ;;  %v1244_v15 = vadd.f32 1.0, %v3277_v10 }
 0xa40   :  { %v3279_v34 = vpop.eup %3278  ;;  %2978 = vmatprep.mubr.msk.bf16.mxu1 %vm3400_vm1, %v3399_v1 }
 0xa41   :  { %v1245_v18 = vadd.f32 1.0, %v3279_v34  ;;  %v1250_v3 = vmul.f32 0.5, %v1244_v15 }
 0xa43   :  { %v1251_v6 = vmul.f32 0.5, %v1245_v18  ;;  %v1256_v25 = vmul.f32 %v1250_v3, %v1192_v12  ;;  %v3924_v12 = vsub.s32 3, %v3558_v17 }
 0xa45   :  { %v1257_v47 = vmul.f32 %v1251_v6, %v1195_v28  ;;  %v1341_v28 = vrot.slane %v3913_v11, %v3924_v12 }
 0xa46   :  { %v3281_v29 = vpop.eup %3280 }
 0xa47   :  { %v1261_v36 = vpack.c.bf16 %v1257_v47, %v1256_v25  ;;  %v1246_v14 = vadd.f32 1.0, %v3281_v29 }
 0xa48   :  { %v3283_v49 = vpop.eup %3282 }
 0xa49   :  { %2979 = vmatmul.mubr.bf16.gmra.mrb[52].mxu1 %v1261_v36  ;;  %v1247_v19 = vadd.f32 1.0, %v3283_v49  ;;  %v1252_v38 = vmul.f32 0.5, %v1246_v14 }
 0xa4a   :  { %2982 = vmatprep.mubr.msk.bf16.mxu1 %vm3400_vm1, %v3399_v1 }
 0xa4b   :  { %v1253_v56 = vmul.f32 0.5, %v1247_v19  ;;  %v1258_v58 = vmul.f32 %v1252_v38, %v1200_v13 }
 0xa4d   :  { %v1259_v8 = vmul.f32 %v1253_v56, %v1203_v48 }
 0xa4f   :  { %v1262_v45 = vpack.c.bf16 %v1259_v8, %v1258_v58 }
 0xa51   :  { %2983 = vmatmul.mubr.bf16.gmra.mrb[56].mxu1 %v1262_v45 }
 0xa52   :  { %3008 = vmatprep.mubr.msk.bf16.mxu1 %vm3400_vm1, %v3399_v1 }
 0xb12   :  { %v1309_v43 = vpop.f32.mrb[48].mxu1 }
 0xb13   :  { %v1332_v27 = vadd.f32 %v1309_v43, %v3807_v51  ;;  %v2976_v16 = vpop.f32.mrb[49].mxu1 }
 0xb14   :  { %v1312_v0 = vpop.f32.mrb[50].mxu1 }
 0xb15   :  { %v3929_v26 = vadd.f32 %v1341_v28, %v1332_v27  ;;  %v1333_v13 = vadd.f32 %v1312_v0, %v3810_v23  ;;  %v2977_v48 = vpop.f32.mrb[51].mxu1 }
 0xb17   :  { %v3932_v52 = vadd.f32 %v1341_v28, %v1333_v13  ;;  %v1363_v44 = vsel %vm236_vm2, %v3929_v26, 0.0 }
 0xb18   :  { %1364 = vadd.xlane.f32.xlu0 %v1363_v44 }
 0xb19   :  { %v1366_v37 = vsel %vm236_vm2, %v3932_v52, 0.0 }
 0xb1a   :  { %1367 = vadd.xlane.f32.xlu1 %v1366_v37 }
 0xb1c   :  { %v1317_v30 = vpop.f32.mrb[52].mxu1 }
 0xb1d   :  { %v1334_v51 = vadd.f32 %v1317_v30, %v3817_v35  ;;  %v2980_v53 = vpop.f32.mrb[53].mxu1 }
 0xb1e   :  { %v1320_v42 = vpop.f32.mrb[54].mxu1  ;;  %v3988_v53 = vld [vmem:[%s4366_s2 + $0x68] sm:$0xff]  }
 0xb1f   :  { %v3939_v40 = vadd.f32 %v1341_v28, %v1334_v51  ;;  %v1335_v23 = vadd.f32 %v1320_v42, %v3820_v59  ;;  %v2981_v39 = vpop.f32.mrb[55].mxu1  ;;  %v3981_v51 = vld [vmem:[%s4366_s2 + $0x60] sm:$0xff]  }
 0xb20   :  { %2987 = vmatpush3.bf16.msra.mxu0 %v3981_v51 }
 0xb21   :  { %v3942_v46 = vadd.f32 %v1341_v28, %v1335_v23  ;;  %v1369_v61 = vsel %vm236_vm2, %v3939_v40, 0.0  ;;  %2988 = vmatprep.subr.bf16.mxu0 %v3399_v1 }
 0xb22   :  { %1370 = vadd.xlane.f32.xlu0 %v1369_v61 }
 0xb23   :  { %v1372_v5 = vsel %vm236_vm2, %v3942_v46, 0.0 }
 0xb24   :  { %1373 = vadd.xlane.f32.xlu1 %v1372_v5  ;;  %v1325_v21 = vpop.f32.mrb[56].mxu1  ;;  %2989 = vmatpush3.bf16.msra.mxu0 %v3988_v53 }
 0xb25   :  { %v1336_v35 = vadd.f32 %v1325_v21, %v3827_v33  ;;  %v2984_v62 = vpop.f32.mrb[57].mxu1  ;;  %3020 = vmatprep.subr.bf16.mxu0 %v3399_v1 }
 0xb26   :  { %v1328_v41 = vpop.f32.mrb[58].mxu1 }
 0xb27   :  { %v3949_v7 = vadd.f32 %v1341_v28, %v1336_v35  ;;  %v1337_v59 = vadd.f32 %v1328_v41, %v3830_v2  ;;  %v2985_v31 = vpop.f32.mrb[59].mxu1 }
 0xb29   :  { %v3952_v57 = vadd.f32 %v1341_v28, %v1337_v59  ;;  %v1375_v55 = vsel %vm236_vm2, %v3949_v7, 0.0 }
 0xb2a   :  { %1376 = vadd.xlane.f32.xlu0 %v1375_v55  ;;  %v1444_v55 = vrot.slane %v3913_v11, %v318_v22 }
 0xb2b   :  { %v1378_v9 = vsel %vm236_vm2, %v3952_v57, 0.0 }
 0xb2c   :  { %1379 = vadd.xlane.f32.xlu1 %v1378_v9 }
 0xba5   :  { %v1365_v10 = vpop.xlane.xlu0 %1364 }
 0xba6   :  { %v1381_v15 = vmul.f32 0.03125, %v1365_v10 }
 0xba7   :  { %v1368_v33 = vpop.xlane.xlu1 %1367 }
 0xba8   :  { %v1387_v34 = vsub.f32 %v3929_v26, %v1381_v15  ;;  %v1382_v18 = vmul.f32 0.03125, %v1368_v33 }
 0xbaa   :  { %v1388_v3 = vsub.f32 %v3932_v52, %v1382_v18  ;;  %v1393_v2 = vmul.f32 %v1387_v34, %v1387_v34  ;;  %v1454_v18 = vrot.slane %v3913_v11, %v328_v32 }
 0xbac   :  { %v1399_v6 = vsel %vm236_vm2, %v1393_v2, 0.0  ;;  %v1394_v25 = vmul.f32 %v1388_v3, %v1388_v3 }
 0xbad   :  { %1400 = vadd.xlane.f32.xlu0 %v1399_v6 }
 0xbae   :  { %v1402_v47 = vsel %vm236_vm2, %v1394_v25, 0.0 }
 0xbaf   :  { %v1371_v29 = vpop.xlane.xlu0 %1370  ;;  %1403 = vadd.xlane.f32.xlu1 %v1402_v47 }
 0xbb0   :  { %v1383_v36 = vmul.f32 0.03125, %v1371_v29 }
 0xbb1   :  { %v1374_v14 = vpop.xlane.xlu1 %1373 }
 0xbb2   :  { %v3963_v49 = vsub.f32 %v3939_v40, %v1383_v36  ;;  %v1384_v19 = vmul.f32 0.03125, %v1374_v14 }
 0xbb4   :  { %v3966_v38 = vsub.f32 %v3942_v46, %v1384_v19  ;;  %v1395_v56 = vmul.f32 %v3963_v49, %v3963_v49 }
 0xbb6   :  { %v1405_v58 = vsel %vm236_vm2, %v1395_v56, 0.0  ;;  %v1396_v8 = vmul.f32 %v3966_v38, %v3966_v38 }
 0xbb7   :  { %1406 = vadd.xlane.f32.xlu0 %v1405_v58  ;;  %v1377_v45 = vpop.xlane.xlu0 %1376 }
 0xbb8   :  { %v1385_v28 = vmul.f32 0.03125, %v1377_v45  ;;  %v1408_v43 = vsel %vm236_vm2, %v1396_v8, 0.0 }
 0xbb9   :  { %1409 = vadd.xlane.f32.xlu1 %v1408_v43  ;;  %v1380_v27 = vpop.xlane.xlu1 %1379 }
 0xbba   :  { %v1391_v16 = vsub.f32 %v3949_v7, %v1385_v28  ;;  %v1386_v0 = vmul.f32 0.03125, %v1380_v27 }
 0xbbc   :  { %v1392_v13 = vsub.f32 %v3952_v57, %v1386_v0  ;;  %v1397_v48 = vmul.f32 %v1391_v16, %v1391_v16 }
 0xbbe   :  { %v1411_v44 = vsel %vm236_vm2, %v1397_v48, 0.0  ;;  %v1398_v37 = vmul.f32 %v1392_v13, %v1392_v13 }
 0xbbf   :  { %1412 = vadd.xlane.f32.xlu0 %v1411_v44 }
 0xbc0   :  { %v1414_v30 = vsel %vm236_vm2, %v1398_v37, 0.0 }
 0xbc1   :  { %1415 = vadd.xlane.f32.xlu1 %v1414_v30 }
 0xc3a   :  { %v1401_v42 = vpop.xlane.xlu0 %1400 }
 0xc3b   :  { %v1417_v23 = vmul.f32 0.03125, %v1401_v42 }
 0xc3c   :  { %v1404_v39 = vpop.xlane.xlu1 %1403 }
 0xc3d   :  { %v1423_v61 = vadd.f32 1e-06, %v1417_v23  ;;  %v1418_v5 = vmul.f32 0.03125, %v1404_v39 }
 0xc3f   :  { %3284 = vrsqrt.f32 %v1423_v61  ;;  %v1424_v21 = vadd.f32 1e-06, %v1418_v5 }
 0xc41   :  { %3286 = vrsqrt.f32 %v1424_v21 }
 0xc44   :  { %v1407_v35 = vpop.xlane.xlu0 %1406 }
 0xc45   :  { %v1419_v62 = vmul.f32 0.03125, %v1407_v35 }
 0xc46   :  { %v1410_v41 = vpop.xlane.xlu1 %1409 }
 0xc47   :  { %v1425_v59 = vadd.f32 1e-06, %v1419_v62  ;;  %v1420_v31 = vmul.f32 0.03125, %v1410_v41 }
 0xc49   :  { %v3285_v9 = vpop.eup %3284  ;;  %3288 = vrsqrt.f32 %v1425_v59  ;;  %v1426_v10 = vadd.f32 1e-06, %v1420_v31 }
 0xc4a   :  { %v1435_v15 = vmul.f32 %v3285_v9, %v1387_v34 }
 0xc4b   :  { %v3287_v33 = vpop.eup %3286  ;;  %3290 = vrsqrt.f32 %v1426_v10 }
 0xc4c   :  { %v1445_v2 = vmul.f32 %v1444_v55, %v1435_v15  ;;  %v1436_v6 = vmul.f32 %v3287_v33, %v1388_v3  ;;  %v1413_v25 = vpop.xlane.xlu0 %1412 }
 0xc4d   :  { %v1421_v47 = vmul.f32 0.03125, %v1413_v25 }
 0xc4e   :  { %v1446_v29 = vmul.f32 %v1444_v55, %v1436_v6  ;;  %v1416_v36 = vpop.xlane.xlu1 %1415  ;;  %v1455_v56 = vadd.f32 %v1454_v18, %v1445_v2 }
 0xc4f   :  { %v1427_v14 = vadd.f32 1e-06, %v1421_v47  ;;  %v1422_v19 = vmul.f32 0.03125, %v1416_v36 }
 0xc50   :  { %v1456_v22 = vadd.f32 %v1454_v18, %v1446_v29 }
 0xc51   :  { %3292 = vrsqrt.f32 %v1427_v14  ;;  %v1428_v58 = vadd.f32 1e-06, %v1422_v19 }
 0xc52   :  { %v1461_v8 = vpack.c.bf16 %v1456_v22, %v1455_v56 }
 0xc53   :  { %v3289_v34 = vpop.eup %3288  ;;  %3294 = vrsqrt.f32 %v1428_v58 }
 0xc54   :  { %v1437_v45 = vmul.f32 %v3289_v34, %v3963_v49  ;;  %2991 = vmatmul.mubr.msk.bf16.vlgmr.msra.gmra.mrb[48].mxu0 %vm236_vm2, %v1461_v8 }
 0xc55   :  { %v3291_v32 = vpop.eup %3290  ;;  %2994 = vmatprep.mubr.msk.bf16.mxu0 %vm3400_vm1, %v3399_v1 }
 0xc56   :  { %v1438_v11 = vmul.f32 %v3291_v32, %v3966_v38  ;;  %v1447_v3 = vmul.f32 %v1444_v55, %v1437_v45  ;;  %v4012_v38 = vld [vmem:[%s4367_s3 + $0x10] sm:$0xff] }
 0xc58   :  { %v1448_v28 = vmul.f32 %v1444_v55, %v1438_v11  ;;  %v1457_v43 = vadd.f32 %v1454_v18, %v1447_v3 }
 0xc5a   :  { %v1458_v27 = vadd.f32 %v1454_v18, %v1448_v28 }
 0xc5b   :  { %v3293_v0 = vpop.eup %3292 }
 0xc5c   :  { %v1439_v48 = vmul.f32 %v3293_v0, %v1391_v16  ;;  %v1462_v44 = vpack.c.bf16 %v1458_v27, %v1457_v43  ;;  %v1545_v16 = vrot.slane %v4012_v38, %v3584_v60 }
 0xc5d   :  { %v3295_v37 = vpop.eup %3294 }
 0xc5e   :  { %v1440_v30 = vmul.f32 %v3295_v37, %v1392_v13  ;;  %2995 = vmatmul.mubr.msk.bf16.gmra.mrb[52].mxu0 %vm236_vm2, %v1462_v44  ;;  %v1449_v49 = vmul.f32 %v1444_v55, %v1439_v48 }
 0xc5f   :  { %2998 = vmatprep.mubr.msk.bf16.mxu0 %vm3400_vm1, %v3399_v1 }
 0xc60   :  { %v1450_v42 = vmul.f32 %v1444_v55, %v1440_v30  ;;  %v1459_v23 = vadd.f32 %v1454_v18, %v1449_v49 }
 0xc62   :  { %v1460_v39 = vadd.f32 %v1454_v18, %v1450_v42 }
 0xc64   :  { %v1463_v61 = vpack.c.bf16 %v1460_v39, %v1459_v23 }
 0xc66   :  { %2999 = vmatmul.mubr.msk.bf16.gmra.mrb[56].mxu0 %vm236_vm2, %v1463_v61 }
 0xc67   :  { %3026 = vmatprep.mubr.msk.bf16.mxu0 %vm3400_vm1, %v3399_v1 }
 0xd27   :  { %v1519_v13 = vpop.f32.mrb[48].mxu0 }
 0xd28   :  { %v1546_v5 = vadd.f32 %v1545_v16, %v1519_v13  ;;  %v2992_v21 = vpop.f32.mrb[49].mxu0 }
 0xd29   :  { %v1522_v35 = vpop.f32.mrb[50].mxu0 }
 0xd2a   :  { %v1547_v62 = vadd.f32 %v1545_v16, %v1522_v35  ;;  %v2993_v41 = vpop.f32.mrb[51].mxu0  ;;  %v1552_v59 = vmul.f32 0.25, %v1546_v5 }
 0xd2c   :  { %v1553_v31 = vmul.f32 0.25, %v1547_v62  ;;  %v4016_v55 = vpack.c.bf16 %v1547_v62, %v1546_v5 }
 0xd2e   :  { %1567 = vrot.lane.b32.xlu0 %v4016_v55, %s3401_s17  ;;  %v1558_v9 = vpack.c.bf16 %v1553_v31, %v1552_v59 }
 0xd31   :  { %v1527_v10 = vpop.f32.mrb[52].mxu0 }
 0xd32   :  { %v1548_v15 = vadd.f32 %v1545_v16, %v1527_v10  ;;  %v2996_v33 = vpop.f32.mrb[53].mxu0 }
 0xd33   :  { %v1530_v18 = vpop.f32.mrb[54].mxu0 }
 0xd34   :  { %v1549_v2 = vadd.f32 %v1545_v16, %v1530_v18  ;;  %v2997_v6 = vpop.f32.mrb[55].mxu0  ;;  %v1554_v25 = vmul.f32 0.25, %v1548_v15 }
 0xd36   :  { %v1555_v47 = vmul.f32 0.25, %v1549_v2  ;;  %v4020_v29 = vpack.c.bf16 %v1549_v2, %v1548_v15 }
 0xd38   :  { %1803 = vrot.lane.b32.xlu0 %v4020_v29, %s3402_s18  ;;  %1569 = vrot.lane.b32.xlu1 %v4020_v29, %s3401_s17  ;;  %v1559_v36 = vpack.c.bf16 %v1555_v47, %v1554_v25 }
 0xd39   :  { %v1535_v14 = vpop.f32.mrb[56].mxu0 }
 0xd3a   :  { %v1550_v19 = vadd.f32 %v1545_v16, %v1535_v14  ;;  %v3000_v56 = vpop.f32.mrb[57].mxu0 }
 0xd3b   :  { %v1538_v22 = vpop.f32.mrb[58].mxu0 }
 0xd3c   :  { %v1551_v58 = vadd.f32 %v1545_v16, %v1538_v22  ;;  %1795 = vrot.lane.b32.xlu0 %v1558_v9, %s3403_s19  ;;  %v3001_v8 = vpop.f32.mrb[59].mxu0  ;;  %v1556_v34 = vmul.f32 0.25, %v1550_v19 }
 0xd3e   :  { %v1557_v45 = vmul.f32 0.25, %v1551_v58  ;;  %v4027_v32 = vpack.c.bf16 %v1551_v58, %v1550_v19 }
 0xd40   :  { %v4029_v11 = vpack.c.bf16 %v1557_v45, %v1556_v34  ;;  %1571 = vrot.lane.b32.xlu1 %v4027_v32, %s3401_s17 }
 0xd44   :  { %1801 = vrot.lane.b32.xlu1 %v4016_v55, %s3402_s18 }
 0xd48   :  { %1805 = vrot.lane.b32.xlu1 %v4027_v32, %s3402_s18 }
 0xd4c   :  { %1797 = vrot.lane.b32.xlu1 %v1559_v36, %s3403_s19 }
 0xda0   :  { %v1568_v3 = vpop.permute.xlu0 %1567 }
 0xda1   :  { %v1583_v28 = vsel %vm448_vm3, %v1568_v3, 0 }
 0xda2   :  { %3003 = vmatpush3.bf16.xpose.msra.mxu1 %v1583_v28 }
 0xda3   :  { %3004 = vmatprep.subr.bf16.mxu1 %v3399_v1 }
 0xdaa   :  { %v1570_v43 = vpop.permute.xlu1 %1569  ;;  %v1804_v30 = vpop.permute.xlu0 %1803 }
 0xdab   :  { %v1586_v27 = vsel %vm448_vm3, %v1570_v43, 0  ;;  %v1820_v49 = vsel %vm448_vm3, %v1804_v30, 0 }
 0xdac   :  { %3005 = vmatpush3.bf16.xpose.msra.mxu1 %v1586_v27 }
 0xdad   :  { %3006 = vmatprep.subr.bf16.mxu1 %v3399_v1 }
 0xdae   :  { %v1796_v39 = vpop.permute.xlu0 %1795 }
 0xdb2   :  { %v1572_v0 = vpop.permute.xlu1 %1571 }
 0xdb3   :  { %v1589_v48 = vsel %vm448_vm3, %v1572_v0, 0 }
 0xdb4   :  { %3007 = vmatpush3.bf16.xpose.msra.mxu1 %v1589_v48 }
 0xdb5   :  { %3038 = vmatprep.subr.bf16.mxu1 %v3399_v1 }
 0xdb6   :  { %v1802_v44 = vpop.permute.xlu1 %1801 }
 0xdb7   :  { %v1817_v37 = vsel %vm448_vm3, %v1802_v44, 0 }
 0xdba   :  { %v1806_v42 = vpop.permute.xlu1 %1805 }
 0xdbb   :  { %3009 = vmatmul.mubr.msk.bf16.vlgmr.msra.gmra.mrb[60].mxu1 %vm448_vm3, %v1558_v9  ;;  %v1823_v23 = vsel %vm448_vm3, %v1806_v42, 0 }
 0xdbc   :  { %3039 = vmatpush3.bf16.xpose.msra.mxu1 %v1817_v37  ;;  %3012 = vmatprep.mubr.msk.bf16.mxu1 %vm3400_vm1, %v3399_v1 }
 0xdbd   :  { %3040 = vmatprep.subr.bf16.mxu1 %v3399_v1 }
 0xdbe   :  { %v1798_v61 = vpop.permute.xlu1 %1797 }
 0xdc3   :  { %3013 = vmatmul.mubr.msk.bf16.gmra.mrb[64].mxu1 %vm448_vm3, %v1559_v36 }
 0xdc4   :  { %3041 = vmatpush3.bf16.xpose.msra.mxu1 %v1820_v49  ;;  %3016 = vmatprep.mubr.msk.bf16.mxu1 %vm3400_vm1, %v3399_v1 }
 0xdc5   :  { %3042 = vmatprep.subr.bf16.mxu1 %v3399_v1 }
 0xdcb   :  { %3017 = vmatmul.mubr.msk.bf16.gmra.mrb[68].mxu1 %vm448_vm3, %v4029_v11 }
 0xdcc   :  { %3043 = vmatpush3.bf16.xpose.msra.mxu1 %v1823_v23  ;;  %3044 = vmatprep.mubr.msk.bf16.mxu1 %vm3400_vm1, %v3399_v1 }
 0xdcd   :  { %3074 = vmatprep.subr.bf16.mxu1 %v3399_v1 }
 0xdd3   :  { %3045 = vmatmul.mubr.msk.bf16.vlgmr.msra.gmra.mrb[72].mxu1 %vm448_vm3, %v1796_v39 }
 0xdd4   :  { %3048 = vmatprep.mubr.msk.bf16.mxu1 %vm3400_vm1, %v3399_v1 }
 0xddb   :  { %3049 = vmatmul.mubr.msk.bf16.gmra.mrb[76].mxu1 %vm448_vm3, %v1798_v61 }
 0xddc   :  { %3052 = vmatprep.mubr.msk.bf16.mxu1 %vm3400_vm1, %v3399_v1 }
 0xe8e   :  { %v1625_v16 = vpop.f32.mrb[60].mxu1 }
 0xe8f   :  { %v1626_v13 = vadd.f32 %v1625_v16, %v3648_v4  ;;  %v3010_v5 = vpop.f32.mrb[61].mxu1 }
 0xe90   :  { %v1628_v21 = vpop.f32.mrb[62].mxu1 }
 0xe91   :  { %v1629_v35 = vadd.f32 %v1628_v21, %v3648_v4  ;;  %v3011_v62 = vpop.f32.mrb[63].mxu1  ;;  %v1648_v41 = vsel %vm63_vm0, %v1626_v13, -inf }
 0xe92   :  { %1649 = vmax.xlane.f32.xlu0 %v1648_v41 }
 0xe93   :  { %v1651_v59 = vsel %vm63_vm0, %v1629_v35, -inf }
 0xe94   :  { %1652 = vmax.xlane.f32.xlu1 %v1651_v59 }
 0xe96   :  { %v1633_v31 = vpop.f32.mrb[64].mxu1 }
 0xe97   :  { %v4071_v9 = vadd.f32 %v1633_v31, %v3648_v4  ;;  %v3014_v10 = vpop.f32.mrb[65].mxu1 }
 0xe98   :  { %v1636_v15 = vpop.f32.mrb[66].mxu1 }
 0xe99   :  { %v1637_v33 = vadd.f32 %v1636_v15, %v3660_v20  ;;  %v3015_v18 = vpop.f32.mrb[67].mxu1  ;;  %v1654_v2 = vsel %vm63_vm0, %v4071_v9, -inf }
 0xe9a   :  { %1655 = vmax.xlane.f32.xlu0 %v1654_v2 }
 0xe9b   :  { %v1657_v6 = vsel %vm63_vm0, %v1637_v33, -inf }
 0xe9e   :  { %1658 = vmax.xlane.f32.xlu0 %v1657_v6  ;;  %v1641_v25 = vpop.f32.mrb[68].mxu1 }
 0xe9f   :  { %v4078_v47 = vadd.f32 %v1641_v25, %v3660_v20  ;;  %v3018_v36 = vpop.f32.mrb[69].mxu1 }
 0xea0   :  { %v1644_v14 = vpop.f32.mrb[70].mxu1 }
 0xea1   :  { %v1645_v19 = vadd.f32 %v1644_v14, %v3660_v20  ;;  %v3019_v56 = vpop.f32.mrb[71].mxu1  ;;  %v1660_v22 = vsel %vm63_vm0, %v4078_v47, -inf }
 0xea2   :  { %1661 = vmax.xlane.f32.xlu0 %v1660_v22 }
 0xea3   :  { %v1663_v58 = vsel %vm63_vm0, %v1645_v19, -inf }
 0xea4   :  { %1664 = vmax.xlane.f32.xlu1 %v1663_v58 }
 0xea6   :  { %v1859_v8 = vpop.f32.mrb[72].mxu1 }
 0xea7   :  { %v1860_v34 = vadd.f32 %v1859_v8, %v3648_v4  ;;  %v3046_v45 = vpop.f32.mrb[73].mxu1 }
 0xea8   :  { %v1862_v3 = vpop.f32.mrb[74].mxu1 }
 0xea9   :  { %v4086_v28 = vadd.f32 %v1862_v3, %v3648_v4  ;;  %v3047_v43 = vpop.f32.mrb[75].mxu1  ;;  %v1882_v27 = vsel %vm63_vm0, %v1860_v34, -inf }
 0xeaa   :  { %1883 = vmax.xlane.f32.xlu0 %v1882_v27 }
 0xeab   :  { %v1885_v0 = vsel %vm63_vm0, %v4086_v28, -inf }
 0xeac   :  { %1886 = vmax.xlane.f32.xlu1 %v1885_v0 }
 0xeae   :  { %v1867_v48 = vpop.f32.mrb[76].mxu1 }
 0xeaf   :  { %v1868_v44 = vadd.f32 %v1867_v48, %v3648_v4  ;;  %v3050_v37 = vpop.f32.mrb[77].mxu1 }
 0xeb0   :  { %v1870_v30 = vpop.f32.mrb[78].mxu1 }
 0xeb1   :  { %v3051_v49 = vpop.f32.mrb[79].mxu1  ;;  %v1888_v42 = vsel %vm63_vm0, %v1868_v44, -inf  ;;  %v4098_v23 = vadd.f32 %v1870_v30, %v3660_v20 }
 0xeb2   :  { %1889 = vmax.xlane.f32.xlu0 %v1888_v42 }
 0xeb3   :  { %v1891_v39 = vsel %vm63_vm0, %v4098_v23, -inf }
 0xebd   :  { %1719 = vrot.lane.b32.xlu1 %v4020_v29, %s3404_s20 }
 0xec8   :  { %1717 = vrot.lane.b32.xlu0 %v4016_v55, %s3404_s20 }
 0xee1   :  { %1892 = vmax.xlane.f32.xlu1 %v1891_v39 }
 0xef2   :  { %1951 = vrot.lane.b32.xlu1 %v4016_v55, %s3406_s21 }
 0xf1f   :  { %v1650_v4 = vpop.xlane.xlu0 %1649 }
 0xf20   :  { %v1666_v61 = vsub.f32 %v1626_v13, %v1650_v4 }
 0xf21   :  { %v1653_v16 = vpop.xlane.xlu1 %1652 }
 0xf22   :  { %v1672_v5 = vmul.f32 1.442695, %v1666_v61  ;;  %v1667_v21 = vsub.f32 %v1629_v35, %v1653_v16 }
 0xf24   :  { %3296 = vpow2.f32 %v1672_v5  ;;  %v1674_v62 = vmul.f32 1.442695, %v1667_v21 }
 0xf26   :  { %3298 = vpow2.f32 %v1674_v62 }
 0xf27   :  { %v1656_v41 = vpop.xlane.xlu0 %1655 }
 0xf28   :  { %v1668_v37 = vsub.f32 %v4071_v9, %v1656_v41 }
 0xf2a   :  { %v1676_v49 = vmul.f32 1.442695, %v1668_v37 }
 0xf2b   :  { %v1659_v59 = vpop.xlane.xlu0 %1658 }
 0xf2c   :  { %v1669_v31 = vsub.f32 %v1637_v33, %v1659_v59 }
 0xf2e   :  { %v4104_v10 = vpop.eup %3296  ;;  %v1678_v15 = vmul.f32 1.442695, %v1669_v31 }
 0xf2f   :  { %v1684_v18 = vsel %vm63_vm0, %v4104_v10, 0.0  ;;  %v1662_v6 = vpop.xlane.xlu0 %1661 }
 0xf30   :  { %v4108_v2 = vpop.eup %3298  ;;  %3300 = vpow2.f32 %v1678_v15  ;;  %1685 = vadd.xlane.f32.xlu0 %v1684_v18  ;;  %v1670_v42 = vsub.f32 %v4078_v47, %v1662_v6 }
 0xf31   :  { %v1665_v55 = vpop.xlane.xlu1 %1664  ;;  %v1687_v13 = vsel %vm63_vm0, %v4108_v2, 0.0 }
 0xf32   :  { %v1671_v35 = vsub.f32 %v1645_v19, %v1665_v55  ;;  %1688 = vadd.xlane.f32.xlu1 %v1687_v13  ;;  %v1680_v39 = vmul.f32 1.442695, %v1670_v42 }
 0xf34   :  { %v1682_v25 = vmul.f32 1.442695, %v1671_v35 }
 0xf36   :  { %3302 = vpow2.f32 %v1682_v25 }
 0xf37   :  { %v1884_v33 = vpop.xlane.xlu0 %1883 }
 0xf38   :  { %v1900_v36 = vsub.f32 %v1860_v34, %v1884_v33 }
 0xf39   :  { %v1887_v3 = vpop.xlane.xlu1 %1886 }
 0xf3a   :  { %v4112_v14 = vpop.eup %3300  ;;  %v1906_v56 = vmul.f32 1.442695, %v1900_v36  ;;  %v1901_v4 = vsub.f32 %v4086_v28, %v1887_v3 }
 0xf3b   :  { %v1693_v22 = vsel %vm63_vm0, %v4112_v14, 0.0 }
 0xf3c   :  { %3304 = vpow2.f32 %v1906_v56  ;;  %1694 = vadd.xlane.f32.xlu1 %v1693_v22  ;;  %v1908_v61 = vmul.f32 1.442695, %v1901_v4 }
 0xf3d   :  { %v1720_v0 = vpop.permute.xlu1 %1719 }
 0xf3f   :  { %v1890_v58 = vpop.xlane.xlu0 %1889 }
 0xf40   :  { %v4116_v8 = vpop.eup %3302  ;;  %v1902_v45 = vsub.f32 %v1868_v44, %v1890_v58 }
 0xf41   :  { %v1699_v19 = vsel %vm63_vm0, %v4116_v8, 0.0 }
 0xf42   :  { %v1910_v43 = vmul.f32 1.442695, %v1902_v45  ;;  %1700 = vadd.xlane.f32.xlu1 %v1699_v19 }
 0xf43   :  { %v1718_v27 = vpop.permute.xlu0 %1717 }
 0xf44   :  { %3306 = vpow2.f32 %v1910_v43  ;;  %3021 = vmatpush3.bf16.msra.mxu0 %v1718_v27 }
 0xf45   :  { %3022 = vmatprep.subr.bf16.mxu0 %v3399_v1  ;;  %3308 = vpow2.f32 %v1676_v49 }
 0xf46   :  { %v4121_v34 = vpop.eup %3304  ;;  %1721 = vrot.lane.b32.xlu0 %v4027_v32, %s3404_s20  ;;  %3310 = vpow2.f32 %v1680_v39 }
 0xf47   :  { %v1918_v48 = vsel %vm63_vm0, %v4121_v34, 0.0  ;;  %3312 = vpow2.f32 %v1908_v61 }
 0xf48   :  { %3023 = vmatpush3.bf16.msra.mxu0 %v1720_v0  ;;  %1919 = vadd.xlane.f32.xlu1 %v1918_v48 }
 0xf49   :  { %3024 = vmatprep.subr.bf16.mxu0 %v3399_v1 }
 0xf4e   :  { %v4128_v44 = vpop.eup %3306 }
 0xf4f   :  { %v1924_v30 = vsel %vm63_vm0, %v4128_v44, 0.0  ;;  %v3309_v16 = vpop.eup %3308 }
 0xf50   :  { %1925 = vadd.xlane.f32.xlu1 %v1924_v30  ;;  %v1690_v5 = vsel %vm63_vm0, %v3309_v16, 0.0  ;;  %v3311_v21 = vpop.eup %3310 }
 0xf51   :  { %v1696_v9 = vsel %vm63_vm0, %v3311_v21, 0.0  ;;  %v4137_v62 = vpop.eup %3312 }
 0xf52   :  { %v1921_v47 = vsel %vm63_vm0, %v4137_v62, 0.0 }
 0xf65   :  { %1691 = vadd.xlane.f32.xlu0 %v1690_v5 }
 0xf69   :  { %1697 = vadd.xlane.f32.xlu0 %v1696_v9 }
 0xf6d   :  { %1922 = vadd.xlane.f32.xlu0 %v1921_v47 }
 0xf6e   :  { %v1893_v41 = vpop.xlane.xlu1 %1892 }
 0xf6f   :  { %v1903_v28 = vsub.f32 %v4098_v23, %v1893_v41 }
 0xf71   :  { %v1912_v59 = vmul.f32 1.442695, %v1903_v28 }
 0xf72   :  { %v1952_v23 = vpop.permute.xlu1 %1951 }
 0xf73   :  { %3314 = vpow2.f32 %v1912_v59 }
 0xf7d   :  { %v4142_v31 = vpop.eup %3314 }
 0xf7e   :  { %v1927_v15 = vsel %vm63_vm0, %v4142_v31, 0.0 }
 0xf7f   :  { %1928 = vadd.xlane.f32.xlu1 %v1927_v15 }
 0xf83   :  { %1953 = vrot.lane.b32.xlu0 %v4020_v29, %s3406_s21 }
 0xf87   :  { %1799 = vrot.lane.b32.xlu0 %v4029_v11, %s3403_s19 }
 0xf90   :  { %1955 = vrot.lane.b32.xlu1 %v4027_v32, %s3406_s21 }
 0xf94   :  { %2059 = vrot.lane.b32.xlu1 %v3981_v51, %s3407_s22 }
 0xf98   :  { %2061 = vrot.lane.b32.xlu1 %v3988_v53, %s3407_s22 }
 0xfbd   :  { %v1686_v18 = vpop.xlane.xlu0 %1685 }
 0xfbe   :  { %3316 = vrcp.f32 %v1686_v18 }
 0xfbf   :  { %v1689_v55 = vpop.xlane.xlu1 %1688 }
 0xfc0   :  { %3318 = vrcp.f32 %v1689_v55 }
 0xfc1   :  { %v1722_v13 = vpop.permute.xlu0 %1721 }
 0xfc2   :  { %3025 = vmatpush3.bf16.msra.mxu0 %v1722_v13 }
 0xfc3   :  { %3056 = vmatprep.subr.bf16.mxu0 %v3399_v1 }
 0xfc8   :  { %v3317_v29 = vpop.eup %3316 }
 0xfc9   :  { %v1708_v35 = vmul.f32 %v3317_v29, %v4104_v10  ;;  %v1695_v51 = vpop.xlane.xlu1 %1694 }
 0xfca   :  { %v3319_v11 = vpop.eup %3318  ;;  %3320 = vrcp.f32 %v1695_v51 }
 0xfcb   :  { %v1709_v32 = vmul.f32 %v3319_v11, %v4108_v2 }
 0xfcd   :  { %v1714_v6 = vpack.c.bf16 %v1709_v32, %v1708_v35 }
 0xfcf   :  { %3027 = vmatmul.mubr.msk.bf16.vlgmr.msra.gmra.mrb[60].mxu0 %vm63_vm0, %v1714_v6  ;;  %v1701_v25 = vpop.xlane.xlu1 %1700 }
 0xfd0   :  { %3057 = vmatpush3.bf16.msra.mxu0 %v1952_v23  ;;  %3030 = vmatprep.mubr.msk.bf16.mxu0 %vm3400_vm1, %v3399_v1 }
 0xfd1   :  { %3058 = vmatprep.subr.bf16.mxu0 %v3399_v1 }
 0xfd4   :  { %v3321_v36 = vpop.eup %3320 }
 0xfd5   :  { %v1711_v58 = vmul.f32 %v3321_v36, %v4112_v14  ;;  %v1920_v45 = vpop.xlane.xlu1 %1919 }
 0xfdd   :  { %v1926_v48 = vpop.xlane.xlu1 %1925 }
 0xff2   :  { %v1692_v53 = vpop.xlane.xlu0 %1691 }
 0xff3   :  { %3322 = vrcp.f32 %v1692_v53 }
 0xff6   :  { %v1698_v33 = vpop.xlane.xlu0 %1697 }
 0xff7   :  { %3324 = vrcp.f32 %v1698_v33 }
 0xff8   :  { %3326 = vrcp.f32 %v1701_v25 }
 0xffa   :  { %v1923_v10 = vpop.xlane.xlu0 %1922 }
 0xffb   :  { %3328 = vrcp.f32 %v1923_v10 }
 0xffc   :  { %3330 = vrcp.f32 %v1920_v45 }
 0xffd   :  { %v3323_v2 = vpop.eup %3322  ;;  %3332 = vrcp.f32 %v1926_v48 }
 0xffe   :  { %v1954_v56 = vpop.permute.xlu0 %1953  ;;  %v1710_v22 = vmul.f32 %v3323_v2, %v3309_v16 }
 0xfff   :  { %3059 = vmatpush3.bf16.msra.mxu0 %v1954_v56 }
0x1000   :  { %v1715_v3 = vpack.c.bf16 %v1711_v58, %v1710_v22  ;;  %3060 = vmatprep.subr.bf16.mxu0 %v3399_v1 }
0x1001   :  { %v3325_v19 = vpop.eup %3324 }
0x1002   :  { %v1800_v43 = vpop.permute.xlu0 %1799  ;;  %3031 = vmatmul.mubr.msk.bf16.gmra.mrb[64].mxu0 %vm63_vm0, %v1715_v3  ;;  %v3327_v27 = vpop.eup %3326  ;;  %v1712_v0 = vmul.f32 %v3325_v19, %v3311_v21 }
0x1003   :  { %3053 = vmatmul.mubr.msk.bf16.gmra.mrb[80].mxu1 %vm448_vm3, %v1800_v43  ;;  %3034 = vmatprep.mubr.msk.bf16.mxu0 %vm3400_vm1, %v3399_v1  ;;  %v1713_v14 = vmul.f32 %v3327_v27, %v4116_v8 }
0x1004   :  { %3078 = vmatprep.mubr.msk.bf16.mxu1 %vm3400_vm1, %v3399_v1 }
0x1005   :  { %v1716_v37 = vpack.c.bf16 %v1713_v14, %v1712_v0  ;;  %v3329_v30 = vpop.eup %3328 }
0x1006   :  { %v3331_v42 = vpop.eup %3330  ;;  %v1943_v39 = vmul.f32 %v3329_v30, %v4137_v62 }
0x1007   :  { %v1942_v4 = vmul.f32 %v3331_v42, %v4121_v34  ;;  %v3333_v8 = vpop.eup %3332 }
0x1008   :  { %v1944_v21 = vmul.f32 %v3333_v8, %v4128_v44 }
0x1009   :  { %v1948_v16 = vpack.c.bf16 %v1943_v39, %v1942_v4 }
0x100a   :  { %3035 = vmatmul.mubr.msk.bf16.gmra.mrb[68].mxu0 %vm63_vm0, %v1716_v37 }
0x100b   :  { %3062 = vmatprep.mubr.msk.bf16.mxu0 %vm3400_vm1, %v3399_v1 }
0x100c   :  { %v1929_v49 = vpop.xlane.xlu1 %1928 }
0x100d   :  { %3334 = vrcp.f32 %v1929_v49 }
0x1010   :  { %v1956_v61 = vpop.permute.xlu1 %1955 }
0x1011   :  { %3061 = vmatpush3.bf16.msra.mxu0 %v1956_v61 }
0x1012   :  { %3090 = vmatprep.subr.bf16.mxu0 %v3399_v1 }
0x1014   :  { %3063 = vmatmul.mubr.msk.bf16.vlgmr.msra.gmra.mrb[72].mxu0 %vm63_vm0, %v1948_v16  ;;  %v2060_v34 = vpop.permute.xlu1 %2059 }
0x1015   :  { %3066 = vmatprep.mubr.msk.bf16.mxu0 %vm3400_vm1, %v3399_v1  ;;  %3075 = vmatpush3.bf16.msra.mxu1 %v2060_v34 }
0x1016   :  { %3076 = vmatprep.subr.bf16.mxu1 %v3399_v1 }
0x1017   :  { %v3335_v5 = vpop.eup %3334 }
0x1018   :  { %v1945_v9 = vmul.f32 %v3335_v5, %v4142_v31  ;;  %v2062_v25 = vpop.permute.xlu1 %2061 }
0x1019   :  { %3077 = vmatpush3.bf16.msra.mxu1 %v2062_v25 }
0x101a   :  { %v1949_v47 = vpack.c.bf16 %v1945_v9, %v1944_v21  ;;  %3106 = vmatprep.subr.bf16.mxu1 %v3399_v1 }
0x101c   :  { %3067 = vmatmul.mubr.msk.bf16.gmra.mrb[76].mxu0 %vm63_vm0, %v1949_v47  ;;  %v4210_v47 = vrot.slane %v4012_v38, %v3802_v54 }
0x101d   :  { %3070 = vmatprep.mubr.msk.bf16.mxu0 %vm3400_vm1, %v3399_v1 }
0x10a2   :  { %v1769_v62 = vpop.f32.mrb[60].mxu0 }
0x10a3   :  { %v3028_v41 = vpop.f32.mrb[61].mxu0 }
0x10a4   :  { %v1772_v28 = vpop.f32.mrb[62].mxu0 }
0x10a5   :  { %v3029_v59 = vpop.f32.mrb[63].mxu0 }
0x10d5   :  { %v1777_v15 = vpop.f32.mrb[64].mxu0 }
0x10d6   :  { %v3032_v23 = vpop.f32.mrb[65].mxu0  ;;  %v1875_v18 = vpop.f32.mrb[80].mxu1 }
0x10d7   :  { %v1876_v44 = vadd.f32 %v1875_v18, %v3660_v20  ;;  %v1780_v31 = vpop.f32.mrb[66].mxu0  ;;  %v3054_v55 = vpop.f32.mrb[81].mxu1 }
0x10d8   :  { %v3033_v13 = vpop.f32.mrb[67].mxu0  ;;  %v1878_v29 = vpop.f32.mrb[82].mxu1 }
0x10d9   :  { %v3055_v11 = vpop.f32.mrb[83].mxu1  ;;  %v1894_v35 = vsel %vm63_vm0, %v1876_v44, -inf  ;;  %v1879_v43 = vadd.f32 %v1878_v29, %v3660_v20 }
0x10da   :  { %1895 = vmax.xlane.f32.xlu1 %v1894_v35 }
0x10db   :  { %v1897_v27 = vsel %vm63_vm0, %v1879_v43, -inf }
0x10dd   :  { %v4189_v32 = vpop.f32.mrb[68].mxu0 }
0x10de   :  { %v3036_v6 = vpop.f32.mrb[69].mxu0 }
0x10df   :  { %v4191_v51 = vpop.f32.mrb[70].mxu0 }
0x10e0   :  { %v3037_v53 = vpop.f32.mrb[71].mxu0 }
0x10e7   :  { %v2003_v33 = vpop.f32.mrb[72].mxu0 }
0x10e8   :  { %v3064_v10 = vpop.f32.mrb[73].mxu0 }
0x10e9   :  { %v2006_v36 = vpop.f32.mrb[74].mxu0 }
0x10ea   :  { %v3164_v2 = vpack.i.bf16 %v2006_v36, %v2003_v33  ;;  %v3065_v56 = vpop.f32.mrb[75].mxu0 }
0x10ec   :  { %3165 = vrot.lane.b32.xlu0 %v3164_v2, %s3408_s23 }
0x10ef   :  { %v2011_v22 = vpop.f32.mrb[76].mxu0 }
0x10f0   :  { %v3068_v58 = vpop.f32.mrb[77].mxu0 }
0x10f1   :  { %v2014_v45 = vpop.f32.mrb[78].mxu0 }
0x10f2   :  { %v3169_v3 = vpack.i.bf16 %v2014_v45, %v2011_v22  ;;  %v3069_v19 = vpop.f32.mrb[79].mxu0 }
0x10f4   :  { %3170 = vrot.lane.b32.xlu0 %v3169_v3, %s3408_s23 }
0x1113   :  { %1898 = vmax.xlane.f32.xlu0 %v1897_v27 }
0x115e   :  { %v3166_v0 = vpop.permute.xlu0 %3165 }
0x115f   :  { %v3168_v14 = vunpack.i.h.bf16 %v3166_v0  ;;  %v3167_v48 = vunpack.i.l.bf16 %v3166_v0 }
0x1161   :  { %v2051_v37 = vsel %vm448_vm3, %v1772_v28, %v3168_v14  ;;  %v2050_v30 = vsel %vm448_vm3, %v1769_v62, %v3167_v48 }
0x1162   :  { %v2056_v49 = vpack.c.bf16 %v2051_v37, %v2050_v30 }
0x1164   :  { %3079 = vmatmul.mubr.msk.bf16.vlgmr.msra.gmra.mrb[84].mxu1 %vm236_vm2, %v2056_v49 }
0x1165   :  { %3082 = vmatprep.mubr.msk.bf16.mxu1 %vm3400_vm1, %v3399_v1 }
0x1166   :  { %v3171_v42 = vpop.permute.xlu0 %3170 }
0x1167   :  { %v3173_v39 = vunpack.i.h.bf16 %v3171_v42  ;;  %v3172_v4 = vunpack.i.l.bf16 %v3171_v42  ;;  %v1896_v8 = vpop.xlane.xlu1 %1895 }
0x1168   :  { %v1904_v21 = vsub.f32 %v1876_v44, %v1896_v8 }
0x1169   :  { %v2053_v20 = vsel %vm448_vm3, %v1780_v31, %v3173_v39  ;;  %v2052_v61 = vsel %vm448_vm3, %v1777_v15, %v3172_v4 }
0x116a   :  { %v2057_v16 = vpack.c.bf16 %v2053_v20, %v2052_v61  ;;  %v1914_v34 = vmul.f32 1.442695, %v1904_v21 }
0x116c   :  { %3083 = vmatmul.mubr.msk.bf16.gmra.mrb[88].mxu1 %vm236_vm2, %v2057_v16  ;;  %3336 = vpow2.f32 %v1914_v34 }
0x116d   :  { %3086 = vmatprep.mubr.msk.bf16.mxu1 %vm3400_vm1, %v3399_v1 }
0x1176   :  { %v3337_v10 = vpop.eup %3336 }
0x1177   :  { %v1930_v2 = vsel %vm63_vm0, %v3337_v10, 0.0 }
0x11a0   :  { %v1899_v5 = vpop.xlane.xlu0 %1898 }
0x11a1   :  { %v1905_v9 = vsub.f32 %v1879_v43, %v1899_v5 }
0x11a3   :  { %v1916_v59 = vmul.f32 1.442695, %v1905_v9 }
0x11a5   :  { %3338 = vpow2.f32 %v1916_v59  ;;  %v3193_v59 = vld [vmem:[%s4366_s2 + $0x78] sm:$0xff]  }
0x11af   :  { %v3339_v36 = vpop.eup %3338 }
0x11b0   :  { %v1933_v56 = vsel %vm63_vm0, %v3339_v36, 0.0 }
0x1237   :  { %v2108_v62 = vpop.f32.mrb[84].mxu1 }
0x1238   :  { %v2131_v41 = vadd.f32 %v2108_v62, %v3929_v26  ;;  %v3080_v28 = vpop.f32.mrb[85].mxu1 }
0x1239   :  { %v2111_v15 = vpop.f32.mrb[86].mxu1  ;;  %v3192_v28 = vld [vmem:[%s4366_s2 + $0x70] sm:$0xff]  }
0x123a   :  { %v4214_v23 = vadd.f32 %v4210_v47, %v2131_v41  ;;  %v2132_v18 = vadd.f32 %v2111_v15, %v3932_v52  ;;  %v3081_v31 = vpop.f32.mrb[87].mxu1  ;;  %3091 = vmatpush3.bf16.msra.mxu0 %v3192_v28 }
0x123b   :  { %3092 = vmatprep.subr.bf16.mxu0 %v3399_v1 }
0x123c   :  { %v2142_v44 = vadd.f32 %v4210_v47, %v2132_v18  ;;  %v2147_v55 = vsel %vm236_vm2, %v4214_v23, 0.0 }
0x123d   :  { %2148 = vadd.xlane.f32.xlu0 %v2147_v55 }
0x123e   :  { %v2150_v11 = vsel %vm236_vm2, %v2142_v44, 0.0  ;;  %3093 = vmatpush3.bf16.msra.mxu0 %v3193_v59 }
0x123f   :  { %v2116_v13 = vpop.f32.mrb[88].mxu1  ;;  %3122 = vmatprep.subr.bf16.mxu0 %v3399_v1 }
0x1240   :  { %v2133_v26 = vadd.f32 %v2116_v13, %v3939_v40  ;;  %v3084_v29 = vpop.f32.mrb[89].mxu1 }
0x1241   :  { %2151 = vadd.xlane.f32.xlu0 %v2150_v11  ;;  %v2119_v35 = vpop.f32.mrb[90].mxu1 }
0x1242   :  { %v2143_v6 = vadd.f32 %v4210_v47, %v2133_v26  ;;  %v2134_v52 = vadd.f32 %v2119_v35, %v3942_v46  ;;  %v3085_v53 = vpop.f32.mrb[91].mxu1 }
0x1244   :  { %v4225_v25 = vadd.f32 %v4210_v47, %v2134_v52  ;;  %v2153_v33 = vsel %vm236_vm2, %v2143_v6, 0.0 }
0x1245   :  { %2154 = vadd.xlane.f32.xlu1 %v2153_v33  ;;  %v3372_v33 = vld [vmem:[%s4367_s3 + $0x8] sm:$0xff] }
0x1246   :  { %v2156_v40 = vsel %vm236_vm2, %v4225_v25, 0.0 }
0x1247   :  { %2157 = vadd.xlane.f32.xlu0 %v2156_v40 }
0x1249   :  { %1931 = vadd.xlane.f32.xlu1 %v1930_v2  ;;  %v4258_v2 = vrot.slane %v3372_v33, %v1113_v24 }
0x124b   :  { %1934 = vadd.xlane.f32.xlu0 %v1933_v56 }
0x12ca   :  { %v2149_v46 = vpop.xlane.xlu0 %2148 }
0x12cb   :  { %v2165_v22 = vmul.f32 0.03125, %v2149_v46 }
0x12cd   :  { %v2171_v58 = vsub.f32 %v4214_v23, %v2165_v22 }
0x12ce   :  { %v2152_v45 = vpop.xlane.xlu0 %2151 }
0x12cf   :  { %v2166_v3 = vmul.f32 0.03125, %v2152_v45  ;;  %v2177_v19 = vmul.f32 %v2171_v58, %v2171_v58 }
0x12d1   :  { %v2172_v43 = vsub.f32 %v2142_v44, %v2166_v3  ;;  %v2183_v27 = vsel %vm236_vm2, %v2177_v19, 0.0 }
0x12d2   :  { %2184 = vadd.xlane.f32.xlu1 %v2183_v27  ;;  %v2155_v0 = vpop.xlane.xlu1 %2154 }
0x12d3   :  { %v2167_v14 = vmul.f32 0.03125, %v2155_v0  ;;  %v2178_v48 = vmul.f32 %v2172_v43, %v2172_v43 }
0x12d4   :  { %v2158_v37 = vpop.xlane.xlu0 %2157 }
0x12d5   :  { %v2173_v30 = vsub.f32 %v2143_v6, %v2167_v14  ;;  %v2168_v49 = vmul.f32 0.03125, %v2158_v37  ;;  %v2186_v42 = vsel %vm236_vm2, %v2178_v48, 0.0 }
0x12d6   :  { %v1932_v39 = vpop.xlane.xlu1 %1931  ;;  %2187 = vadd.xlane.f32.xlu0 %v2186_v42 }
0x12d7   :  { %v2174_v4 = vsub.f32 %v4225_v25, %v2168_v49  ;;  %3340 = vrcp.f32 %v1932_v39  ;;  %v2179_v20 = vmul.f32 %v2173_v30, %v2173_v30 }
0x12d8   :  { %v1935_v61 = vpop.xlane.xlu0 %1934 }
0x12d9   :  { %3342 = vrcp.f32 %v1935_v61  ;;  %v2189_v16 = vsel %vm236_vm2, %v2179_v20, 0.0  ;;  %v2180_v8 = vmul.f32 %v2174_v4, %v2174_v4  ;;  %v3195_v20 = vld [vmem:[%s4366_s2 + $0x88] sm:$0xff]  }
0x12da   :  { %2190 = vadd.xlane.f32.xlu1 %v2189_v16 }
0x12db   :  { %v2192_v5 = vsel %vm236_vm2, %v2180_v8, 0.0 }
0x12dc   :  { %2193 = vadd.xlane.f32.xlu0 %v2192_v5 }
0x12e1   :  { %v3341_v21 = vpop.eup %3340 }
0x12e2   :  { %v1946_v34 = vmul.f32 %v3341_v21, %v3337_v10  ;;  %v4254_v10 = vrot.slane %v3372_v33, %v1103_v50 }
0x12e3   :  { %v3343_v9 = vpop.eup %3342 }
0x12e4   :  { %v1947_v62 = vmul.f32 %v3343_v9, %v3339_v36 }
0x12e6   :  { %v1950_v41 = vpack.c.bf16 %v1947_v62, %v1946_v34  ;;  %v4291_v34 = vrot.slane %v4012_v38, %v3908_v63 }
0x12e8   :  { %3071 = vmatmul.mubr.msk.bf16.gmra.mrb[80].mxu0 %vm63_vm0, %v1950_v41 }
0x12e9   :  { %3094 = vmatprep.mubr.msk.bf16.mxu0 %vm3400_vm1, %v3399_v1 }
0x135f   :  { %v2185_v15 = vpop.xlane.xlu1 %2184 }
0x1360   :  { %v2201_v18 = vmul.f32 0.03125, %v2185_v15 }
0x1362   :  { %v2207_v31 = vadd.f32 1e-06, %v2201_v18 }
0x1363   :  { %v2188_v44 = vpop.xlane.xlu0 %2187 }
0x1364   :  { %3344 = vrsqrt.f32 %v2207_v31  ;;  %v2202_v55 = vmul.f32 0.03125, %v2188_v44 }
0x1366   :  { %v2208_v13 = vadd.f32 1e-06, %v2202_v55 }
0x1367   :  { %v2191_v26 = vpop.xlane.xlu1 %2190 }
0x1368   :  { %3346 = vrsqrt.f32 %v2208_v13  ;;  %v2203_v29 = vmul.f32 0.03125, %v2191_v26 }
0x1369   :  { %v2194_v11 = vpop.xlane.xlu0 %2193 }
0x136a   :  { %v2209_v35 = vadd.f32 1e-06, %v2203_v29  ;;  %v2204_v6 = vmul.f32 0.03125, %v2194_v11 }
0x136c   :  { %3348 = vrsqrt.f32 %v2209_v35  ;;  %v2210_v52 = vadd.f32 1e-06, %v2204_v6 }
0x136e   :  { %v3345_v53 = vpop.eup %3344  ;;  %3350 = vrsqrt.f32 %v2210_v52 }
0x136f   :  { %v2219_v40 = vmul.f32 %v3345_v53, %v2171_v58 }
0x1371   :  { %v2229_v56 = vmul.f32 %v4254_v10, %v2219_v40 }
0x1372   :  { %v3347_v36 = vpop.eup %3346 }
0x1373   :  { %v2220_v46 = vmul.f32 %v3347_v36, %v2172_v43  ;;  %v2239_v3 = vadd.f32 %v4258_v2, %v2229_v56 }
0x1375   :  { %v2230_v22 = vmul.f32 %v4254_v10, %v2220_v46 }
0x1376   :  { %v3349_v45 = vpop.eup %3348 }
0x1377   :  { %v2240_v19 = vadd.f32 %v4258_v2, %v2230_v22  ;;  %v2221_v27 = vmul.f32 %v3349_v45, %v2173_v30 }
0x1378   :  { %v3351_v0 = vpop.eup %3350 }
0x1379   :  { %v2222_v50 = vmul.f32 %v3351_v0, %v2174_v4  ;;  %v2245_v14 = vpack.c.bf16 %v2240_v19, %v2239_v3  ;;  %v2231_v17 = vmul.f32 %v4254_v10, %v2221_v27  ;;  %v3194_v4 = vld [vmem:[%s4366_s2 + $0x80] sm:$0xff]  }
0x137a   :  { %3107 = vmatpush3.bf16.xpose.msra.mxu1 %v3194_v4 }
0x137b   :  { %3095 = vmatmul.mubr.msk.bf16.vlgmr.msra.gmra.mrb[84].mxu0 %vm236_vm2, %v2245_v14  ;;  %v2232_v24 = vmul.f32 %v4254_v10, %v2222_v50  ;;  %v2241_v43 = vadd.f32 %v4258_v2, %v2231_v17  ;;  %3108 = vmatprep.subr.bf16.mxu1 %v3399_v1 }
0x137c   :  { %3098 = vmatprep.mubr.msk.bf16.mxu0 %vm3400_vm1, %v3399_v1 }
0x137d   :  { %v2242_v58 = vadd.f32 %v4258_v2, %v2232_v24 }
0x137f   :  { %v2246_v48 = vpack.c.bf16 %v2242_v58, %v2241_v43 }
0x1382   :  { %3109 = vmatpush3.bf16.xpose.msra.mxu1 %v3195_v20 }
0x1383   :  { %3099 = vmatmul.mubr.msk.bf16.gmra.mrb[88].mxu0 %vm236_vm2, %v2246_v48 }
0x1384   :  { %3102 = vmatprep.mubr.msk.bf16.mxu0 %vm3400_vm1, %v3399_v1 }
0x13bb   :  { %v2019_v37 = vpop.f32.mrb[80].mxu0 }
0x13bc   :  { %v3072_v30 = vpop.f32.mrb[81].mxu0 }
0x13bd   :  { %v2022_v49 = vpop.f32.mrb[82].mxu0 }
0x13be   :  { %v3174_v42 = vpack.i.bf16 %v2022_v49, %v2019_v37  ;;  %v3073_v39 = vpop.f32.mrb[83].mxu0 }
0x13c0   :  { %3175 = vrot.lane.b32.xlu1 %v3174_v42, %s3408_s23 }
0x1432   :  { %v3176_v61 = vpop.permute.xlu1 %3175 }
0x1433   :  { %v3178_v16 = vunpack.i.h.bf16 %v3176_v61  ;;  %v3177_v8 = vunpack.i.l.bf16 %v3176_v61 }
0x1435   :  { %v2055_v5 = vsel %vm448_vm3, %v4191_v51, %v3178_v16  ;;  %v2054_v21 = vsel %vm448_vm3, %v4189_v32, %v3177_v8 }
0x1436   :  { %v2058_v9 = vpack.c.bf16 %v2055_v5, %v2054_v21 }
0x1438   :  { %3087 = vmatmul.mubr.msk.bf16.gmra.mrb[92].mxu1 %vm236_vm2, %v2058_v9 }
0x1439   :  { %3110 = vmatprep.mubr.msk.bf16.mxu1 %vm3400_vm1, %v3399_v1 }
0x144e   :  { %v2307_v62 = vpop.f32.mrb[84].mxu0 }
0x144f   :  { %v2308_v41 = vadd.f32 %v2307_v62, %v4291_v34  ;;  %v3096_v28 = vpop.f32.mrb[85].mxu0 }
0x1450   :  { %v2310_v59 = vpop.f32.mrb[86].mxu0 }
0x1451   :  { %v2330_v15 = vmul.f32 %v2308_v41, %v2308_v41  ;;  %v2311_v51 = vadd.f32 %v2310_v59, %v4291_v34  ;;  %v3097_v18 = vpop.f32.mrb[87].mxu0 }
0x1453   :  { %v2336_v32 = vmul.f32 %v2330_v15, %v2308_v41  ;;  %v2331_v31 = vmul.f32 %v2311_v51, %v2311_v51 }
0x1455   :  { %v2342_v44 = vmul.f32 0.044715, %v2336_v32  ;;  %v2337_v55 = vmul.f32 %v2331_v31, %v2311_v51 }
0x1456   :  { %v2315_v13 = vpop.f32.mrb[88].mxu0 }
0x1457   :  { %v2348_v26 = vadd.f32 %v2342_v44, %v2308_v41  ;;  %v2343_v29 = vmul.f32 0.044715, %v2337_v55  ;;  %v2316_v11 = vadd.f32 %v2315_v13, %v4291_v34  ;;  %v3100_v38 = vpop.f32.mrb[89].mxu0 }
0x1458   :  { %v2318_v35 = vpop.f32.mrb[90].mxu0 }
0x1459   :  { %v2354_v6 = vmul.f32 0.7978846, %v2348_v26  ;;  %v2349_v52 = vadd.f32 %v2343_v29, %v2311_v51  ;;  %v2332_v53 = vmul.f32 %v2316_v11, %v2316_v11  ;;  %v2319_v33 = vadd.f32 %v2318_v35, %v4291_v34  ;;  %v3101_v40 = vpop.f32.mrb[91].mxu0 }
0x145b   :  { %3352 = vtanh.f32 %v2354_v6  ;;  %v2355_v36 = vmul.f32 0.7978846, %v2349_v52  ;;  %v2338_v56 = vmul.f32 %v2332_v53, %v2316_v11  ;;  %v2333_v46 = vmul.f32 %v2319_v33, %v2319_v33 }
0x145d   :  { %3354 = vtanh.f32 %v2355_v36  ;;  %v2344_v22 = vmul.f32 0.044715, %v2338_v56  ;;  %v2339_v45 = vmul.f32 %v2333_v46, %v2319_v33 }
0x145f   :  { %v2350_v3 = vadd.f32 %v2344_v22, %v2316_v11  ;;  %v2345_v19 = vmul.f32 0.044715, %v2339_v45 }
0x1461   :  { %v2356_v27 = vmul.f32 0.7978846, %v2350_v3  ;;  %v2351_v0 = vadd.f32 %v2345_v19, %v2319_v33 }
0x1463   :  { %3356 = vtanh.f32 %v2356_v27  ;;  %v2357_v50 = vmul.f32 0.7978846, %v2351_v0 }
0x1465   :  { %v3353_v14 = vpop.eup %3352  ;;  %3358 = vtanh.f32 %v2357_v50 }
0x1466   :  { %v2366_v17 = vadd.f32 1.0, %v3353_v14 }
0x1467   :  { %v3355_v24 = vpop.eup %3354 }
0x1468   :  { %v2372_v58 = vmul.f32 0.5, %v2366_v17  ;;  %v2367_v43 = vadd.f32 1.0, %v3355_v24 }
0x146a   :  { %v2373_v48 = vmul.f32 0.5, %v2367_v43  ;;  %v2378_v37 = vmul.f32 %v2372_v58, %v2308_v41  ;;  %v3196_v43 = vld [vmem:[%s4366_s2 + $0x10] sm:$0xff]  }
0x146b   :  { %3123 = vmatpush3.bf16.msra.mxu0 %v3196_v43 }
0x146c   :  { %v2379_v30 = vmul.f32 %v2373_v48, %v2311_v51  ;;  %3124 = vmatprep.subr.bf16.mxu0 %v3399_v1  ;;  %v3197_v48 = vld [vmem:[%s4366_s2 + $0x18] sm:$0xff]  }
0x146d   :  { %v3357_v49 = vpop.eup %3356 }
0x146e   :  { %v2384_v42 = vpack.c.bf16 %v2379_v30, %v2378_v37  ;;  %v2368_v39 = vadd.f32 1.0, %v3357_v49 }
0x146f   :  { %v3359_v4 = vpop.eup %3358  ;;  %3125 = vmatpush3.bf16.msra.mxu0 %v3197_v48 }
0x1470   :  { %3111 = vmatmul.mubr.bf16.vlgmr.msra.gmra.mrb[96].mxu1 %v2384_v42  ;;  %v2369_v20 = vadd.f32 1.0, %v3359_v4  ;;  %v2374_v61 = vmul.f32 0.5, %v2368_v39  ;;  %3130 = vmatprep.subr.bf16.mxu0 %v3399_v1 }
0x1471   :  { %3114 = vmatprep.mubr.msk.bf16.mxu1 %vm3400_vm1, %v3399_v1 }
0x1472   :  { %v2375_v16 = vmul.f32 0.5, %v2369_v20  ;;  %v2380_v8 = vmul.f32 %v2374_v61, %v2316_v11 }
0x1474   :  { %v2381_v5 = vmul.f32 %v2375_v16, %v2319_v33 }
0x1476   :  { %v2385_v21 = vpack.c.bf16 %v2381_v5, %v2380_v8 }
0x1478   :  { %3115 = vmatmul.mubr.bf16.gmra.mrb[100].mxu1 %v2385_v21 }
0x1479   :  { %3118 = vmatprep.mubr.msk.bf16.mxu1 %vm3400_vm1, %v3399_v1 }
0x150b   :  { %v2124_v9 = vpop.f32.mrb[92].mxu1 }
0x150c   :  { %v2135_v62 = vadd.f32 %v2124_v9, %v3949_v7  ;;  %v3088_v41 = vpop.f32.mrb[93].mxu1 }
0x150d   :  { %v2127_v28 = vpop.f32.mrb[94].mxu1 }
0x150e   :  { %v2145_v59 = vadd.f32 %v4210_v47, %v2135_v62  ;;  %v2136_v15 = vadd.f32 %v2127_v28, %v3952_v57  ;;  %v3089_v51 = vpop.f32.mrb[95].mxu1  ;;  %v3373_v57 = vld [vmem:[%s4367_s3 + $0x10] sm:$0xff] }
0x150f   :  { %v3374_v51 = vld [vmem:[%s4367_s3] sm:$0xff] }
0x1510   :  { %v2146_v18 = vadd.f32 %v4210_v47, %v2136_v15  ;;  %v2159_v32 = vsel %vm236_vm2, %v2145_v59, 0.0  ;;  %v2457_v47 = vrot.slane %v3373_v57, %v3924_v12 }
0x1511   :  { %2160 = vadd.xlane.f32.xlu0 %v2159_v32  ;;  %v2487_v32 = vrot.slane %v3374_v51, %v3802_v54 }
0x1512   :  { %v2162_v31 = vsel %vm236_vm2, %v2146_v18, 0.0 }
0x1515   :  { %2163 = vadd.xlane.f32.xlu0 %v2162_v31 }
0x1543   :  { %v2433_v44 = vpop.f32.mrb[96].mxu1 }
0x1544   :  { %v3112_v55 = vpop.f32.mrb[97].mxu1  ;;  %v2452_v38 = vadd.f32 %v2433_v44, %v4214_v23 }
0x1545   :  { %v2436_v13 = vpop.f32.mrb[98].mxu1 }
0x1546   :  { %v3113_v26 = vpop.f32.mrb[99].mxu1  ;;  %v2458_v53 = vadd.f32 %v2457_v47, %v2452_v38  ;;  %v3198_v13 = vld [vmem:[%s4366_s2 + $0x20] sm:$0xff]  }
0x154b   :  { %v2440_v7 = vpop.f32.mrb[100].mxu1 }
0x154c   :  { %v3116_v29 = vpop.f32.mrb[101].mxu1 }
0x154d   :  { %v2442_v11 = vpop.f32.mrb[102].mxu1 }
0x154e   :  { %v2453_v35 = vadd.f32 %v2442_v11, %v4225_v25  ;;  %v3117_v6 = vpop.f32.mrb[103].mxu1 }
0x1550   :  { %v2459_v52 = vadd.f32 %v2457_v47, %v2453_v35 }
0x1552   :  { %v2461_v33 = vrot.slane %v2459_v52, 7 }
0x1554   :  { %v2464_v40 = vsel %vm2463_vm8, %v2458_v53, %v2461_v33 }
0x1555   :  { %v2466_v36 = vsel %vm2465_vm9, %v2464_v40, 0.0 }
0x1556   :  { %2467 = vadd.xlane.f32.xlu0 %v2466_v36 }
0x159e   :  { %v2161_v56 = vpop.xlane.xlu0 %2160 }
0x159f   :  { %v2169_v23 = vmul.f32 0.03125, %v2161_v56 }
0x15a1   :  { %v2175_v46 = vsub.f32 %v2145_v59, %v2169_v23 }
0x15a2   :  { %v2164_v22 = vpop.xlane.xlu0 %2163 }
0x15a3   :  { %v2170_v45 = vmul.f32 0.03125, %v2164_v22  ;;  %v2181_v3 = vmul.f32 %v2175_v46, %v2175_v46 }
0x15a5   :  { %v2176_v19 = vsub.f32 %v2146_v18, %v2170_v45  ;;  %v2195_v27 = vsel %vm236_vm2, %v2181_v3, 0.0 }
0x15a6   :  { %2196 = vadd.xlane.f32.xlu0 %v2195_v27 }
0x15a7   :  { %v2182_v25 = vmul.f32 %v2176_v19, %v2176_v19 }
0x15a9   :  { %v2198_v0 = vsel %vm236_vm2, %v2182_v25, 0.0  ;;  %v2498_v25 = vrot.slane %v3374_v51, %v3908_v63 }
0x15aa   :  { %2199 = vadd.xlane.f32.xlu1 %v2198_v0 }
0x15e3   :  { %v2468_v50 = vpop.xlane.xlu0 %2467 }
0x15e4   :  { %v2469_v14 = vmul.f32 0.03125, %v2468_v50 }
0x15e6   :  { %v2470_v17 = vsub.f32 %v2464_v40, %v2469_v14 }
0x15e8   :  { %v2471_v24 = vmul.f32 %v2470_v17, %v2470_v17 }
0x15ea   :  { %v2472_v58 = vsel %vm2465_vm9, %v2471_v24, 0.0 }
0x15eb   :  { %2473 = vadd.xlane.f32.xlu0 %v2472_v58 }
0x1633   :  { %v2197_v37 = vpop.xlane.xlu0 %2196 }
0x1634   :  { %v2205_v30 = vmul.f32 0.03125, %v2197_v37 }
0x1636   :  { %v2211_v49 = vadd.f32 1e-06, %v2205_v30 }
0x1637   :  { %v2200_v42 = vpop.xlane.xlu1 %2199 }
0x1638   :  { %3360 = vrsqrt.f32 %v2211_v49  ;;  %v2206_v39 = vmul.f32 0.03125, %v2200_v42  ;;  %v2564_v42 = vrot.slane %v3374_v51, %v3924_v12 }
0x163a   :  { %v2212_v4 = vadd.f32 1e-06, %v2206_v39 }
0x163c   :  { %3362 = vrsqrt.f32 %v2212_v4 }
0x1642   :  { %v3361_v20 = vpop.eup %3360 }
0x1643   :  { %v2223_v61 = vmul.f32 %v3361_v20, %v2175_v46 }
0x1645   :  { %v2233_v5 = vmul.f32 %v4254_v10, %v2223_v61 }
0x1646   :  { %v3363_v16 = vpop.eup %3362 }
0x1647   :  { %v2224_v8 = vmul.f32 %v3363_v16, %v2176_v19  ;;  %v2243_v9 = vadd.f32 %v4258_v2, %v2233_v5 }
0x1649   :  { %v2234_v21 = vmul.f32 %v4254_v10, %v2224_v8  ;;  %v2482_v10 = vrot.slane %v3374_v51, %v3584_v60  ;;  %v3199_v60 = vld [vmem:[%s4366_s2 + $0x28] sm:$0xff]   ;;  %s3409_s2 = smov [#allocation2]  }
0x164a   :  { %s2627_s8 = sshll.u32 %s3409_s2, 4  ;;  %s2628_s8 = int_to_ptr.vmem [resolvable:$true] %s2627_s8 }
0x164b   :  { %v2244_v62 = vadd.f32 %v4258_v2, %v2234_v21  ;;  %s3375_s9 = scalar_lea.vmem %s2628_s8, 32  ;;  %p3380_p1 = scmp.lt.s32.totalorder %s2628_s8, %s2628_s8 }
0x164c   :  { %p3376_p0 = scmp.ne.s32.totalorder %s2628_s8, %s3375_s9  ;;  %p3381_p2 = scmp.lt.s32.totalorder %s3375_s9, %s3375_s9 }
0x164d   :  { %v2247_v41 = vpack.c.bf16 %v2244_v62, %v2243_v9 }
0x164e   :  { %p3382_p3 = por %p3381_p2, %p3380_p1 }
0x164f   :  { %3103 = vmatmul.mubr.msk.bf16.gmra.mrb[92].mxu0 %vm236_vm2, %v2247_v41 }
0x1650   :  { %3126 = vmatprep.mubr.msk.bf16.mxu0 %vm3400_vm1, %v3399_v1  ;;  %p3383_p4 = pnand %p3382_p3, %p3376_p0 }
0x1678   :  { %v2474_v28 = vpop.xlane.xlu0 %2473 }
0x1679   :  { %v2475_v59 = vmul.f32 0.03125, %v2474_v28 }
0x167b   :  { %v2476_v15 = vadd.f32 1e-06, %v2475_v59 }
0x167d   :  { %3364 = vrsqrt.f32 %v2476_v15 }
0x1687   :  { %v3365_v18 = vpop.eup %3364 }
0x1688   :  { %v2478_v2 = vmul.f32 %v3365_v18, %v2470_v17 }
0x168a   :  { %v2483_v31 = vmul.f32 %v2482_v10, %v2478_v2 }
0x168c   :  { %v2488_v44 = vadd.f32 %v2487_v32, %v2483_v31 }
0x168e   :  { %v2489_v55 = vpack.c.bf16 %v2488_v44, %v2488_v44 }
0x1690   :  { %3127 = vmatmul.mubr.msk.bf16.vlgmr.msra.gmra.mrb[96].mxu0 %vm236_vm2, %v2489_v55 }
0x1691   :  { %3134 = vmatprep.mubr.msk.bf16.mxu0 %vm3400_vm1, %v3399_v1  ;;  %3131 = vmatpush3.bf16.msra.mxu0 %v3198_v13 }
0x1692   :  { %3132 = vmatprep.subr.bf16.mxu0 %v3399_v1 }
0x1695   :  { %3133 = vmatpush3.bf16.msra.mxu0 %v3199_v60 }
0x1722   :  { %v2323_v54 = vpop.f32.mrb[92].mxu0 }
0x1723   :  { %v2324_v26 = vadd.f32 %v2323_v54, %v4291_v34  ;;  %v3104_v7 = vpop.f32.mrb[93].mxu0 }
0x1724   :  { %v2326_v29 = vpop.f32.mrb[94].mxu0 }
0x1725   :  { %v2334_v11 = vmul.f32 %v2324_v26, %v2324_v26  ;;  %v2327_v38 = vadd.f32 %v2326_v29, %v4291_v34  ;;  %v3105_v57 = vpop.f32.mrb[95].mxu0 }
0x1727   :  { %v2340_v47 = vmul.f32 %v2334_v11, %v2324_v26  ;;  %v2335_v35 = vmul.f32 %v2327_v38, %v2327_v38 }
0x1729   :  { %v2346_v6 = vmul.f32 0.044715, %v2340_v47  ;;  %v2341_v52 = vmul.f32 %v2335_v35, %v2327_v38 }
0x172b   :  { %v2352_v53 = vadd.f32 %v2346_v6, %v2324_v26  ;;  %v2347_v1 = vmul.f32 0.044715, %v2341_v52 }
0x172d   :  { %v2358_v33 = vmul.f32 0.7978846, %v2352_v53  ;;  %v2353_v40 = vadd.f32 %v2347_v1, %v2327_v38 }
0x172f   :  { %3366 = vtanh.f32 %v2358_v33  ;;  %v2359_v36 = vmul.f32 0.7978846, %v2353_v40 }
0x1731   :  { %3368 = vtanh.f32 %v2359_v36 }
0x1739   :  { %v3367_v56 = vpop.eup %3366 }
0x173a   :  { %v2370_v23 = vadd.f32 1.0, %v3367_v56 }
0x173b   :  { %v3369_v46 = vpop.eup %3368 }
0x173c   :  { %v2371_v22 = vadd.f32 1.0, %v3369_v46  ;;  %v2376_v45 = vmul.f32 0.5, %v2370_v23 }
0x173e   :  { %v2377_v3 = vmul.f32 0.5, %v2371_v22  ;;  %v2382_v19 = vmul.f32 %v2376_v45, %v2324_v26 }
0x1740   :  { %v2383_v34 = vmul.f32 %v2377_v3, %v2327_v38 }
0x1742   :  { %v2386_v27 = vpack.c.bf16 %v2383_v34, %v2382_v19 }
0x1744   :  { %3119 = vmatmul.mubr.bf16.gmra.mrb[104].mxu1 %v2386_v27 }
0x1763   :  { %v2548_v0 = vpop.f32.mrb[96].mxu0 }
0x1764   :  { %v2549_v50 = vadd.f32 %v2548_v0, %v2498_v25  ;;  %v3128_v14 = vpop.f32.mrb[97].mxu0 }
0x1765   :  { %v2551_v17 = vpop.f32.mrb[98].mxu0 }
0x1766   :  { %v2554_v24 = vmax.f32 %v2549_v50, 0.0  ;;  %v3129_v58 = vpop.f32.mrb[99].mxu0 }
0x1768   :  { %v2555_v43 = vpack.c.bf16 %v2554_v24, %v2554_v24 }
0x176a   :  { %3135 = vmatmul.mubr.msk.bf16.vlgmr.msra.gmra.mrb[100].mxu0 %vm236_vm2, %v2555_v43 }
0x1817   :  { %v2447_v48 = vpop.f32.mrb[104].mxu1 }
0x1818   :  { %v3120_v37 = vpop.f32.mrb[105].mxu1 }
0x1819   :  { %v2449_v30 = vpop.f32.mrb[106].mxu1 }
0x181a   :  { %v3121_v49 = vpop.f32.mrb[107].mxu1 }
0x183d   :  { %v2614_v39 = vpop.f32.mrb[100].mxu0 }
0x183e   :  { %v2615_v4 = vadd.f32 %v2614_v39, %v2564_v42  ;;  %v3136_v63 = vpop.f32.mrb[101].mxu0 }
0x183f   :  { %v2617_v20 = vpop.f32.mrb[102].mxu0 }
0x1840   :  { %2620 = vst [vmem:[#allocation2] sm:$0x3] %v2615_v4  ;;  %v3137_v61 = vpop.f32.mrb[103].mxu0 }
0x1841   :  { %3386 = shalt.err (!%p3383_p4)
}
0x1842   :  { %s3387_s11 = scalar_lea.hbm %s4368_s4, 32 }
0x1843   :  { %p3388_p5 = scmp.ne.s32.totalorder %s4368_s4, %s3387_s11  ;;  %p3391_p6 = scmp.lt.u32.totalorder %s3387_s11, %s4368_s4 }
0x1845   :  { %p3393_p7 = pnand %p3391_p6, %p3388_p5 }
0x1847   :  { %3396 = shalt.err (!%p3393_p7)
}
0x1848   :  { %2630 = dma.vmem_to_hbm [thread:$0]  %s2628_s8, 32, %s4368_s4, [#allocation3]  }
0x1849   :  { %3397 = dma.done.wait [#allocation3], 32  }
0x184a   :  { %3398 = vsyncadd [#allocation3], 4294967264 }
0x184b   :  { %2634 = vsyncpa [#allocation3], 1 }

</bundles_post_ra>
